<compile_context>
chip_gen: v7x
topology: tpu7x:2x2x1
jax: 0.10.0
libtpu: 0.0.40
codegen_flags: <defaults>
</compile_context>

<pallas_src>
import functools

import jax
import jax.numpy as jnp
from jax.experimental import pallas as pl
from jax.experimental.pallas import tpu as pltpu

EPS = 1e-5
NEG_SLOPE = 0.01  # nn.LeakyReLU() default negative_slope


def _round_up(x, m):
    return (x + m - 1) // m * m


# ----------------------------- Pallas kernel --------------------------------
def _conv_in_act_kernel(x_ref, w_ref, o_ref, xs_ref, *, kh, kw, h, w, wp, cin_pad,
                        apply_leaky):
    """Fused stride-1 Conv2d + InstanceNorm2d (+ LeakyReLU) for one sample.

    x_ref  : (Cin_pad, Lflat)        bf16  row-major flattened padded image (+ zero tail)
    w_ref  : (Cout, KH*KW*Cin_pad)   bf16  lane-dense folded weights (tap-major rows)
    o_ref  : (Cout, Lout)            bf16/f32  lane-dense output, Lout % 128 == 0
    xs_ref : (KH*KW*Cin_pad, Lout)   bf16  VMEM scratch: stacked shifted slices
    """
    lout = o_ref.shape[1]
    x = x_ref[...]                                       # (Cin_pad, Lflat), loaded once

    # Assemble the folded-K operand: row block t = ki*kw + kj holds the image
    # shifted by tap (ki, kj); the whole conv then becomes ONE MXU contraction.
    for ki in range(kh):
        for kj in range(kw):
            t = ki * kw + kj
            s = ki * wp + kj
            xs_ref[t * cin_pad:(t + 1) * cin_pad, :] = x[:, s:s + lout]

    # Single matmul: bf16 operands, f32 accumulation.  No bias add — the no-affine
    # InstanceNorm right after subtracts the per-channel mean, cancelling it exactly.
    acc = jnp.dot(w_ref[...], xs_ref[...], preferred_element_type=jnp.float32)

    # Valid-lane mask built in-kernel: lane l is real output iff it falls inside one
    # of the h row windows [r*wp, r*wp + w).  Unrolled compares (h is small) avoid
    # relying on vector integer mod support and drop the mask DMA entirely.
    idx = jax.lax.broadcasted_iota(jnp.int32, (1, lout), 1)
    valid = idx < 0                                      # all-False start
    for r in range(h):
        valid = jnp.logical_or(
            valid, jnp.logical_and(idx >= r * wp, idx < r * wp + w))
    mask = valid.astype(jnp.float32)
    inv_cnt = 1.0 / float(h * w)

    # Two-pass InstanceNorm2d (biased variance, eps=1e-5, no affine) over valid lanes.
    mean = jnp.sum(acc * mask, axis=1, keepdims=True) * inv_cnt
    cen = (acc - mean) * mask
    var = jnp.sum(cen * cen, axis=1, keepdims=True) * inv_cnt
    y = (acc - mean) * jax.lax.rsqrt(var + EPS)
    if apply_leaky:
        y = jnp.maximum(y, NEG_SLOPE * y)
    o_ref[...] = y.astype(o_ref.dtype)


# ------------------------------ conv wrapper ---------------------------------
def conv_instnorm(x_nchw, w_oihw, *, pad, pad_mode, apply_leaky,
                  out_dtype=jnp.float32):
    """Conv2d(stride=1, pad) + InstanceNorm2d (+ LeakyReLU) via one Pallas kernel."""
    n, cin, h, w = x_nchw.shape
    cout, cin_w, kh, kw = w_oihw.shape
    assert cin == cin_w
    # The shifted-lane-window formulation assumes a "same"-style conv with this pad.
    assert kh == 2 * pad + 1 and kw == 2 * pad + 1, (kh, kw, pad)
    if pad_mode == "reflect":
        assert pad < h and pad < w, "reflect pad must be smaller than the image"

    hp, wp = h + 2 * pad, w + 2 * pad
    lout = _round_up(h * wp, 128)                    # lane-dense, 128-aligned output
    cin_pad = _round_up(cin, 16)                     # bf16 sublane-packed tap row blocks
    kdim = kh * kw * cin_pad                         # folded contraction length
    max_shift = (kh - 1) * wp + (kw - 1)
    lflat = _round_up(max_shift + lout, 128)         # every tap slice stays in bounds

    xb = x_nchw.astype(jnp.bfloat16)
    xp = jnp.pad(xb, ((0, 0), (0, 0), (pad, pad), (pad, pad)),
                 mode="reflect" if pad_mode == "reflect" else "constant")
    xflat = xp.reshape(n, cin, hp * wp)
    xflat = jnp.pad(xflat, ((0, 0), (0, cin_pad - cin), (0, lflat - hp * wp)))

    # (Cout, Cin, KH, KW) -> lane-dense (Cout, KH*KW*Cin_pad), tap-major rows, zero-padded Cin.
    wt = jnp.transpose(w_oihw, (0, 2, 3, 1))                         # (Cout, KH, KW, Cin)
    wt = jnp.pad(wt, ((0, 0), (0, 0), (0, 0), (0, cin_pad - cin)))
    w2d = wt.reshape(cout, kdim).astype(jnp.bfloat16)

    kernel = functools.partial(_conv_in_act_kernel, kh=kh, kw=kw, h=h, w=w, wp=wp,
                               cin_pad=cin_pad, apply_leaky=apply_leaky)
    out_bytes = jnp.dtype(out_dtype).itemsize
    cost = pl.CostEstimate(
        flops=2 * n * cout * kdim * lout,
        transcendentals=n * cout,
        bytes_accessed=(n * cin_pad * lflat * 2 + cout * kdim * 2
                        + n * cout * lout * out_bytes))

    out = pl.pallas_call(
        kernel,
        out_shape=jax.ShapeDtypeStruct((n, cout, lout), out_dtype),
        grid=(n,),
        in_specs=[
            pl.BlockSpec((pl.Squeezed(), cin_pad, lflat), lambda i: (i, 0, 0)),
            pl.BlockSpec((cout, kdim), lambda i: (0, 0)),
        ],
        out_specs=pl.BlockSpec((pl.Squeezed(), cout, lout), lambda i: (i, 0, 0)),
        scratch_shapes=[pltpu.VMEM((kdim, lout), jnp.bfloat16)],
        compiler_params=pltpu.CompilerParams(
            dimension_semantics=("parallel",),
            vmem_limit_bytes=32 * 1024 * 1024),
        cost_estimate=cost,
    )(xflat, w2d)

    # Drop tail lanes and the (wp - w) reflect/zero pad columns per image row.
    return out[:, :, :h * wp].reshape(n, cout, h, wp)[:, :, :, :w]


# ------------------------- UnetUpConv forward (Pallas) ----------------------
def init_params(n, c_list, key):
    """Deterministic parameter init matching the module's layer shapes."""
    c = c_list[::-1] + [n]
    params = []
    for i in range(len(c) - 1):
        cin, cout = c[i] + 3, c[i + 1]
        key, k1, k2, k3, k4 = jax.random.split(key, 5)
        params.append({
            "w1": 0.05 * jax.random.normal(k1, (cout, cin, 7, 7), jnp.float32),
            "b1": 0.05 * jax.random.normal(k2, (cout,), jnp.float32),
            "w2": 0.05 * jax.random.normal(k3, (cout, cout, 3, 3), jnp.float32),
            "b2": 0.05 * jax.random.normal(k4, (cout,), jnp.float32),
        })
    return params


def unet_up_conv_forward(params, skips_nchw, x_nchw):
    # TODO(synk): fuse nearest-2x upsample + channel concat into the kernel input DMA.
    x = x_nchw
    nblocks = len(params)
    for i, p in enumerate(params):
        x = jnp.repeat(jnp.repeat(x, 2, axis=2), 2, axis=3)            # nearest 2x upsample
        x = jnp.concatenate([x, skips_nchw[-(i + 1)].astype(x.dtype)], axis=1)
        last = (i == nblocks - 1)
        # ReflectionPad2d(3) + Conv2d(k=7) + InstanceNorm + LeakyReLU  (bias cancelled by IN)
        x = conv_instnorm(x, p["w1"], pad=3, pad_mode="reflect",
                          apply_leaky=True, out_dtype=jnp.bfloat16)
        # Conv2d(k=3, pad=1 zero) + InstanceNorm                       (bias cancelled by IN)
        x = conv_instnorm(x, p["w2"], pad=1, pad_mode="zero",
                          apply_leaky=False,
                          out_dtype=jnp.float32 if last else jnp.bfloat16)
    return x


# ------------------------------ pure-JAX reference ---------------------------
def _conv_ref(x, w, b, pad, mode):
    xp = jnp.pad(x, ((0, 0), (0, 0), (pad, pad), (pad, pad)),
                 mode="reflect" if mode == "reflect" else "constant")
    y = jax.lax.conv_general_dilated(xp, w, (1, 1), "VALID",
                                     dimension_numbers=("NCHW", "OIHW", "NCHW"),
                                     precision=jax.lax.Precision.HIGHEST)
    return y + b[None, :, None, None]


def _inorm_ref(x):
    mean = jnp.mean(x, axis=(2, 3), keepdims=True)
    var = jnp.mean((x - mean) ** 2, axis=(2, 3), keepdims=True)
    return (x - mean) * jax.lax.rsqrt(var + EPS)


def ref_forward(params, skips, x):
    for i, p in enumerate(params):
        x = jnp.repeat(jnp.repeat(x, 2, axis=2), 2, axis=3)
        x = jnp.concatenate([x, skips[-(i + 1)]], axis=1)
        x = _inorm_ref(_conv_ref(x, p["w1"], p["b1"], 3, "reflect"))
        x = jnp.where(x > 0, x, NEG_SLOPE * x)
        x = _inorm_ref(_conv_ref(x, p["w2"], p["b2"], 1, "zero"))
    return x


# ------------------------------------ main -----------------------------------
if __name__ == "__main__":
    n_out = 4
    c_list = [4, 8]          # module arg `c`; c[::-1] + [n] = [8, 4, 4] -> two blocks
    key = jax.random.PRNGKey(0)
    key, kx, ks0, ks1, kp = jax.random.split(key, 5)

    # x: NCHW with channels = reversed c[0] = 8, spatial 4x4
    x = jax.random.normal(kx, (2, 8, 4, 4), jnp.float32)
    # skip connections (3 channels each); c[-1] used first (8x8), c[-2] second (16x16)
    skips = [jax.random.normal(ks0, (2, 3, 16, 16), jnp.float32),
             jax.random.normal(ks1, (2, 3, 8, 8), jnp.float32)]

    params = init_params(n_out, c_list, kp)

    fwd = jax.jit(unet_up_conv_forward)
    out = jax.block_until_ready(fwd(params, skips, x))
    assert out.shape == (2, 4, 16, 16), out.shape
    assert out.dtype == jnp.float32, out.dtype

    ref = jax.block_until_ready(ref_forward(params, skips, x))
    max_err = float(jnp.max(jnp.abs(out - ref)))
    assert max_err < 1e-1, f"mismatch vs reference: max abs diff = {max_err}"

    print("KERNEL_OK")
</pallas_src>

<mosaic_0001>
module attributes {stable_mosaic.version = 11 : i64} {
  func.func @_conv_in_act_kernel(%arg0: i32, %arg1: memref<1x16x256xbf16, #tpu.memory_space<vmem>>, %arg2: memref<4x784xbf16, #tpu.memory_space<vmem>>, %arg3: memref<1x4x128xbf16, #tpu.memory_space<vmem>>, %arg4: memref<784x128xbf16, #tpu.memory_space<vmem>>) attributes {dimension_semantics = [#tpu.dimension_semantics<parallel>], iteration_bounds = array<i64: 2>, scalar_prefetch = 0 : i64, scratch_operands = 1 : i64, tpu.core_type = #tpu.core_type<tc>, window_params = [{transform_indices = @transform_0, window_bounds = array<i64: 1, 16, 256>}, {pipeline_mode = #tpu.pipeline_mode<synchronous>, transform_indices = @transform_1, window_bounds = array<i64: 4, 784>}, {transform_indices = @transform_2, window_bounds = array<i64: 1, 4, 128>}]} {
    %c0 = arith.constant 0 : index
    %c0_0 = arith.constant 0 : index
    %c0_1 = arith.constant 0 : index
    %0 = vector.load %arg1[%c0, %c0_0, %c0_1] : memref<1x16x256xbf16, #tpu.memory_space<vmem>>, vector<1x16x256xbf16>
    %1 = vector.shape_cast %0 : vector<1x16x256xbf16> to vector<16x256xbf16>
    %2 = vector.extract_strided_slice %1 {offsets = [0, 0], sizes = [16, 128], strides = [1, 1]} : vector<16x256xbf16> to vector<16x128xbf16>
    %c0_2 = arith.constant 0 : index
    %c0_3 = arith.constant 0 : index
    %3 = vector.load %arg4[%c0_2, %c0_3] : memref<784x128xbf16, #tpu.memory_space<vmem>>, vector<16x128xbf16>
    tpu.vector_store %arg4[%c0_2, %c0_3], %2 {strides = array<i32>} : memref<784x128xbf16, #tpu.memory_space<vmem>>, vector<16x128xbf16>,
    %4 = vector.extract_strided_slice %1 {offsets = [0, 1], sizes = [16, 128], strides = [1, 1]} : vector<16x256xbf16> to vector<16x128xbf16>
    %c16 = arith.constant 16 : index
    %c0_4 = arith.constant 0 : index
    %5 = vector.load %arg4[%c16, %c0_4] : memref<784x128xbf16, #tpu.memory_space<vmem>>, vector<16x128xbf16>
    tpu.vector_store %arg4[%c16, %c0_4], %4 {strides = array<i32>} : memref<784x128xbf16, #tpu.memory_space<vmem>>, vector<16x128xbf16>,
    %6 = vector.extract_strided_slice %1 {offsets = [0, 2], sizes = [16, 128], strides = [1, 1]} : vector<16x256xbf16> to vector<16x128xbf16>
    %c32 = arith.constant 32 : index
    %c0_5 = arith.constant 0 : index
    %7 = vector.load %arg4[%c32, %c0_5] : memref<784x128xbf16, #tpu.memory_space<vmem>>, vector<16x128xbf16>
    tpu.vector_store %arg4[%c32, %c0_5], %6 {strides = array<i32>} : memref<784x128xbf16, #tpu.memory_space<vmem>>, vector<16x128xbf16>,
    %8 = vector.extract_strided_slice %1 {offsets = [0, 3], sizes = [16, 128], strides = [1, 1]} : vector<16x256xbf16> to vector<16x128xbf16>
    %c48 = arith.constant 48 : index
    %c0_6 = arith.constant 0 : index
    %9 = vector.load %arg4[%c48, %c0_6] : memref<784x128xbf16, #tpu.memory_space<vmem>>, vector<16x128xbf16>
    tpu.vector_store %arg4[%c48, %c0_6], %8 {strides = array<i32>} : memref<784x128xbf16, #tpu.memory_space<vmem>>, vector<16x128xbf16>,
    %10 = vector.extract_strided_slice %1 {offsets = [0, 4], sizes = [16, 128], strides = [1, 1]} : vector<16x256xbf16> to vector<16x128xbf16>
    %c64 = arith.constant 64 : index
    %c0_7 = arith.constant 0 : index
    %11 = vector.load %arg4[%c64, %c0_7] : memref<784x128xbf16, #tpu.memory_space<vmem>>, vector<16x128xbf16>
    tpu.vector_store %arg4[%c64, %c0_7], %10 {strides = array<i32>} : memref<784x128xbf16, #tpu.memory_space<vmem>>, vector<16x128xbf16>,
    %12 = vector.extract_strided_slice %1 {offsets = [0, 5], sizes = [16, 128], strides = [1, 1]} : vector<16x256xbf16> to vector<16x128xbf16>
    %c80 = arith.constant 80 : index
    %c0_8 = arith.constant 0 : index
    %13 = vector.load %arg4[%c80, %c0_8] : memref<784x128xbf16, #tpu.memory_space<vmem>>, vector<16x128xbf16>
    tpu.vector_store %arg4[%c80, %c0_8], %12 {strides = array<i32>} : memref<784x128xbf16, #tpu.memory_space<vmem>>, vector<16x128xbf16>,
    %14 = vector.extract_strided_slice %1 {offsets = [0, 6], sizes = [16, 128], strides = [1, 1]} : vector<16x256xbf16> to vector<16x128xbf16>
    %c96 = arith.constant 96 : index
    %c0_9 = arith.constant 0 : index
    %15 = vector.load %arg4[%c96, %c0_9] : memref<784x128xbf16, #tpu.memory_space<vmem>>, vector<16x128xbf16>
    tpu.vector_store %arg4[%c96, %c0_9], %14 {strides = array<i32>} : memref<784x128xbf16, #tpu.memory_space<vmem>>, vector<16x128xbf16>,
    %16 = vector.extract_strided_slice %1 {offsets = [0, 14], sizes = [16, 128], strides = [1, 1]} : vector<16x256xbf16> to vector<16x128xbf16>
    %c112 = arith.constant 112 : index
    %c0_10 = arith.constant 0 : index
    %17 = vector.load %arg4[%c112, %c0_10] : memref<784x128xbf16, #tpu.memory_space<vmem>>, vector<16x128xbf16>
    tpu.vector_store %arg4[%c112, %c0_10], %16 {strides = array<i32>} : memref<784x128xbf16, #tpu.memory_space<vmem>>, vector<16x128xbf16>,
    %18 = vector.extract_strided_slice %1 {offsets = [0, 15], sizes = [16, 128], strides = [1, 1]} : vector<16x256xbf16> to vector<16x128xbf16>
    %c128 = arith.constant 128 : index
    %c0_11 = arith.constant 0 : index
    %19 = vector.load %arg4[%c128, %c0_11] : memref<784x128xbf16, #tpu.memory_space<vmem>>, vector<16x128xbf16>
    tpu.vector_store %arg4[%c128, %c0_11], %18 {strides = array<i32>} : memref<784x128xbf16, #tpu.memory_space<vmem>>, vector<16x128xbf16>,
    %20 = vector.extract_strided_slice %1 {offsets = [0, 16], sizes = [16, 128], strides = [1, 1]} : vector<16x256xbf16> to vector<16x128xbf16>
    %c144 = arith.constant 144 : index
    %c0_12 = arith.constant 0 : index
    %21 = vector.load %arg4[%c144, %c0_12] : memref<784x128xbf16, #tpu.memory_space<vmem>>, vector<16x128xbf16>
    tpu.vector_store %arg4[%c144, %c0_12], %20 {strides = array<i32>} : memref<784x128xbf16, #tpu.memory_space<vmem>>, vector<16x128xbf16>,
    %22 = vector.extract_strided_slice %1 {offsets = [0, 17], sizes = [16, 128], strides = [1, 1]} : vector<16x256xbf16> to vector<16x128xbf16>
    %c160 = arith.constant 160 : index
    %c0_13 = arith.constant 0 : index
    %23 = vector.load %arg4[%c160, %c0_13] : memref<784x128xbf16, #tpu.memory_space<vmem>>, vector<16x128xbf16>
    tpu.vector_store %arg4[%c160, %c0_13], %22 {strides = array<i32>} : memref<784x128xbf16, #tpu.memory_space<vmem>>, vector<16x128xbf16>,
    %24 = vector.extract_strided_slice %1 {offsets = [0, 18], sizes = [16, 128], strides = [1, 1]} : vector<16x256xbf16> to vector<16x128xbf16>
    %c176 = arith.constant 176 : index
    %c0_14 = arith.constant 0 : index
    %25 = vector.load %arg4[%c176, %c0_14] : memref<784x128xbf16, #tpu.memory_space<vmem>>, vector<16x128xbf16>
    tpu.vector_store %arg4[%c176, %c0_14], %24 {strides = array<i32>} : memref<784x128xbf16, #tpu.memory_space<vmem>>, vector<16x128xbf16>,
    %26 = vector.extract_strided_slice %1 {offsets = [0, 19], sizes = [16, 128], strides = [1, 1]} : vector<16x256xbf16> to vector<16x128xbf16>
    %c192 = arith.constant 192 : index
    %c0_15 = arith.constant 0 : index
    %27 = vector.load %arg4[%c192, %c0_15] : memref<784x128xbf16, #tpu.memory_space<vmem>>, vector<16x128xbf16>
    tpu.vector_store %arg4[%c192, %c0_15], %26 {strides = array<i32>} : memref<784x128xbf16, #tpu.memory_space<vmem>>, vector<16x128xbf16>,
    %28 = vector.extract_strided_slice %1 {offsets = [0, 20], sizes = [16, 128], strides = [1, 1]} : vector<16x256xbf16> to vector<16x128xbf16>
    %c208 = arith.constant 208 : index
    %c0_16 = arith.constant 0 : index
    %29 = vector.load %arg4[%c208, %c0_16] : memref<784x128xbf16, #tpu.memory_space<vmem>>, vector<16x128xbf16>
    tpu.vector_store %arg4[%c208, %c0_16], %28 {strides = array<i32>} : memref<784x128xbf16, #tpu.memory_space<vmem>>, vector<16x128xbf16>,
    %30 = vector.extract_strided_slice %1 {offsets = [0, 28], sizes = [16, 128], strides = [1, 1]} : vector<16x256xbf16> to vector<16x128xbf16>
    %c224 = arith.constant 224 : index
    %c0_17 = arith.constant 0 : index
    %31 = vector.load %arg4[%c224, %c0_17] : memref<784x128xbf16, #tpu.memory_space<vmem>>, vector<16x128xbf16>
    tpu.vector_store %arg4[%c224, %c0_17], %30 {strides = array<i32>} : memref<784x128xbf16, #tpu.memory_space<vmem>>, vector<16x128xbf16>,
    %32 = vector.extract_strided_slice %1 {offsets = [0, 29], sizes = [16, 128], strides = [1, 1]} : vector<16x256xbf16> to vector<16x128xbf16>
    %c240 = arith.constant 240 : index
    %c0_18 = arith.constant 0 : index
    %33 = vector.load %arg4[%c240, %c0_18] : memref<784x128xbf16, #tpu.memory_space<vmem>>, vector<16x128xbf16>
    tpu.vector_store %arg4[%c240, %c0_18], %32 {strides = array<i32>} : memref<784x128xbf16, #tpu.memory_space<vmem>>, vector<16x128xbf16>,
    %34 = vector.extract_strided_slice %1 {offsets = [0, 30], sizes = [16, 128], strides = [1, 1]} : vector<16x256xbf16> to vector<16x128xbf16>
    %c256 = arith.constant 256 : index
    %c0_19 = arith.constant 0 : index
    %35 = vector.load %arg4[%c256, %c0_19] : memref<784x128xbf16, #tpu.memory_space<vmem>>, vector<16x128xbf16>
    tpu.vector_store %arg4[%c256, %c0_19], %34 {strides = array<i32>} : memref<784x128xbf16, #tpu.memory_space<vmem>>, vector<16x128xbf16>,
    %36 = vector.extract_strided_slice %1 {offsets = [0, 31], sizes = [16, 128], strides = [1, 1]} : vector<16x256xbf16> to vector<16x128xbf16>
    %c272 = arith.constant 272 : index
    %c0_20 = arith.constant 0 : index
    %37 = vector.load %arg4[%c272, %c0_20] : memref<784x128xbf16, #tpu.memory_space<vmem>>, vector<16x128xbf16>
    tpu.vector_store %arg4[%c272, %c0_20], %36 {strides = array<i32>} : memref<784x128xbf16, #tpu.memory_space<vmem>>, vector<16x128xbf16>,
    %38 = vector.extract_strided_slice %1 {offsets = [0, 32], sizes = [16, 128], strides = [1, 1]} : vector<16x256xbf16> to vector<16x128xbf16>
    %c288 = arith.constant 288 : index
    %c0_21 = arith.constant 0 : index
    %39 = vector.load %arg4[%c288, %c0_21] : memref<784x128xbf16, #tpu.memory_space<vmem>>, vector<16x128xbf16>
    tpu.vector_store %arg4[%c288, %c0_21], %38 {strides = array<i32>} : memref<784x128xbf16, #tpu.memory_space<vmem>>, vector<16x128xbf16>,
    %40 = vector.extract_strided_slice %1 {offsets = [0, 33], sizes = [16, 128], strides = [1, 1]} : vector<16x256xbf16> to vector<16x128xbf16>
    %c304 = arith.constant 304 : index
    %c0_22 = arith.constant 0 : index
    %41 = vector.load %arg4[%c304, %c0_22] : memref<784x128xbf16, #tpu.memory_space<vmem>>, vector<16x128xbf16>
    tpu.vector_store %arg4[%c304, %c0_22], %40 {strides = array<i32>} : memref<784x128xbf16, #tpu.memory_space<vmem>>, vector<16x128xbf16>,
    %42 = vector.extract_strided_slice %1 {offsets = [0, 34], sizes = [16, 128], strides = [1, 1]} : vector<16x256xbf16> to vector<16x128xbf16>
    %c320 = arith.constant 320 : index
    %c0_23 = arith.constant 0 : index
    %43 = vector.load %arg4[%c320, %c0_23] : memref<784x128xbf16, #tpu.memory_space<vmem>>, vector<16x128xbf16>
    tpu.vector_store %arg4[%c320, %c0_23], %42 {strides = array<i32>} : memref<784x128xbf16, #tpu.memory_space<vmem>>, vector<16x128xbf16>,
    %44 = vector.extract_strided_slice %1 {offsets = [0, 42], sizes = [16, 128], strides = [1, 1]} : vector<16x256xbf16> to vector<16x128xbf16>
    %c336 = arith.constant 336 : index
    %c0_24 = arith.constant 0 : index
    %45 = vector.load %arg4[%c336, %c0_24] : memref<784x128xbf16, #tpu.memory_space<vmem>>, vector<16x128xbf16>
    tpu.vector_store %arg4[%c336, %c0_24], %44 {strides = array<i32>} : memref<784x128xbf16, #tpu.memory_space<vmem>>, vector<16x128xbf16>,
    %46 = vector.extract_strided_slice %1 {offsets = [0, 43], sizes = [16, 128], strides = [1, 1]} : vector<16x256xbf16> to vector<16x128xbf16>
    %c352 = arith.constant 352 : index
    %c0_25 = arith.constant 0 : index
    %47 = vector.load %arg4[%c352, %c0_25] : memref<784x128xbf16, #tpu.memory_space<vmem>>, vector<16x128xbf16>
    tpu.vector_store %arg4[%c352, %c0_25], %46 {strides = array<i32>} : memref<784x128xbf16, #tpu.memory_space<vmem>>, vector<16x128xbf16>,
    %48 = vector.extract_strided_slice %1 {offsets = [0, 44], sizes = [16, 128], strides = [1, 1]} : vector<16x256xbf16> to vector<16x128xbf16>
    %c368 = arith.constant 368 : index
    %c0_26 = arith.constant 0 : index
    %49 = vector.load %arg4[%c368, %c0_26] : memref<784x128xbf16, #tpu.memory_space<vmem>>, vector<16x128xbf16>
    tpu.vector_store %arg4[%c368, %c0_26], %48 {strides = array<i32>} : memref<784x128xbf16, #tpu.memory_space<vmem>>, vector<16x128xbf16>,
    %50 = vector.extract_strided_slice %1 {offsets = [0, 45], sizes = [16, 128], strides = [1, 1]} : vector<16x256xbf16> to vector<16x128xbf16>
    %c384 = arith.constant 384 : index
    %c0_27 = arith.constant 0 : index
    %51 = vector.load %arg4[%c384, %c0_27] : memref<784x128xbf16, #tpu.memory_space<vmem>>, vector<16x128xbf16>
    tpu.vector_store %arg4[%c384, %c0_27], %50 {strides = array<i32>} : memref<784x128xbf16, #tpu.memory_space<vmem>>, vector<16x128xbf16>,
    %52 = vector.extract_strided_slice %1 {offsets = [0, 46], sizes = [16, 128], strides = [1, 1]} : vector<16x256xbf16> to vector<16x128xbf16>
    %c400 = arith.constant 400 : index
    %c0_28 = arith.constant 0 : index
    %53 = vector.load %arg4[%c400, %c0_28] : memref<784x128xbf16, #tpu.memory_space<vmem>>, vector<16x128xbf16>
    tpu.vector_store %arg4[%c400, %c0_28], %52 {strides = array<i32>} : memref<784x128xbf16, #tpu.memory_space<vmem>>, vector<16x128xbf16>,
    %54 = vector.extract_strided_slice %1 {offsets = [0, 47], sizes = [16, 128], strides = [1, 1]} : vector<16x256xbf16> to vector<16x128xbf16>
    %c416 = arith.constant 416 : index
    %c0_29 = arith.constant 0 : index
    %55 = vector.load %arg4[%c416, %c0_29] : memref<784x128xbf16, #tpu.memory_space<vmem>>, vector<16x128xbf16>
    tpu.vector_store %arg4[%c416, %c0_29], %54 {strides = array<i32>} : memref<784x128xbf16, #tpu.memory_space<vmem>>, vector<16x128xbf16>,
    %56 = vector.extract_strided_slice %1 {offsets = [0, 48], sizes = [16, 128], strides = [1, 1]} : vector<16x256xbf16> to vector<16x128xbf16>
    %c432 = arith.constant 432 : index
    %c0_30 = arith.constant 0 : index
    %57 = vector.load %arg4[%c432, %c0_30] : memref<784x128xbf16, #tpu.memory_space<vmem>>, vector<16x128xbf16>
    tpu.vector_store %arg4[%c432, %c0_30], %56 {strides = array<i32>} : memref<784x128xbf16, #tpu.memory_space<vmem>>, vector<16x128xbf16>,
    %58 = vector.extract_strided_slice %1 {offsets = [0, 56], sizes = [16, 128], strides = [1, 1]} : vector<16x256xbf16> to vector<16x128xbf16>
    %c448 = arith.constant 448 : index
    %c0_31 = arith.constant 0 : index
    %59 = vector.load %arg4[%c448, %c0_31] : memref<784x128xbf16, #tpu.memory_space<vmem>>, vector<16x128xbf16>
    tpu.vector_store %arg4[%c448, %c0_31], %58 {strides = array<i32>} : memref<784x128xbf16, #tpu.memory_space<vmem>>, vector<16x128xbf16>,
    %60 = vector.extract_strided_slice %1 {offsets = [0, 57], sizes = [16, 128], strides = [1, 1]} : vector<16x256xbf16> to vector<16x128xbf16>
    %c464 = arith.constant 464 : index
    %c0_32 = arith.constant 0 : index
    %61 = vector.load %arg4[%c464, %c0_32] : memref<784x128xbf16, #tpu.memory_space<vmem>>, vector<16x128xbf16>
    tpu.vector_store %arg4[%c464, %c0_32], %60 {strides = array<i32>} : memref<784x128xbf16, #tpu.memory_space<vmem>>, vector<16x128xbf16>,
    %62 = vector.extract_strided_slice %1 {offsets = [0, 58], sizes = [16, 128], strides = [1, 1]} : vector<16x256xbf16> to vector<16x128xbf16>
    %c480 = arith.constant 480 : index
    %c0_33 = arith.constant 0 : index
    %63 = vector.load %arg4[%c480, %c0_33] : memref<784x128xbf16, #tpu.memory_space<vmem>>, vector<16x128xbf16>
    tpu.vector_store %arg4[%c480, %c0_33], %62 {strides = array<i32>} : memref<784x128xbf16, #tpu.memory_space<vmem>>, vector<16x128xbf16>,
    %64 = vector.extract_strided_slice %1 {offsets = [0, 59], sizes = [16, 128], strides = [1, 1]} : vector<16x256xbf16> to vector<16x128xbf16>
    %c496 = arith.constant 496 : index
    %c0_34 = arith.constant 0 : index
    %65 = vector.load %arg4[%c496, %c0_34] : memref<784x128xbf16, #tpu.memory_space<vmem>>, vector<16x128xbf16>
    tpu.vector_store %arg4[%c496, %c0_34], %64 {strides = array<i32>} : memref<784x128xbf16, #tpu.memory_space<vmem>>, vector<16x128xbf16>,
    %66 = vector.extract_strided_slice %1 {offsets = [0, 60], sizes = [16, 128], strides = [1, 1]} : vector<16x256xbf16> to vector<16x128xbf16>
    %c512 = arith.constant 512 : index
    %c0_35 = arith.constant 0 : index
    %67 = vector.load %arg4[%c512, %c0_35] : memref<784x128xbf16, #tpu.memory_space<vmem>>, vector<16x128xbf16>
    tpu.vector_store %arg4[%c512, %c0_35], %66 {strides = array<i32>} : memref<784x128xbf16, #tpu.memory_space<vmem>>, vector<16x128xbf16>,
    %68 = vector.extract_strided_slice %1 {offsets = [0, 61], sizes = [16, 128], strides = [1, 1]} : vector<16x256xbf16> to vector<16x128xbf16>
    %c528 = arith.constant 528 : index
    %c0_36 = arith.constant 0 : index
    %69 = vector.load %arg4[%c528, %c0_36] : memref<784x128xbf16, #tpu.memory_space<vmem>>, vector<16x128xbf16>
    tpu.vector_store %arg4[%c528, %c0_36], %68 {strides = array<i32>} : memref<784x128xbf16, #tpu.memory_space<vmem>>, vector<16x128xbf16>,
    %70 = vector.extract_strided_slice %1 {offsets = [0, 62], sizes = [16, 128], strides = [1, 1]} : vector<16x256xbf16> to vector<16x128xbf16>
    %c544 = arith.constant 544 : index
    %c0_37 = arith.constant 0 : index
    %71 = vector.load %arg4[%c544, %c0_37] : memref<784x128xbf16, #tpu.memory_space<vmem>>, vector<16x128xbf16>
    tpu.vector_store %arg4[%c544, %c0_37], %70 {strides = array<i32>} : memref<784x128xbf16, #tpu.memory_space<vmem>>, vector<16x128xbf16>,
    %72 = vector.extract_strided_slice %1 {offsets = [0, 70], sizes = [16, 128], strides = [1, 1]} : vector<16x256xbf16> to vector<16x128xbf16>
    %c560 = arith.constant 560 : index
    %c0_38 = arith.constant 0 : index
    %73 = vector.load %arg4[%c560, %c0_38] : memref<784x128xbf16, #tpu.memory_space<vmem>>, vector<16x128xbf16>
    tpu.vector_store %arg4[%c560, %c0_38], %72 {strides = array<i32>} : memref<784x128xbf16, #tpu.memory_space<vmem>>, vector<16x128xbf16>,
    %74 = vector.extract_strided_slice %1 {offsets = [0, 71], sizes = [16, 128], strides = [1, 1]} : vector<16x256xbf16> to vector<16x128xbf16>
    %c576 = arith.constant 576 : index
    %c0_39 = arith.constant 0 : index
    %75 = vector.load %arg4[%c576, %c0_39] : memref<784x128xbf16, #tpu.memory_space<vmem>>, vector<16x128xbf16>
    tpu.vector_store %arg4[%c576, %c0_39], %74 {strides = array<i32>} : memref<784x128xbf16, #tpu.memory_space<vmem>>, vector<16x128xbf16>,
    %76 = vector.extract_strided_slice %1 {offsets = [0, 72], sizes = [16, 128], strides = [1, 1]} : vector<16x256xbf16> to vector<16x128xbf16>
    %c592 = arith.constant 592 : index
    %c0_40 = arith.constant 0 : index
    %77 = vector.load %arg4[%c592, %c0_40] : memref<784x128xbf16, #tpu.memory_space<vmem>>, vector<16x128xbf16>
    tpu.vector_store %arg4[%c592, %c0_40], %76 {strides = array<i32>} : memref<784x128xbf16, #tpu.memory_space<vmem>>, vector<16x128xbf16>,
    %78 = vector.extract_strided_slice %1 {offsets = [0, 73], sizes = [16, 128], strides = [1, 1]} : vector<16x256xbf16> to vector<16x128xbf16>
    %c608 = arith.constant 608 : index
    %c0_41 = arith.constant 0 : index
    %79 = vector.load %arg4[%c608, %c0_41] : memref<784x128xbf16, #tpu.memory_space<vmem>>, vector<16x128xbf16>
    tpu.vector_store %arg4[%c608, %c0_41], %78 {strides = array<i32>} : memref<784x128xbf16, #tpu.memory_space<vmem>>, vector<16x128xbf16>,
    %80 = vector.extract_strided_slice %1 {offsets = [0, 74], sizes = [16, 128], strides = [1, 1]} : vector<16x256xbf16> to vector<16x128xbf16>
    %c624 = arith.constant 624 : index
    %c0_42 = arith.constant 0 : index
    %81 = vector.load %arg4[%c624, %c0_42] : memref<784x128xbf16, #tpu.memory_space<vmem>>, vector<16x128xbf16>
    tpu.vector_store %arg4[%c624, %c0_42], %80 {strides = array<i32>} : memref<784x128xbf16, #tpu.memory_space<vmem>>, vector<16x128xbf16>,
    %82 = vector.extract_strided_slice %1 {offsets = [0, 75], sizes = [16, 128], strides = [1, 1]} : vector<16x256xbf16> to vector<16x128xbf16>
    %c640 = arith.constant 640 : index
    %c0_43 = arith.constant 0 : index
    %83 = vector.load %arg4[%c640, %c0_43] : memref<784x128xbf16, #tpu.memory_space<vmem>>, vector<16x128xbf16>
    tpu.vector_store %arg4[%c640, %c0_43], %82 {strides = array<i32>} : memref<784x128xbf16, #tpu.memory_space<vmem>>, vector<16x128xbf16>,
    %84 = vector.extract_strided_slice %1 {offsets = [0, 76], sizes = [16, 128], strides = [1, 1]} : vector<16x256xbf16> to vector<16x128xbf16>
    %c656 = arith.constant 656 : index
    %c0_44 = arith.constant 0 : index
    %85 = vector.load %arg4[%c656, %c0_44] : memref<784x128xbf16, #tpu.memory_space<vmem>>, vector<16x128xbf16>
    tpu.vector_store %arg4[%c656, %c0_44], %84 {strides = array<i32>} : memref<784x128xbf16, #tpu.memory_space<vmem>>, vector<16x128xbf16>,
    %86 = vector.extract_strided_slice %1 {offsets = [0, 84], sizes = [16, 128], strides = [1, 1]} : vector<16x256xbf16> to vector<16x128xbf16>
    %c672 = arith.constant 672 : index
    %c0_45 = arith.constant 0 : index
    %87 = vector.load %arg4[%c672, %c0_45] : memref<784x128xbf16, #tpu.memory_space<vmem>>, vector<16x128xbf16>
    tpu.vector_store %arg4[%c672, %c0_45], %86 {strides = array<i32>} : memref<784x128xbf16, #tpu.memory_space<vmem>>, vector<16x128xbf16>,
    %88 = vector.extract_strided_slice %1 {offsets = [0, 85], sizes = [16, 128], strides = [1, 1]} : vector<16x256xbf16> to vector<16x128xbf16>
    %c688 = arith.constant 688 : index
    %c0_46 = arith.constant 0 : index
    %89 = vector.load %arg4[%c688, %c0_46] : memref<784x128xbf16, #tpu.memory_space<vmem>>, vector<16x128xbf16>
    tpu.vector_store %arg4[%c688, %c0_46], %88 {strides = array<i32>} : memref<784x128xbf16, #tpu.memory_space<vmem>>, vector<16x128xbf16>,
    %90 = vector.extract_strided_slice %1 {offsets = [0, 86], sizes = [16, 128], strides = [1, 1]} : vector<16x256xbf16> to vector<16x128xbf16>
    %c704 = arith.constant 704 : index
    %c0_47 = arith.constant 0 : index
    %91 = vector.load %arg4[%c704, %c0_47] : memref<784x128xbf16, #tpu.memory_space<vmem>>, vector<16x128xbf16>
    tpu.vector_store %arg4[%c704, %c0_47], %90 {strides = array<i32>} : memref<784x128xbf16, #tpu.memory_space<vmem>>, vector<16x128xbf16>,
    %92 = vector.extract_strided_slice %1 {offsets = [0, 87], sizes = [16, 128], strides = [1, 1]} : vector<16x256xbf16> to vector<16x128xbf16>
    %c720 = arith.constant 720 : index
    %c0_48 = arith.constant 0 : index
    %93 = vector.load %arg4[%c720, %c0_48] : memref<784x128xbf16, #tpu.memory_space<vmem>>, vector<16x128xbf16>
    tpu.vector_store %arg4[%c720, %c0_48], %92 {strides = array<i32>} : memref<784x128xbf16, #tpu.memory_space<vmem>>, vector<16x128xbf16>,
    %94 = vector.extract_strided_slice %1 {offsets = [0, 88], sizes = [16, 128], strides = [1, 1]} : vector<16x256xbf16> to vector<16x128xbf16>
    %c736 = arith.constant 736 : index
    %c0_49 = arith.constant 0 : index
    %95 = vector.load %arg4[%c736, %c0_49] : memref<784x128xbf16, #tpu.memory_space<vmem>>, vector<16x128xbf16>
    tpu.vector_store %arg4[%c736, %c0_49], %94 {strides = array<i32>} : memref<784x128xbf16, #tpu.memory_space<vmem>>, vector<16x128xbf16>,
    %96 = vector.extract_strided_slice %1 {offsets = [0, 89], sizes = [16, 128], strides = [1, 1]} : vector<16x256xbf16> to vector<16x128xbf16>
    %c752 = arith.constant 752 : index
    %c0_50 = arith.constant 0 : index
    %97 = vector.load %arg4[%c752, %c0_50] : memref<784x128xbf16, #tpu.memory_space<vmem>>, vector<16x128xbf16>
    tpu.vector_store %arg4[%c752, %c0_50], %96 {strides = array<i32>} : memref<784x128xbf16, #tpu.memory_space<vmem>>, vector<16x128xbf16>,
    %98 = vector.extract_strided_slice %1 {offsets = [0, 90], sizes = [16, 128], strides = [1, 1]} : vector<16x256xbf16> to vector<16x128xbf16>
    %c768 = arith.constant 768 : index
    %c0_51 = arith.constant 0 : index
    %99 = vector.load %arg4[%c768, %c0_51] : memref<784x128xbf16, #tpu.memory_space<vmem>>, vector<16x128xbf16>
    tpu.vector_store %arg4[%c768, %c0_51], %98 {strides = array<i32>} : memref<784x128xbf16, #tpu.memory_space<vmem>>, vector<16x128xbf16>,
    %c0_52 = arith.constant 0 : index
    %c0_53 = arith.constant 0 : index
    %100 = vector.load %arg2[%c0_52, %c0_53] : memref<4x784xbf16, #tpu.memory_space<vmem>>, vector<4x784xbf16>
    %c0_54 = arith.constant 0 : index
    %c0_55 = arith.constant 0 : index
    %101 = vector.load %arg4[%c0_54, %c0_55] : memref<784x128xbf16, #tpu.memory_space<vmem>>, vector<784x128xbf16>
    %cst = arith.constant dense<0.000000e+00> : vector<4x128xf32>
    %102 = tpu.matmul %100, %101, %cst {dimension_numbers = #tpu.dot_dimension_numbers<[1], [0], [0], [1], [0, 0, 1, 1], [], []>} : vector<4x784xbf16>, vector<784x128xbf16>, vector<4x128xf32> -> vector<4x128xf32>
    %103 = tpu.iota {dimensions = array<i32: 1>} : vector<1x128xi32>
    %c0_i32 = arith.constant 0 : i32
    %104 = vector.broadcast %c0_i32 : i32 to vector<1x128xi32>
    %105 = arith.cmpi slt, %103, %104 : vector<1x128xi32>
    %c0_i32_56 = arith.constant 0 : i32
    %106 = vector.broadcast %c0_i32_56 : i32 to vector<1x128xi32>
    %107 = arith.cmpi sge, %103, %106 : vector<1x128xi32>
    %c8_i32 = arith.constant 8 : i32
    %108 = vector.broadcast %c8_i32 : i32 to vector<1x128xi32>
    %109 = arith.cmpi slt, %103, %108 : vector<1x128xi32>
    %110 = arith.andi %107, %109 : vector<1x128xi1>
    %111 = arith.ori %105, %110 : vector<1x128xi1>
    %c14_i32 = arith.constant 14 : i32
    %112 = vector.broadcast %c14_i32 : i32 to vector<1x128xi32>
    %113 = arith.cmpi sge, %103, %112 : vector<1x128xi32>
    %c22_i32 = arith.constant 22 : i32
    %114 = vector.broadcast %c22_i32 : i32 to vector<1x128xi32>
    %115 = arith.cmpi slt, %103, %114 : vector<1x128xi32>
    %116 = arith.andi %113, %115 : vector<1x128xi1>
    %117 = arith.ori %111, %116 : vector<1x128xi1>
    %c28_i32 = arith.constant 28 : i32
    %118 = vector.broadcast %c28_i32 : i32 to vector<1x128xi32>
    %119 = arith.cmpi sge, %103, %118 : vector<1x128xi32>
    %c36_i32 = arith.constant 36 : i32
    %120 = vector.broadcast %c36_i32 : i32 to vector<1x128xi32>
    %121 = arith.cmpi slt, %103, %120 : vector<1x128xi32>
    %122 = arith.andi %119, %121 : vector<1x128xi1>
    %123 = arith.ori %117, %122 : vector<1x128xi1>
    %c42_i32 = arith.constant 42 : i32
    %124 = vector.broadcast %c42_i32 : i32 to vector<1x128xi32>
    %125 = arith.cmpi sge, %103, %124 : vector<1x128xi32>
    %c50_i32 = arith.constant 50 : i32
    %126 = vector.broadcast %c50_i32 : i32 to vector<1x128xi32>
    %127 = arith.cmpi slt, %103, %126 : vector<1x128xi32>
    %128 = arith.andi %125, %127 : vector<1x128xi1>
    %129 = arith.ori %123, %128 : vector<1x128xi1>
    %c56_i32 = arith.constant 56 : i32
    %130 = vector.broadcast %c56_i32 : i32 to vector<1x128xi32>
    %131 = arith.cmpi sge, %103, %130 : vector<1x128xi32>
    %c64_i32 = arith.constant 64 : i32
    %132 = vector.broadcast %c64_i32 : i32 to vector<1x128xi32>
    %133 = arith.cmpi slt, %103, %132 : vector<1x128xi32>
    %134 = arith.andi %131, %133 : vector<1x128xi1>
    %135 = arith.ori %129, %134 : vector<1x128xi1>
    %c70_i32 = arith.constant 70 : i32
    %136 = vector.broadcast %c70_i32 : i32 to vector<1x128xi32>
    %137 = arith.cmpi sge, %103, %136 : vector<1x128xi32>
    %c78_i32 = arith.constant 78 : i32
    %138 = vector.broadcast %c78_i32 : i32 to vector<1x128xi32>
    %139 = arith.cmpi slt, %103, %138 : vector<1x128xi32>
    %140 = arith.andi %137, %139 : vector<1x128xi1>
    %141 = arith.ori %135, %140 : vector<1x128xi1>
    %c84_i32 = arith.constant 84 : i32
    %142 = vector.broadcast %c84_i32 : i32 to vector<1x128xi32>
    %143 = arith.cmpi sge, %103, %142 : vector<1x128xi32>
    %c92_i32 = arith.constant 92 : i32
    %144 = vector.broadcast %c92_i32 : i32 to vector<1x128xi32>
    %145 = arith.cmpi slt, %103, %144 : vector<1x128xi32>
    %146 = arith.andi %143, %145 : vector<1x128xi1>
    %147 = arith.ori %141, %146 : vector<1x128xi1>
    %c98_i32 = arith.constant 98 : i32
    %148 = vector.broadcast %c98_i32 : i32 to vector<1x128xi32>
    %149 = arith.cmpi sge, %103, %148 : vector<1x128xi32>
    %c106_i32 = arith.constant 106 : i32
    %150 = vector.broadcast %c106_i32 : i32 to vector<1x128xi32>
    %151 = arith.cmpi slt, %103, %150 : vector<1x128xi32>
    %152 = arith.andi %149, %151 : vector<1x128xi1>
    %153 = arith.ori %147, %152 : vector<1x128xi1>
    %154 = arith.extui %153 : vector<1x128xi1> to vector<1x128xi32>
    %155 = arith.sitofp %154 : vector<1x128xi32> to vector<1x128xf32>
    %156 = vector.broadcast %155 : vector<1x128xf32> to vector<4x128xf32>
    %157 = arith.mulf %102, %156 : vector<4x128xf32>
    %cst_57 = arith.constant dense<0.000000e+00> : vector<4xf32>
    %158 = vector.multi_reduction <add>, %157, %cst_57 [1] : vector<4x128xf32> to vector<4xf32>
    %159 = vector.shape_cast %158 : vector<4xf32> to vector<4x1xf32>
    %cst_58 = arith.constant 1.562500e-02 : f32
    %160 = vector.broadcast %cst_58 : f32 to vector<4x1xf32>
    %161 = arith.mulf %159, %160 : vector<4x1xf32>
    %162 = vector.broadcast %161 : vector<4x1xf32> to vector<4x128xf32>
    %163 = arith.subf %102, %162 : vector<4x128xf32>
    %164 = vector.broadcast %155 : vector<1x128xf32> to vector<4x128xf32>
    %165 = arith.mulf %163, %164 : vector<4x128xf32>
    %166 = arith.mulf %165, %165 : vector<4x128xf32>
    %cst_59 = arith.constant dense<0.000000e+00> : vector<4xf32>
    %167 = vector.multi_reduction <add>, %166, %cst_59 [1] : vector<4x128xf32> to vector<4xf32>
    %168 = vector.shape_cast %167 : vector<4xf32> to vector<4x1xf32>
    %cst_60 = arith.constant 1.562500e-02 : f32
    %169 = vector.broadcast %cst_60 : f32 to vector<4x1xf32>
    %170 = arith.mulf %168, %169 : vector<4x1xf32>
    %171 = vector.broadcast %161 : vector<4x1xf32> to vector<4x128xf32>
    %172 = arith.subf %102, %171 : vector<4x128xf32>
    %cst_61 = arith.constant 9.99999974E-6 : f32
    %173 = vector.broadcast %cst_61 : f32 to vector<4x1xf32>
    %174 = arith.addf %170, %173 : vector<4x1xf32>
    %175 = math.rsqrt %174 : vector<4x1xf32>
    %176 = vector.broadcast %175 : vector<4x1xf32> to vector<4x128xf32>
    %177 = arith.mulf %172, %176 : vector<4x128xf32>
    %cst_62 = arith.constant 0.00999999977 : f32
    %178 = vector.broadcast %cst_62 : f32 to vector<4x128xf32>
    %179 = arith.mulf %178, %177 : vector<4x128xf32>
    %180 = arith.maximumf %177, %179 : vector<4x128xf32>
    %181 = arith.truncf %180 : vector<4x128xf32> to vector<4x128xbf16>
    %c0_63 = arith.constant 0 : index
    %c0_64 = arith.constant 0 : index
    %c0_65 = arith.constant 0 : index
    %182 = vector.load %arg3[%c0_63, %c0_64, %c0_65] : memref<1x4x128xbf16, #tpu.memory_space<vmem>>, vector<1x4x128xbf16>
    %183 = vector.shape_cast %182 : vector<1x4x128xbf16> to vector<4x128xbf16>
    %184 = vector.shape_cast %181 : vector<4x128xbf16> to vector<1x4x128xbf16>
    tpu.vector_store %arg3[%c0_63, %c0_64, %c0_65], %184 {strides = array<i32>} : memref<1x4x128xbf16, #tpu.memory_space<vmem>>, vector<1x4x128xbf16>,
    return
  }
  func.func @transform_0(%arg0: i32) -> (i32, i32, i32) {
    %c0_i32 = arith.constant 0 : i32
    %c0_i32_0 = arith.constant 0 : i32
    %c0_i32_1 = arith.constant 0 : i32
    return %arg0, %c0_i32, %c0_i32_0 : i32, i32, i32
  }
  func.func @transform_1(%arg0: i32) -> (i32, i32) {
    %c0_i32 = arith.constant 0 : i32
    %c0_i32_0 = arith.constant 0 : i32
    %c0_i32_1 = arith.constant 0 : i32
    return %c0_i32, %c0_i32_0 : i32, i32
  }
  func.func @transform_2(%arg0: i32) -> (i32, i32, i32) {
    %c0_i32 = arith.constant 0 : i32
    %c0_i32_0 = arith.constant 0 : i32
    %c0_i32_1 = arith.constant 0 : i32
    return %arg0, %c0_i32, %c0_i32_0 : i32, i32, i32
  }
}

module attributes {stable_mosaic.version = 11 : i64} {
  func.func @_conv_in_act_kernel(%arg0: i32, %arg1: memref<1x16x256xbf16, #tpu.memory_space<vmem>>, %arg2: memref<4x144xbf16, #tpu.memory_space<vmem>>, %arg3: memref<1x4x128xbf16, #tpu.memory_space<vmem>>, %arg4: memref<144x128xbf16, #tpu.memory_space<vmem>>) attributes {dimension_semantics = [#tpu.dimension_semantics<parallel>], iteration_bounds = array<i64: 2>, scalar_prefetch = 0 : i64, scratch_operands = 1 : i64, tpu.core_type = #tpu.core_type<tc>, window_params = [{transform_indices = @transform_0, window_bounds = array<i64: 1, 16, 256>}, {pipeline_mode = #tpu.pipeline_mode<synchronous>, transform_indices = @transform_1, window_bounds = array<i64: 4, 144>}, {transform_indices = @transform_2, window_bounds = array<i64: 1, 4, 128>}]} {
    %c0 = arith.constant 0 : index
    %c0_0 = arith.constant 0 : index
    %c0_1 = arith.constant 0 : index
    %0 = vector.load %arg1[%c0, %c0_0, %c0_1] : memref<1x16x256xbf16, #tpu.memory_space<vmem>>, vector<1x16x256xbf16>
    %1 = vector.shape_cast %0 : vector<1x16x256xbf16> to vector<16x256xbf16>
    %2 = vector.extract_strided_slice %1 {offsets = [0, 0], sizes = [16, 128], strides = [1, 1]} : vector<16x256xbf16> to vector<16x128xbf16>
    %c0_2 = arith.constant 0 : index
    %c0_3 = arith.constant 0 : index
    %3 = vector.load %arg4[%c0_2, %c0_3] : memref<144x128xbf16, #tpu.memory_space<vmem>>, vector<16x128xbf16>
    tpu.vector_store %arg4[%c0_2, %c0_3], %2 {strides = array<i32>} : memref<144x128xbf16, #tpu.memory_space<vmem>>, vector<16x128xbf16>,
    %4 = vector.extract_strided_slice %1 {offsets = [0, 1], sizes = [16, 128], strides = [1, 1]} : vector<16x256xbf16> to vector<16x128xbf16>
    %c16 = arith.constant 16 : index
    %c0_4 = arith.constant 0 : index
    %5 = vector.load %arg4[%c16, %c0_4] : memref<144x128xbf16, #tpu.memory_space<vmem>>, vector<16x128xbf16>
    tpu.vector_store %arg4[%c16, %c0_4], %4 {strides = array<i32>} : memref<144x128xbf16, #tpu.memory_space<vmem>>, vector<16x128xbf16>,
    %6 = vector.extract_strided_slice %1 {offsets = [0, 2], sizes = [16, 128], strides = [1, 1]} : vector<16x256xbf16> to vector<16x128xbf16>
    %c32 = arith.constant 32 : index
    %c0_5 = arith.constant 0 : index
    %7 = vector.load %arg4[%c32, %c0_5] : memref<144x128xbf16, #tpu.memory_space<vmem>>, vector<16x128xbf16>
    tpu.vector_store %arg4[%c32, %c0_5], %6 {strides = array<i32>} : memref<144x128xbf16, #tpu.memory_space<vmem>>, vector<16x128xbf16>,
    %8 = vector.extract_strided_slice %1 {offsets = [0, 10], sizes = [16, 128], strides = [1, 1]} : vector<16x256xbf16> to vector<16x128xbf16>
    %c48 = arith.constant 48 : index
    %c0_6 = arith.constant 0 : index
    %9 = vector.load %arg4[%c48, %c0_6] : memref<144x128xbf16, #tpu.memory_space<vmem>>, vector<16x128xbf16>
    tpu.vector_store %arg4[%c48, %c0_6], %8 {strides = array<i32>} : memref<144x128xbf16, #tpu.memory_space<vmem>>, vector<16x128xbf16>,
    %10 = vector.extract_strided_slice %1 {offsets = [0, 11], sizes = [16, 128], strides = [1, 1]} : vector<16x256xbf16> to vector<16x128xbf16>
    %c64 = arith.constant 64 : index
    %c0_7 = arith.constant 0 : index
    %11 = vector.load %arg4[%c64, %c0_7] : memref<144x128xbf16, #tpu.memory_space<vmem>>, vector<16x128xbf16>
    tpu.vector_store %arg4[%c64, %c0_7], %10 {strides = array<i32>} : memref<144x128xbf16, #tpu.memory_space<vmem>>, vector<16x128xbf16>,
    %12 = vector.extract_strided_slice %1 {offsets = [0, 12], sizes = [16, 128], strides = [1, 1]} : vector<16x256xbf16> to vector<16x128xbf16>
    %c80 = arith.constant 80 : index
    %c0_8 = arith.constant 0 : index
    %13 = vector.load %arg4[%c80, %c0_8] : memref<144x128xbf16, #tpu.memory_space<vmem>>, vector<16x128xbf16>
    tpu.vector_store %arg4[%c80, %c0_8], %12 {strides = array<i32>} : memref<144x128xbf16, #tpu.memory_space<vmem>>, vector<16x128xbf16>,
    %14 = vector.extract_strided_slice %1 {offsets = [0, 20], sizes = [16, 128], strides = [1, 1]} : vector<16x256xbf16> to vector<16x128xbf16>
    %c96 = arith.constant 96 : index
    %c0_9 = arith.constant 0 : index
    %15 = vector.load %arg4[%c96, %c0_9] : memref<144x128xbf16, #tpu.memory_space<vmem>>, vector<16x128xbf16>
    tpu.vector_store %arg4[%c96, %c0_9], %14 {strides = array<i32>} : memref<144x128xbf16, #tpu.memory_space<vmem>>, vector<16x128xbf16>,
    %16 = vector.extract_strided_slice %1 {offsets = [0, 21], sizes = [16, 128], strides = [1, 1]} : vector<16x256xbf16> to vector<16x128xbf16>
    %c112 = arith.constant 112 : index
    %c0_10 = arith.constant 0 : index
    %17 = vector.load %arg4[%c112, %c0_10] : memref<144x128xbf16, #tpu.memory_space<vmem>>, vector<16x128xbf16>
    tpu.vector_store %arg4[%c112, %c0_10], %16 {strides = array<i32>} : memref<144x128xbf16, #tpu.memory_space<vmem>>, vector<16x128xbf16>,
    %18 = vector.extract_strided_slice %1 {offsets = [0, 22], sizes = [16, 128], strides = [1, 1]} : vector<16x256xbf16> to vector<16x128xbf16>
    %c128 = arith.constant 128 : index
    %c0_11 = arith.constant 0 : index
    %19 = vector.load %arg4[%c128, %c0_11] : memref<144x128xbf16, #tpu.memory_space<vmem>>, vector<16x128xbf16>
    tpu.vector_store %arg4[%c128, %c0_11], %18 {strides = array<i32>} : memref<144x128xbf16, #tpu.memory_space<vmem>>, vector<16x128xbf16>,
    %c0_12 = arith.constant 0 : index
    %c0_13 = arith.constant 0 : index
    %20 = vector.load %arg2[%c0_12, %c0_13] : memref<4x144xbf16, #tpu.memory_space<vmem>>, vector<4x144xbf16>
    %c0_14 = arith.constant 0 : index
    %c0_15 = arith.constant 0 : index
    %21 = vector.load %arg4[%c0_14, %c0_15] : memref<144x128xbf16, #tpu.memory_space<vmem>>, vector<144x128xbf16>
    %cst = arith.constant dense<0.000000e+00> : vector<4x128xf32>
    %22 = tpu.matmul %20, %21, %cst {dimension_numbers = #tpu.dot_dimension_numbers<[1], [0], [0], [1], [0, 0, 1, 1], [], []>} : vector<4x144xbf16>, vector<144x128xbf16>, vector<4x128xf32> -> vector<4x128xf32>
    %23 = tpu.iota {dimensions = array<i32: 1>} : vector<1x128xi32>
    %c0_i32 = arith.constant 0 : i32
    %24 = vector.broadcast %c0_i32 : i32 to vector<1x128xi32>
    %25 = arith.cmpi slt, %23, %24 : vector<1x128xi32>
    %c0_i32_16 = arith.constant 0 : i32
    %26 = vector.broadcast %c0_i32_16 : i32 to vector<1x128xi32>
    %27 = arith.cmpi sge, %23, %26 : vector<1x128xi32>
    %c8_i32 = arith.constant 8 : i32
    %28 = vector.broadcast %c8_i32 : i32 to vector<1x128xi32>
    %29 = arith.cmpi slt, %23, %28 : vector<1x128xi32>
    %30 = arith.andi %27, %29 : vector<1x128xi1>
    %31 = arith.ori %25, %30 : vector<1x128xi1>
    %c10_i32 = arith.constant 10 : i32
    %32 = vector.broadcast %c10_i32 : i32 to vector<1x128xi32>
    %33 = arith.cmpi sge, %23, %32 : vector<1x128xi32>
    %c18_i32 = arith.constant 18 : i32
    %34 = vector.broadcast %c18_i32 : i32 to vector<1x128xi32>
    %35 = arith.cmpi slt, %23, %34 : vector<1x128xi32>
    %36 = arith.andi %33, %35 : vector<1x128xi1>
    %37 = arith.ori %31, %36 : vector<1x128xi1>
    %c20_i32 = arith.constant 20 : i32
    %38 = vector.broadcast %c20_i32 : i32 to vector<1x128xi32>
    %39 = arith.cmpi sge, %23, %38 : vector<1x128xi32>
    %c28_i32 = arith.constant 28 : i32
    %40 = vector.broadcast %c28_i32 : i32 to vector<1x128xi32>
    %41 = arith.cmpi slt, %23, %40 : vector<1x128xi32>
    %42 = arith.andi %39, %41 : vector<1x128xi1>
    %43 = arith.ori %37, %42 : vector<1x128xi1>
    %c30_i32 = arith.constant 30 : i32
    %44 = vector.broadcast %c30_i32 : i32 to vector<1x128xi32>
    %45 = arith.cmpi sge, %23, %44 : vector<1x128xi32>
    %c38_i32 = arith.constant 38 : i32
    %46 = vector.broadcast %c38_i32 : i32 to vector<1x128xi32>
    %47 = arith.cmpi slt, %23, %46 : vector<1x128xi32>
    %48 = arith.andi %45, %47 : vector<1x128xi1>
    %49 = arith.ori %43, %48 : vector<1x128xi1>
    %c40_i32 = arith.constant 40 : i32
    %50 = vector.broadcast %c40_i32 : i32 to vector<1x128xi32>
    %51 = arith.cmpi sge, %23, %50 : vector<1x128xi32>
    %c48_i32 = arith.constant 48 : i32
    %52 = vector.broadcast %c48_i32 : i32 to vector<1x128xi32>
    %53 = arith.cmpi slt, %23, %52 : vector<1x128xi32>
    %54 = arith.andi %51, %53 : vector<1x128xi1>
    %55 = arith.ori %49, %54 : vector<1x128xi1>
    %c50_i32 = arith.constant 50 : i32
    %56 = vector.broadcast %c50_i32 : i32 to vector<1x128xi32>
    %57 = arith.cmpi sge, %23, %56 : vector<1x128xi32>
    %c58_i32 = arith.constant 58 : i32
    %58 = vector.broadcast %c58_i32 : i32 to vector<1x128xi32>
    %59 = arith.cmpi slt, %23, %58 : vector<1x128xi32>
    %60 = arith.andi %57, %59 : vector<1x128xi1>
    %61 = arith.ori %55, %60 : vector<1x128xi1>
    %c60_i32 = arith.constant 60 : i32
    %62 = vector.broadcast %c60_i32 : i32 to vector<1x128xi32>
    %63 = arith.cmpi sge, %23, %62 : vector<1x128xi32>
    %c68_i32 = arith.constant 68 : i32
    %64 = vector.broadcast %c68_i32 : i32 to vector<1x128xi32>
    %65 = arith.cmpi slt, %23, %64 : vector<1x128xi32>
    %66 = arith.andi %63, %65 : vector<1x128xi1>
    %67 = arith.ori %61, %66 : vector<1x128xi1>
    %c70_i32 = arith.constant 70 : i32
    %68 = vector.broadcast %c70_i32 : i32 to vector<1x128xi32>
    %69 = arith.cmpi sge, %23, %68 : vector<1x128xi32>
    %c78_i32 = arith.constant 78 : i32
    %70 = vector.broadcast %c78_i32 : i32 to vector<1x128xi32>
    %71 = arith.cmpi slt, %23, %70 : vector<1x128xi32>
    %72 = arith.andi %69, %71 : vector<1x128xi1>
    %73 = arith.ori %67, %72 : vector<1x128xi1>
    %74 = arith.extui %73 : vector<1x128xi1> to vector<1x128xi32>
    %75 = arith.sitofp %74 : vector<1x128xi32> to vector<1x128xf32>
    %76 = vector.broadcast %75 : vector<1x128xf32> to vector<4x128xf32>
    %77 = arith.mulf %22, %76 : vector<4x128xf32>
    %cst_17 = arith.constant dense<0.000000e+00> : vector<4xf32>
    %78 = vector.multi_reduction <add>, %77, %cst_17 [1] : vector<4x128xf32> to vector<4xf32>
    %79 = vector.shape_cast %78 : vector<4xf32> to vector<4x1xf32>
    %cst_18 = arith.constant 1.562500e-02 : f32
    %80 = vector.broadcast %cst_18 : f32 to vector<4x1xf32>
    %81 = arith.mulf %79, %80 : vector<4x1xf32>
    %82 = vector.broadcast %81 : vector<4x1xf32> to vector<4x128xf32>
    %83 = arith.subf %22, %82 : vector<4x128xf32>
    %84 = vector.broadcast %75 : vector<1x128xf32> to vector<4x128xf32>
    %85 = arith.mulf %83, %84 : vector<4x128xf32>
    %86 = arith.mulf %85, %85 : vector<4x128xf32>
    %cst_19 = arith.constant dense<0.000000e+00> : vector<4xf32>
    %87 = vector.multi_reduction <add>, %86, %cst_19 [1] : vector<4x128xf32> to vector<4xf32>
    %88 = vector.shape_cast %87 : vector<4xf32> to vector<4x1xf32>
    %cst_20 = arith.constant 1.562500e-02 : f32
    %89 = vector.broadcast %cst_20 : f32 to vector<4x1xf32>
    %90 = arith.mulf %88, %89 : vector<4x1xf32>
    %91 = vector.broadcast %81 : vector<4x1xf32> to vector<4x128xf32>
    %92 = arith.subf %22, %91 : vector<4x128xf32>
    %cst_21 = arith.constant 9.99999974E-6 : f32
    %93 = vector.broadcast %cst_21 : f32 to vector<4x1xf32>
    %94 = arith.addf %90, %93 : vector<4x1xf32>
    %95 = math.rsqrt %94 : vector<4x1xf32>
    %96 = vector.broadcast %95 : vector<4x1xf32> to vector<4x128xf32>
    %97 = arith.mulf %92, %96 : vector<4x128xf32>
    %98 = arith.truncf %97 : vector<4x128xf32> to vector<4x128xbf16>
    %c0_22 = arith.constant 0 : index
    %c0_23 = arith.constant 0 : index
    %c0_24 = arith.constant 0 : index
    %99 = vector.load %arg3[%c0_22, %c0_23, %c0_24] : memref<1x4x128xbf16, #tpu.memory_space<vmem>>, vector<1x4x128xbf16>
    %100 = vector.shape_cast %99 : vector<1x4x128xbf16> to vector<4x128xbf16>
    %101 = vector.shape_cast %98 : vector<4x128xbf16> to vector<1x4x128xbf16>
    tpu.vector_store %arg3[%c0_22, %c0_23, %c0_24], %101 {strides = array<i32>} : memref<1x4x128xbf16, #tpu.memory_space<vmem>>, vector<1x4x128xbf16>,
    return
  }
  func.func @transform_0(%arg0: i32) -> (i32, i32, i32) {
    %c0_i32 = arith.constant 0 : i32
    %c0_i32_0 = arith.constant 0 : i32
    %c0_i32_1 = arith.constant 0 : i32
    return %arg0, %c0_i32, %c0_i32_0 : i32, i32, i32
  }
  func.func @transform_1(%arg0: i32) -> (i32, i32) {
    %c0_i32 = arith.constant 0 : i32
    %c0_i32_0 = arith.constant 0 : i32
    %c0_i32_1 = arith.constant 0 : i32
    return %c0_i32, %c0_i32_0 : i32, i32
  }
  func.func @transform_2(%arg0: i32) -> (i32, i32, i32) {
    %c0_i32 = arith.constant 0 : i32
    %c0_i32_0 = arith.constant 0 : i32
    %c0_i32_1 = arith.constant 0 : i32
    return %arg0, %c0_i32, %c0_i32_0 : i32, i32, i32
  }
}

module attributes {stable_mosaic.version = 11 : i64} {
  func.func @_conv_in_act_kernel(%arg0: i32, %arg1: memref<1x16x640xbf16, #tpu.memory_space<vmem>>, %arg2: memref<4x784xbf16, #tpu.memory_space<vmem>>, %arg3: memref<1x4x384xbf16, #tpu.memory_space<vmem>>, %arg4: memref<784x384xbf16, #tpu.memory_space<vmem>>) attributes {dimension_semantics = [#tpu.dimension_semantics<parallel>], iteration_bounds = array<i64: 2>, scalar_prefetch = 0 : i64, scratch_operands = 1 : i64, tpu.core_type = #tpu.core_type<tc>, window_params = [{transform_indices = @transform_0, window_bounds = array<i64: 1, 16, 640>}, {pipeline_mode = #tpu.pipeline_mode<synchronous>, transform_indices = @transform_1, window_bounds = array<i64: 4, 784>}, {transform_indices = @transform_2, window_bounds = array<i64: 1, 4, 384>}]} {
    %c0 = arith.constant 0 : index
    %c0_0 = arith.constant 0 : index
    %c0_1 = arith.constant 0 : index
    %0 = vector.load %arg1[%c0, %c0_0, %c0_1] : memref<1x16x640xbf16, #tpu.memory_space<vmem>>, vector<1x16x640xbf16>
    %1 = vector.shape_cast %0 : vector<1x16x640xbf16> to vector<16x640xbf16>
    %2 = vector.extract_strided_slice %1 {offsets = [0, 0], sizes = [16, 384], strides = [1, 1]} : vector<16x640xbf16> to vector<16x384xbf16>
    %c0_2 = arith.constant 0 : index
    %c0_3 = arith.constant 0 : index
    %3 = vector.load %arg4[%c0_2, %c0_3] : memref<784x384xbf16, #tpu.memory_space<vmem>>, vector<16x384xbf16>
    tpu.vector_store %arg4[%c0_2, %c0_3], %2 {strides = array<i32>} : memref<784x384xbf16, #tpu.memory_space<vmem>>, vector<16x384xbf16>,
    %4 = vector.extract_strided_slice %1 {offsets = [0, 1], sizes = [16, 384], strides = [1, 1]} : vector<16x640xbf16> to vector<16x384xbf16>
    %c16 = arith.constant 16 : index
    %c0_4 = arith.constant 0 : index
    %5 = vector.load %arg4[%c16, %c0_4] : memref<784x384xbf16, #tpu.memory_space<vmem>>, vector<16x384xbf16>
    tpu.vector_store %arg4[%c16, %c0_4], %4 {strides = array<i32>} : memref<784x384xbf16, #tpu.memory_space<vmem>>, vector<16x384xbf16>,
    %6 = vector.extract_strided_slice %1 {offsets = [0, 2], sizes = [16, 384], strides = [1, 1]} : vector<16x640xbf16> to vector<16x384xbf16>
    %c32 = arith.constant 32 : index
    %c0_5 = arith.constant 0 : index
    %7 = vector.load %arg4[%c32, %c0_5] : memref<784x384xbf16, #tpu.memory_space<vmem>>, vector<16x384xbf16>
    tpu.vector_store %arg4[%c32, %c0_5], %6 {strides = array<i32>} : memref<784x384xbf16, #tpu.memory_space<vmem>>, vector<16x384xbf16>,
    %8 = vector.extract_strided_slice %1 {offsets = [0, 3], sizes = [16, 384], strides = [1, 1]} : vector<16x640xbf16> to vector<16x384xbf16>
    %c48 = arith.constant 48 : index
    %c0_6 = arith.constant 0 : index
    %9 = vector.load %arg4[%c48, %c0_6] : memref<784x384xbf16, #tpu.memory_space<vmem>>, vector<16x384xbf16>
    tpu.vector_store %arg4[%c48, %c0_6], %8 {strides = array<i32>} : memref<784x384xbf16, #tpu.memory_space<vmem>>, vector<16x384xbf16>,
    %10 = vector.extract_strided_slice %1 {offsets = [0, 4], sizes = [16, 384], strides = [1, 1]} : vector<16x640xbf16> to vector<16x384xbf16>
    %c64 = arith.constant 64 : index
    %c0_7 = arith.constant 0 : index
    %11 = vector.load %arg4[%c64, %c0_7] : memref<784x384xbf16, #tpu.memory_space<vmem>>, vector<16x384xbf16>
    tpu.vector_store %arg4[%c64, %c0_7], %10 {strides = array<i32>} : memref<784x384xbf16, #tpu.memory_space<vmem>>, vector<16x384xbf16>,
    %12 = vector.extract_strided_slice %1 {offsets = [0, 5], sizes = [16, 384], strides = [1, 1]} : vector<16x640xbf16> to vector<16x384xbf16>
    %c80 = arith.constant 80 : index
    %c0_8 = arith.constant 0 : index
    %13 = vector.load %arg4[%c80, %c0_8] : memref<784x384xbf16, #tpu.memory_space<vmem>>, vector<16x384xbf16>
    tpu.vector_store %arg4[%c80, %c0_8], %12 {strides = array<i32>} : memref<784x384xbf16, #tpu.memory_space<vmem>>, vector<16x384xbf16>,
    %14 = vector.extract_strided_slice %1 {offsets = [0, 6], sizes = [16, 384], strides = [1, 1]} : vector<16x640xbf16> to vector<16x384xbf16>
    %c96 = arith.constant 96 : index
    %c0_9 = arith.constant 0 : index
    %15 = vector.load %arg4[%c96, %c0_9] : memref<784x384xbf16, #tpu.memory_space<vmem>>, vector<16x384xbf16>
    tpu.vector_store %arg4[%c96, %c0_9], %14 {strides = array<i32>} : memref<784x384xbf16, #tpu.memory_space<vmem>>, vector<16x384xbf16>,
    %16 = vector.extract_strided_slice %1 {offsets = [0, 22], sizes = [16, 384], strides = [1, 1]} : vector<16x640xbf16> to vector<16x384xbf16>
    %c112 = arith.constant 112 : index
    %c0_10 = arith.constant 0 : index
    %17 = vector.load %arg4[%c112, %c0_10] : memref<784x384xbf16, #tpu.memory_space<vmem>>, vector<16x384xbf16>
    tpu.vector_store %arg4[%c112, %c0_10], %16 {strides = array<i32>} : memref<784x384xbf16, #tpu.memory_space<vmem>>, vector<16x384xbf16>,
    %18 = vector.extract_strided_slice %1 {offsets = [0, 23], sizes = [16, 384], strides = [1, 1]} : vector<16x640xbf16> to vector<16x384xbf16>
    %c128 = arith.constant 128 : index
    %c0_11 = arith.constant 0 : index
    %19 = vector.load %arg4[%c128, %c0_11] : memref<784x384xbf16, #tpu.memory_space<vmem>>, vector<16x384xbf16>
    tpu.vector_store %arg4[%c128, %c0_11], %18 {strides = array<i32>} : memref<784x384xbf16, #tpu.memory_space<vmem>>, vector<16x384xbf16>,
    %20 = vector.extract_strided_slice %1 {offsets = [0, 24], sizes = [16, 384], strides = [1, 1]} : vector<16x640xbf16> to vector<16x384xbf16>
    %c144 = arith.constant 144 : index
    %c0_12 = arith.constant 0 : index
    %21 = vector.load %arg4[%c144, %c0_12] : memref<784x384xbf16, #tpu.memory_space<vmem>>, vector<16x384xbf16>
    tpu.vector_store %arg4[%c144, %c0_12], %20 {strides = array<i32>} : memref<784x384xbf16, #tpu.memory_space<vmem>>, vector<16x384xbf16>,
    %22 = vector.extract_strided_slice %1 {offsets = [0, 25], sizes = [16, 384], strides = [1, 1]} : vector<16x640xbf16> to vector<16x384xbf16>
    %c160 = arith.constant 160 : index
    %c0_13 = arith.constant 0 : index
    %23 = vector.load %arg4[%c160, %c0_13] : memref<784x384xbf16, #tpu.memory_space<vmem>>, vector<16x384xbf16>
    tpu.vector_store %arg4[%c160, %c0_13], %22 {strides = array<i32>} : memref<784x384xbf16, #tpu.memory_space<vmem>>, vector<16x384xbf16>,
    %24 = vector.extract_strided_slice %1 {offsets = [0, 26], sizes = [16, 384], strides = [1, 1]} : vector<16x640xbf16> to vector<16x384xbf16>
    %c176 = arith.constant 176 : index
    %c0_14 = arith.constant 0 : index
    %25 = vector.load %arg4[%c176, %c0_14] : memref<784x384xbf16, #tpu.memory_space<vmem>>, vector<16x384xbf16>
    tpu.vector_store %arg4[%c176, %c0_14], %24 {strides = array<i32>} : memref<784x384xbf16, #tpu.memory_space<vmem>>, vector<16x384xbf16>,
    %26 = vector.extract_strided_slice %1 {offsets = [0, 27], sizes = [16, 384], strides = [1, 1]} : vector<16x640xbf16> to vector<16x384xbf16>
    %c192 = arith.constant 192 : index
    %c0_15 = arith.constant 0 : index
    %27 = vector.load %arg4[%c192, %c0_15] : memref<784x384xbf16, #tpu.memory_space<vmem>>, vector<16x384xbf16>
    tpu.vector_store %arg4[%c192, %c0_15], %26 {strides = array<i32>} : memref<784x384xbf16, #tpu.memory_space<vmem>>, vector<16x384xbf16>,
    %28 = vector.extract_strided_slice %1 {offsets = [0, 28], sizes = [16, 384], strides = [1, 1]} : vector<16x640xbf16> to vector<16x384xbf16>
    %c208 = arith.constant 208 : index
    %c0_16 = arith.constant 0 : index
    %29 = vector.load %arg4[%c208, %c0_16] : memref<784x384xbf16, #tpu.memory_space<vmem>>, vector<16x384xbf16>
    tpu.vector_store %arg4[%c208, %c0_16], %28 {strides = array<i32>} : memref<784x384xbf16, #tpu.memory_space<vmem>>, vector<16x384xbf16>,
    %30 = vector.extract_strided_slice %1 {offsets = [0, 44], sizes = [16, 384], strides = [1, 1]} : vector<16x640xbf16> to vector<16x384xbf16>
    %c224 = arith.constant 224 : index
    %c0_17 = arith.constant 0 : index
    %31 = vector.load %arg4[%c224, %c0_17] : memref<784x384xbf16, #tpu.memory_space<vmem>>, vector<16x384xbf16>
    tpu.vector_store %arg4[%c224, %c0_17], %30 {strides = array<i32>} : memref<784x384xbf16, #tpu.memory_space<vmem>>, vector<16x384xbf16>,
    %32 = vector.extract_strided_slice %1 {offsets = [0, 45], sizes = [16, 384], strides = [1, 1]} : vector<16x640xbf16> to vector<16x384xbf16>
    %c240 = arith.constant 240 : index
    %c0_18 = arith.constant 0 : index
    %33 = vector.load %arg4[%c240, %c0_18] : memref<784x384xbf16, #tpu.memory_space<vmem>>, vector<16x384xbf16>
    tpu.vector_store %arg4[%c240, %c0_18], %32 {strides = array<i32>} : memref<784x384xbf16, #tpu.memory_space<vmem>>, vector<16x384xbf16>,
    %34 = vector.extract_strided_slice %1 {offsets = [0, 46], sizes = [16, 384], strides = [1, 1]} : vector<16x640xbf16> to vector<16x384xbf16>
    %c256 = arith.constant 256 : index
    %c0_19 = arith.constant 0 : index
    %35 = vector.load %arg4[%c256, %c0_19] : memref<784x384xbf16, #tpu.memory_space<vmem>>, vector<16x384xbf16>
    tpu.vector_store %arg4[%c256, %c0_19], %34 {strides = array<i32>} : memref<784x384xbf16, #tpu.memory_space<vmem>>, vector<16x384xbf16>,
    %36 = vector.extract_strided_slice %1 {offsets = [0, 47], sizes = [16, 384], strides = [1, 1]} : vector<16x640xbf16> to vector<16x384xbf16>
    %c272 = arith.constant 272 : index
    %c0_20 = arith.constant 0 : index
    %37 = vector.load %arg4[%c272, %c0_20] : memref<784x384xbf16, #tpu.memory_space<vmem>>, vector<16x384xbf16>
    tpu.vector_store %arg4[%c272, %c0_20], %36 {strides = array<i32>} : memref<784x384xbf16, #tpu.memory_space<vmem>>, vector<16x384xbf16>,
    %38 = vector.extract_strided_slice %1 {offsets = [0, 48], sizes = [16, 384], strides = [1, 1]} : vector<16x640xbf16> to vector<16x384xbf16>
    %c288 = arith.constant 288 : index
    %c0_21 = arith.constant 0 : index
    %39 = vector.load %arg4[%c288, %c0_21] : memref<784x384xbf16, #tpu.memory_space<vmem>>, vector<16x384xbf16>
    tpu.vector_store %arg4[%c288, %c0_21], %38 {strides = array<i32>} : memref<784x384xbf16, #tpu.memory_space<vmem>>, vector<16x384xbf16>,
    %40 = vector.extract_strided_slice %1 {offsets = [0, 49], sizes = [16, 384], strides = [1, 1]} : vector<16x640xbf16> to vector<16x384xbf16>
    %c304 = arith.constant 304 : index
    %c0_22 = arith.constant 0 : index
    %41 = vector.load %arg4[%c304, %c0_22] : memref<784x384xbf16, #tpu.memory_space<vmem>>, vector<16x384xbf16>
    tpu.vector_store %arg4[%c304, %c0_22], %40 {strides = array<i32>} : memref<784x384xbf16, #tpu.memory_space<vmem>>, vector<16x384xbf16>,
    %42 = vector.extract_strided_slice %1 {offsets = [0, 50], sizes = [16, 384], strides = [1, 1]} : vector<16x640xbf16> to vector<16x384xbf16>
    %c320 = arith.constant 320 : index
    %c0_23 = arith.constant 0 : index
    %43 = vector.load %arg4[%c320, %c0_23] : memref<784x384xbf16, #tpu.memory_space<vmem>>, vector<16x384xbf16>
    tpu.vector_store %arg4[%c320, %c0_23], %42 {strides = array<i32>} : memref<784x384xbf16, #tpu.memory_space<vmem>>, vector<16x384xbf16>,
    %44 = vector.extract_strided_slice %1 {offsets = [0, 66], sizes = [16, 384], strides = [1, 1]} : vector<16x640xbf16> to vector<16x384xbf16>
    %c336 = arith.constant 336 : index
    %c0_24 = arith.constant 0 : index
    %45 = vector.load %arg4[%c336, %c0_24] : memref<784x384xbf16, #tpu.memory_space<vmem>>, vector<16x384xbf16>
    tpu.vector_store %arg4[%c336, %c0_24], %44 {strides = array<i32>} : memref<784x384xbf16, #tpu.memory_space<vmem>>, vector<16x384xbf16>,
    %46 = vector.extract_strided_slice %1 {offsets = [0, 67], sizes = [16, 384], strides = [1, 1]} : vector<16x640xbf16> to vector<16x384xbf16>
    %c352 = arith.constant 352 : index
    %c0_25 = arith.constant 0 : index
    %47 = vector.load %arg4[%c352, %c0_25] : memref<784x384xbf16, #tpu.memory_space<vmem>>, vector<16x384xbf16>
    tpu.vector_store %arg4[%c352, %c0_25], %46 {strides = array<i32>} : memref<784x384xbf16, #tpu.memory_space<vmem>>, vector<16x384xbf16>,
    %48 = vector.extract_strided_slice %1 {offsets = [0, 68], sizes = [16, 384], strides = [1, 1]} : vector<16x640xbf16> to vector<16x384xbf16>
    %c368 = arith.constant 368 : index
    %c0_26 = arith.constant 0 : index
    %49 = vector.load %arg4[%c368, %c0_26] : memref<784x384xbf16, #tpu.memory_space<vmem>>, vector<16x384xbf16>
    tpu.vector_store %arg4[%c368, %c0_26], %48 {strides = array<i32>} : memref<784x384xbf16, #tpu.memory_space<vmem>>, vector<16x384xbf16>,
    %50 = vector.extract_strided_slice %1 {offsets = [0, 69], sizes = [16, 384], strides = [1, 1]} : vector<16x640xbf16> to vector<16x384xbf16>
    %c384 = arith.constant 384 : index
    %c0_27 = arith.constant 0 : index
    %51 = vector.load %arg4[%c384, %c0_27] : memref<784x384xbf16, #tpu.memory_space<vmem>>, vector<16x384xbf16>
    tpu.vector_store %arg4[%c384, %c0_27], %50 {strides = array<i32>} : memref<784x384xbf16, #tpu.memory_space<vmem>>, vector<16x384xbf16>,
    %52 = vector.extract_strided_slice %1 {offsets = [0, 70], sizes = [16, 384], strides = [1, 1]} : vector<16x640xbf16> to vector<16x384xbf16>
    %c400 = arith.constant 400 : index
    %c0_28 = arith.constant 0 : index
    %53 = vector.load %arg4[%c400, %c0_28] : memref<784x384xbf16, #tpu.memory_space<vmem>>, vector<16x384xbf16>
    tpu.vector_store %arg4[%c400, %c0_28], %52 {strides = array<i32>} : memref<784x384xbf16, #tpu.memory_space<vmem>>, vector<16x384xbf16>,
    %54 = vector.extract_strided_slice %1 {offsets = [0, 71], sizes = [16, 384], strides = [1, 1]} : vector<16x640xbf16> to vector<16x384xbf16>
    %c416 = arith.constant 416 : index
    %c0_29 = arith.constant 0 : index
    %55 = vector.load %arg4[%c416, %c0_29] : memref<784x384xbf16, #tpu.memory_space<vmem>>, vector<16x384xbf16>
    tpu.vector_store %arg4[%c416, %c0_29], %54 {strides = array<i32>} : memref<784x384xbf16, #tpu.memory_space<vmem>>, vector<16x384xbf16>,
    %56 = vector.extract_strided_slice %1 {offsets = [0, 72], sizes = [16, 384], strides = [1, 1]} : vector<16x640xbf16> to vector<16x384xbf16>
    %c432 = arith.constant 432 : index
    %c0_30 = arith.constant 0 : index
    %57 = vector.load %arg4[%c432, %c0_30] : memref<784x384xbf16, #tpu.memory_space<vmem>>, vector<16x384xbf16>
    tpu.vector_store %arg4[%c432, %c0_30], %56 {strides = array<i32>} : memref<784x384xbf16, #tpu.memory_space<vmem>>, vector<16x384xbf16>,
    %58 = vector.extract_strided_slice %1 {offsets = [0, 88], sizes = [16, 384], strides = [1, 1]} : vector<16x640xbf16> to vector<16x384xbf16>
    %c448 = arith.constant 448 : index
    %c0_31 = arith.constant 0 : index
    %59 = vector.load %arg4[%c448, %c0_31] : memref<784x384xbf16, #tpu.memory_space<vmem>>, vector<16x384xbf16>
    tpu.vector_store %arg4[%c448, %c0_31], %58 {strides = array<i32>} : memref<784x384xbf16, #tpu.memory_space<vmem>>, vector<16x384xbf16>,
    %60 = vector.extract_strided_slice %1 {offsets = [0, 89], sizes = [16, 384], strides = [1, 1]} : vector<16x640xbf16> to vector<16x384xbf16>
    %c464 = arith.constant 464 : index
    %c0_32 = arith.constant 0 : index
    %61 = vector.load %arg4[%c464, %c0_32] : memref<784x384xbf16, #tpu.memory_space<vmem>>, vector<16x384xbf16>
    tpu.vector_store %arg4[%c464, %c0_32], %60 {strides = array<i32>} : memref<784x384xbf16, #tpu.memory_space<vmem>>, vector<16x384xbf16>,
    %62 = vector.extract_strided_slice %1 {offsets = [0, 90], sizes = [16, 384], strides = [1, 1]} : vector<16x640xbf16> to vector<16x384xbf16>
    %c480 = arith.constant 480 : index
    %c0_33 = arith.constant 0 : index
    %63 = vector.load %arg4[%c480, %c0_33] : memref<784x384xbf16, #tpu.memory_space<vmem>>, vector<16x384xbf16>
    tpu.vector_store %arg4[%c480, %c0_33], %62 {strides = array<i32>} : memref<784x384xbf16, #tpu.memory_space<vmem>>, vector<16x384xbf16>,
    %64 = vector.extract_strided_slice %1 {offsets = [0, 91], sizes = [16, 384], strides = [1, 1]} : vector<16x640xbf16> to vector<16x384xbf16>
    %c496 = arith.constant 496 : index
    %c0_34 = arith.constant 0 : index
    %65 = vector.load %arg4[%c496, %c0_34] : memref<784x384xbf16, #tpu.memory_space<vmem>>, vector<16x384xbf16>
    tpu.vector_store %arg4[%c496, %c0_34], %64 {strides = array<i32>} : memref<784x384xbf16, #tpu.memory_space<vmem>>, vector<16x384xbf16>,
    %66 = vector.extract_strided_slice %1 {offsets = [0, 92], sizes = [16, 384], strides = [1, 1]} : vector<16x640xbf16> to vector<16x384xbf16>
    %c512 = arith.constant 512 : index
    %c0_35 = arith.constant 0 : index
    %67 = vector.load %arg4[%c512, %c0_35] : memref<784x384xbf16, #tpu.memory_space<vmem>>, vector<16x384xbf16>
    tpu.vector_store %arg4[%c512, %c0_35], %66 {strides = array<i32>} : memref<784x384xbf16, #tpu.memory_space<vmem>>, vector<16x384xbf16>,
    %68 = vector.extract_strided_slice %1 {offsets = [0, 93], sizes = [16, 384], strides = [1, 1]} : vector<16x640xbf16> to vector<16x384xbf16>
    %c528 = arith.constant 528 : index
    %c0_36 = arith.constant 0 : index
    %69 = vector.load %arg4[%c528, %c0_36] : memref<784x384xbf16, #tpu.memory_space<vmem>>, vector<16x384xbf16>
    tpu.vector_store %arg4[%c528, %c0_36], %68 {strides = array<i32>} : memref<784x384xbf16, #tpu.memory_space<vmem>>, vector<16x384xbf16>,
    %70 = vector.extract_strided_slice %1 {offsets = [0, 94], sizes = [16, 384], strides = [1, 1]} : vector<16x640xbf16> to vector<16x384xbf16>
    %c544 = arith.constant 544 : index
    %c0_37 = arith.constant 0 : index
    %71 = vector.load %arg4[%c544, %c0_37] : memref<784x384xbf16, #tpu.memory_space<vmem>>, vector<16x384xbf16>
    tpu.vector_store %arg4[%c544, %c0_37], %70 {strides = array<i32>} : memref<784x384xbf16, #tpu.memory_space<vmem>>, vector<16x384xbf16>,
    %72 = vector.extract_strided_slice %1 {offsets = [0, 110], sizes = [16, 384], strides = [1, 1]} : vector<16x640xbf16> to vector<16x384xbf16>
    %c560 = arith.constant 560 : index
    %c0_38 = arith.constant 0 : index
    %73 = vector.load %arg4[%c560, %c0_38] : memref<784x384xbf16, #tpu.memory_space<vmem>>, vector<16x384xbf16>
    tpu.vector_store %arg4[%c560, %c0_38], %72 {strides = array<i32>} : memref<784x384xbf16, #tpu.memory_space<vmem>>, vector<16x384xbf16>,
    %74 = vector.extract_strided_slice %1 {offsets = [0, 111], sizes = [16, 384], strides = [1, 1]} : vector<16x640xbf16> to vector<16x384xbf16>
    %c576 = arith.constant 576 : index
    %c0_39 = arith.constant 0 : index
    %75 = vector.load %arg4[%c576, %c0_39] : memref<784x384xbf16, #tpu.memory_space<vmem>>, vector<16x384xbf16>
    tpu.vector_store %arg4[%c576, %c0_39], %74 {strides = array<i32>} : memref<784x384xbf16, #tpu.memory_space<vmem>>, vector<16x384xbf16>,
    %76 = vector.extract_strided_slice %1 {offsets = [0, 112], sizes = [16, 384], strides = [1, 1]} : vector<16x640xbf16> to vector<16x384xbf16>
    %c592 = arith.constant 592 : index
    %c0_40 = arith.constant 0 : index
    %77 = vector.load %arg4[%c592, %c0_40] : memref<784x384xbf16, #tpu.memory_space<vmem>>, vector<16x384xbf16>
    tpu.vector_store %arg4[%c592, %c0_40], %76 {strides = array<i32>} : memref<784x384xbf16, #tpu.memory_space<vmem>>, vector<16x384xbf16>,
    %78 = vector.extract_strided_slice %1 {offsets = [0, 113], sizes = [16, 384], strides = [1, 1]} : vector<16x640xbf16> to vector<16x384xbf16>
    %c608 = arith.constant 608 : index
    %c0_41 = arith.constant 0 : index
    %79 = vector.load %arg4[%c608, %c0_41] : memref<784x384xbf16, #tpu.memory_space<vmem>>, vector<16x384xbf16>
    tpu.vector_store %arg4[%c608, %c0_41], %78 {strides = array<i32>} : memref<784x384xbf16, #tpu.memory_space<vmem>>, vector<16x384xbf16>,
    %80 = vector.extract_strided_slice %1 {offsets = [0, 114], sizes = [16, 384], strides = [1, 1]} : vector<16x640xbf16> to vector<16x384xbf16>
    %c624 = arith.constant 624 : index
    %c0_42 = arith.constant 0 : index
    %81 = vector.load %arg4[%c624, %c0_42] : memref<784x384xbf16, #tpu.memory_space<vmem>>, vector<16x384xbf16>
    tpu.vector_store %arg4[%c624, %c0_42], %80 {strides = array<i32>} : memref<784x384xbf16, #tpu.memory_space<vmem>>, vector<16x384xbf16>,
    %82 = vector.extract_strided_slice %1 {offsets = [0, 115], sizes = [16, 384], strides = [1, 1]} : vector<16x640xbf16> to vector<16x384xbf16>
    %c640 = arith.constant 640 : index
    %c0_43 = arith.constant 0 : index
    %83 = vector.load %arg4[%c640, %c0_43] : memref<784x384xbf16, #tpu.memory_space<vmem>>, vector<16x384xbf16>
    tpu.vector_store %arg4[%c640, %c0_43], %82 {strides = array<i32>} : memref<784x384xbf16, #tpu.memory_space<vmem>>, vector<16x384xbf16>,
    %84 = vector.extract_strided_slice %1 {offsets = [0, 116], sizes = [16, 384], strides = [1, 1]} : vector<16x640xbf16> to vector<16x384xbf16>
    %c656 = arith.constant 656 : index
    %c0_44 = arith.constant 0 : index
    %85 = vector.load %arg4[%c656, %c0_44] : memref<784x384xbf16, #tpu.memory_space<vmem>>, vector<16x384xbf16>
    tpu.vector_store %arg4[%c656, %c0_44], %84 {strides = array<i32>} : memref<784x384xbf16, #tpu.memory_space<vmem>>, vector<16x384xbf16>,
    %86 = vector.extract_strided_slice %1 {offsets = [0, 132], sizes = [16, 384], strides = [1, 1]} : vector<16x640xbf16> to vector<16x384xbf16>
    %c672 = arith.constant 672 : index
    %c0_45 = arith.constant 0 : index
    %87 = vector.load %arg4[%c672, %c0_45] : memref<784x384xbf16, #tpu.memory_space<vmem>>, vector<16x384xbf16>
    tpu.vector_store %arg4[%c672, %c0_45], %86 {strides = array<i32>} : memref<784x384xbf16, #tpu.memory_space<vmem>>, vector<16x384xbf16>,
    %88 = vector.extract_strided_slice %1 {offsets = [0, 133], sizes = [16, 384], strides = [1, 1]} : vector<16x640xbf16> to vector<16x384xbf16>
    %c688 = arith.constant 688 : index
    %c0_46 = arith.constant 0 : index
    %89 = vector.load %arg4[%c688, %c0_46] : memref<784x384xbf16, #tpu.memory_space<vmem>>, vector<16x384xbf16>
    tpu.vector_store %arg4[%c688, %c0_46], %88 {strides = array<i32>} : memref<784x384xbf16, #tpu.memory_space<vmem>>, vector<16x384xbf16>,
    %90 = vector.extract_strided_slice %1 {offsets = [0, 134], sizes = [16, 384], strides = [1, 1]} : vector<16x640xbf16> to vector<16x384xbf16>
    %c704 = arith.constant 704 : index
    %c0_47 = arith.constant 0 : index
    %91 = vector.load %arg4[%c704, %c0_47] : memref<784x384xbf16, #tpu.memory_space<vmem>>, vector<16x384xbf16>
    tpu.vector_store %arg4[%c704, %c0_47], %90 {strides = array<i32>} : memref<784x384xbf16, #tpu.memory_space<vmem>>, vector<16x384xbf16>,
    %92 = vector.extract_strided_slice %1 {offsets = [0, 135], sizes = [16, 384], strides = [1, 1]} : vector<16x640xbf16> to vector<16x384xbf16>
    %c720 = arith.constant 720 : index
    %c0_48 = arith.constant 0 : index
    %93 = vector.load %arg4[%c720, %c0_48] : memref<784x384xbf16, #tpu.memory_space<vmem>>, vector<16x384xbf16>
    tpu.vector_store %arg4[%c720, %c0_48], %92 {strides = array<i32>} : memref<784x384xbf16, #tpu.memory_space<vmem>>, vector<16x384xbf16>,
    %94 = vector.extract_strided_slice %1 {offsets = [0, 136], sizes = [16, 384], strides = [1, 1]} : vector<16x640xbf16> to vector<16x384xbf16>
    %c736 = arith.constant 736 : index
    %c0_49 = arith.constant 0 : index
    %95 = vector.load %arg4[%c736, %c0_49] : memref<784x384xbf16, #tpu.memory_space<vmem>>, vector<16x384xbf16>
    tpu.vector_store %arg4[%c736, %c0_49], %94 {strides = array<i32>} : memref<784x384xbf16, #tpu.memory_space<vmem>>, vector<16x384xbf16>,
    %96 = vector.extract_strided_slice %1 {offsets = [0, 137], sizes = [16, 384], strides = [1, 1]} : vector<16x640xbf16> to vector<16x384xbf16>
    %c752 = arith.constant 752 : index
    %c0_50 = arith.constant 0 : index
    %97 = vector.load %arg4[%c752, %c0_50] : memref<784x384xbf16, #tpu.memory_space<vmem>>, vector<16x384xbf16>
    tpu.vector_store %arg4[%c752, %c0_50], %96 {strides = array<i32>} : memref<784x384xbf16, #tpu.memory_space<vmem>>, vector<16x384xbf16>,
    %98 = vector.extract_strided_slice %1 {offsets = [0, 138], sizes = [16, 384], strides = [1, 1]} : vector<16x640xbf16> to vector<16x384xbf16>
    %c768 = arith.constant 768 : index
    %c0_51 = arith.constant 0 : index
    %99 = vector.load %arg4[%c768, %c0_51] : memref<784x384xbf16, #tpu.memory_space<vmem>>, vector<16x384xbf16>
    tpu.vector_store %arg4[%c768, %c0_51], %98 {strides = array<i32>} : memref<784x384xbf16, #tpu.memory_space<vmem>>, vector<16x384xbf16>,
    %c0_52 = arith.constant 0 : index
    %c0_53 = arith.constant 0 : index
    %100 = vector.load %arg2[%c0_52, %c0_53] : memref<4x784xbf16, #tpu.memory_space<vmem>>, vector<4x784xbf16>
    %c0_54 = arith.constant 0 : index
    %c0_55 = arith.constant 0 : index
    %101 = vector.load %arg4[%c0_54, %c0_55] : memref<784x384xbf16, #tpu.memory_space<vmem>>, vector<784x384xbf16>
    %cst = arith.constant dense<0.000000e+00> : vector<4x384xf32>
    %102 = tpu.matmul %100, %101, %cst {dimension_numbers = #tpu.dot_dimension_numbers<[1], [0], [0], [1], [0, 0, 1, 1], [], []>} : vector<4x784xbf16>, vector<784x384xbf16>, vector<4x384xf32> -> vector<4x384xf32>
    %103 = tpu.iota {dimensions = array<i32: 1>} : vector<1x384xi32>
    %c0_i32 = arith.constant 0 : i32
    %104 = vector.broadcast %c0_i32 : i32 to vector<1x384xi32>
    %105 = arith.cmpi slt, %103, %104 : vector<1x384xi32>
    %c0_i32_56 = arith.constant 0 : i32
    %106 = vector.broadcast %c0_i32_56 : i32 to vector<1x384xi32>
    %107 = arith.cmpi sge, %103, %106 : vector<1x384xi32>
    %c16_i32 = arith.constant 16 : i32
    %108 = vector.broadcast %c16_i32 : i32 to vector<1x384xi32>
    %109 = arith.cmpi slt, %103, %108 : vector<1x384xi32>
    %110 = arith.andi %107, %109 : vector<1x384xi1>
    %111 = arith.ori %105, %110 : vector<1x384xi1>
    %c22_i32 = arith.constant 22 : i32
    %112 = vector.broadcast %c22_i32 : i32 to vector<1x384xi32>
    %113 = arith.cmpi sge, %103, %112 : vector<1x384xi32>
    %c38_i32 = arith.constant 38 : i32
    %114 = vector.broadcast %c38_i32 : i32 to vector<1x384xi32>
    %115 = arith.cmpi slt, %103, %114 : vector<1x384xi32>
    %116 = arith.andi %113, %115 : vector<1x384xi1>
    %117 = arith.ori %111, %116 : vector<1x384xi1>
    %c44_i32 = arith.constant 44 : i32
    %118 = vector.broadcast %c44_i32 : i32 to vector<1x384xi32>
    %119 = arith.cmpi sge, %103, %118 : vector<1x384xi32>
    %c60_i32 = arith.constant 60 : i32
    %120 = vector.broadcast %c60_i32 : i32 to vector<1x384xi32>
    %121 = arith.cmpi slt, %103, %120 : vector<1x384xi32>
    %122 = arith.andi %119, %121 : vector<1x384xi1>
    %123 = arith.ori %117, %122 : vector<1x384xi1>
    %c66_i32 = arith.constant 66 : i32
    %124 = vector.broadcast %c66_i32 : i32 to vector<1x384xi32>
    %125 = arith.cmpi sge, %103, %124 : vector<1x384xi32>
    %c82_i32 = arith.constant 82 : i32
    %126 = vector.broadcast %c82_i32 : i32 to vector<1x384xi32>
    %127 = arith.cmpi slt, %103, %126 : vector<1x384xi32>
    %128 = arith.andi %125, %127 : vector<1x384xi1>
    %129 = arith.ori %123, %128 : vector<1x384xi1>
    %c88_i32 = arith.constant 88 : i32
    %130 = vector.broadcast %c88_i32 : i32 to vector<1x384xi32>
    %131 = arith.cmpi sge, %103, %130 : vector<1x384xi32>
    %c104_i32 = arith.constant 104 : i32
    %132 = vector.broadcast %c104_i32 : i32 to vector<1x384xi32>
    %133 = arith.cmpi slt, %103, %132 : vector<1x384xi32>
    %134 = arith.andi %131, %133 : vector<1x384xi1>
    %135 = arith.ori %129, %134 : vector<1x384xi1>
    %c110_i32 = arith.constant 110 : i32
    %136 = vector.broadcast %c110_i32 : i32 to vector<1x384xi32>
    %137 = arith.cmpi sge, %103, %136 : vector<1x384xi32>
    %c126_i32 = arith.constant 126 : i32
    %138 = vector.broadcast %c126_i32 : i32 to vector<1x384xi32>
    %139 = arith.cmpi slt, %103, %138 : vector<1x384xi32>
    %140 = arith.andi %137, %139 : vector<1x384xi1>
    %141 = arith.ori %135, %140 : vector<1x384xi1>
    %c132_i32 = arith.constant 132 : i32
    %142 = vector.broadcast %c132_i32 : i32 to vector<1x384xi32>
    %143 = arith.cmpi sge, %103, %142 : vector<1x384xi32>
    %c148_i32 = arith.constant 148 : i32
    %144 = vector.broadcast %c148_i32 : i32 to vector<1x384xi32>
    %145 = arith.cmpi slt, %103, %144 : vector<1x384xi32>
    %146 = arith.andi %143, %145 : vector<1x384xi1>
    %147 = arith.ori %141, %146 : vector<1x384xi1>
    %c154_i32 = arith.constant 154 : i32
    %148 = vector.broadcast %c154_i32 : i32 to vector<1x384xi32>
    %149 = arith.cmpi sge, %103, %148 : vector<1x384xi32>
    %c170_i32 = arith.constant 170 : i32
    %150 = vector.broadcast %c170_i32 : i32 to vector<1x384xi32>
    %151 = arith.cmpi slt, %103, %150 : vector<1x384xi32>
    %152 = arith.andi %149, %151 : vector<1x384xi1>
    %153 = arith.ori %147, %152 : vector<1x384xi1>
    %c176_i32 = arith.constant 176 : i32
    %154 = vector.broadcast %c176_i32 : i32 to vector<1x384xi32>
    %155 = arith.cmpi sge, %103, %154 : vector<1x384xi32>
    %c192_i32 = arith.constant 192 : i32
    %156 = vector.broadcast %c192_i32 : i32 to vector<1x384xi32>
    %157 = arith.cmpi slt, %103, %156 : vector<1x384xi32>
    %158 = arith.andi %155, %157 : vector<1x384xi1>
    %159 = arith.ori %153, %158 : vector<1x384xi1>
    %c198_i32 = arith.constant 198 : i32
    %160 = vector.broadcast %c198_i32 : i32 to vector<1x384xi32>
    %161 = arith.cmpi sge, %103, %160 : vector<1x384xi32>
    %c214_i32 = arith.constant 214 : i32
    %162 = vector.broadcast %c214_i32 : i32 to vector<1x384xi32>
    %163 = arith.cmpi slt, %103, %162 : vector<1x384xi32>
    %164 = arith.andi %161, %163 : vector<1x384xi1>
    %165 = arith.ori %159, %164 : vector<1x384xi1>
    %c220_i32 = arith.constant 220 : i32
    %166 = vector.broadcast %c220_i32 : i32 to vector<1x384xi32>
    %167 = arith.cmpi sge, %103, %166 : vector<1x384xi32>
    %c236_i32 = arith.constant 236 : i32
    %168 = vector.broadcast %c236_i32 : i32 to vector<1x384xi32>
    %169 = arith.cmpi slt, %103, %168 : vector<1x384xi32>
    %170 = arith.andi %167, %169 : vector<1x384xi1>
    %171 = arith.ori %165, %170 : vector<1x384xi1>
    %c242_i32 = arith.constant 242 : i32
    %172 = vector.broadcast %c242_i32 : i32 to vector<1x384xi32>
    %173 = arith.cmpi sge, %103, %172 : vector<1x384xi32>
    %c258_i32 = arith.constant 258 : i32
    %174 = vector.broadcast %c258_i32 : i32 to vector<1x384xi32>
    %175 = arith.cmpi slt, %103, %174 : vector<1x384xi32>
    %176 = arith.andi %173, %175 : vector<1x384xi1>
    %177 = arith.ori %171, %176 : vector<1x384xi1>
    %c264_i32 = arith.constant 264 : i32
    %178 = vector.broadcast %c264_i32 : i32 to vector<1x384xi32>
    %179 = arith.cmpi sge, %103, %178 : vector<1x384xi32>
    %c280_i32 = arith.constant 280 : i32
    %180 = vector.broadcast %c280_i32 : i32 to vector<1x384xi32>
    %181 = arith.cmpi slt, %103, %180 : vector<1x384xi32>
    %182 = arith.andi %179, %181 : vector<1x384xi1>
    %183 = arith.ori %177, %182 : vector<1x384xi1>
    %c286_i32 = arith.constant 286 : i32
    %184 = vector.broadcast %c286_i32 : i32 to vector<1x384xi32>
    %185 = arith.cmpi sge, %103, %184 : vector<1x384xi32>
    %c302_i32 = arith.constant 302 : i32
    %186 = vector.broadcast %c302_i32 : i32 to vector<1x384xi32>
    %187 = arith.cmpi slt, %103, %186 : vector<1x384xi32>
    %188 = arith.andi %185, %187 : vector<1x384xi1>
    %189 = arith.ori %183, %188 : vector<1x384xi1>
    %c308_i32 = arith.constant 308 : i32
    %190 = vector.broadcast %c308_i32 : i32 to vector<1x384xi32>
    %191 = arith.cmpi sge, %103, %190 : vector<1x384xi32>
    %c324_i32 = arith.constant 324 : i32
    %192 = vector.broadcast %c324_i32 : i32 to vector<1x384xi32>
    %193 = arith.cmpi slt, %103, %192 : vector<1x384xi32>
    %194 = arith.andi %191, %193 : vector<1x384xi1>
    %195 = arith.ori %189, %194 : vector<1x384xi1>
    %c330_i32 = arith.constant 330 : i32
    %196 = vector.broadcast %c330_i32 : i32 to vector<1x384xi32>
    %197 = arith.cmpi sge, %103, %196 : vector<1x384xi32>
    %c346_i32 = arith.constant 346 : i32
    %198 = vector.broadcast %c346_i32 : i32 to vector<1x384xi32>
    %199 = arith.cmpi slt, %103, %198 : vector<1x384xi32>
    %200 = arith.andi %197, %199 : vector<1x384xi1>
    %201 = arith.ori %195, %200 : vector<1x384xi1>
    %202 = arith.extui %201 : vector<1x384xi1> to vector<1x384xi32>
    %203 = arith.sitofp %202 : vector<1x384xi32> to vector<1x384xf32>
    %204 = vector.broadcast %203 : vector<1x384xf32> to vector<4x384xf32>
    %205 = arith.mulf %102, %204 : vector<4x384xf32>
    %cst_57 = arith.constant dense<0.000000e+00> : vector<4xf32>
    %206 = vector.multi_reduction <add>, %205, %cst_57 [1] : vector<4x384xf32> to vector<4xf32>
    %207 = vector.shape_cast %206 : vector<4xf32> to vector<4x1xf32>
    %cst_58 = arith.constant 3.906250e-03 : f32
    %208 = vector.broadcast %cst_58 : f32 to vector<4x1xf32>
    %209 = arith.mulf %207, %208 : vector<4x1xf32>
    %210 = vector.broadcast %209 : vector<4x1xf32> to vector<4x384xf32>
    %211 = arith.subf %102, %210 : vector<4x384xf32>
    %212 = vector.broadcast %203 : vector<1x384xf32> to vector<4x384xf32>
    %213 = arith.mulf %211, %212 : vector<4x384xf32>
    %214 = arith.mulf %213, %213 : vector<4x384xf32>
    %cst_59 = arith.constant dense<0.000000e+00> : vector<4xf32>
    %215 = vector.multi_reduction <add>, %214, %cst_59 [1] : vector<4x384xf32> to vector<4xf32>
    %216 = vector.shape_cast %215 : vector<4xf32> to vector<4x1xf32>
    %cst_60 = arith.constant 3.906250e-03 : f32
    %217 = vector.broadcast %cst_60 : f32 to vector<4x1xf32>
    %218 = arith.mulf %216, %217 : vector<4x1xf32>
    %219 = vector.broadcast %209 : vector<4x1xf32> to vector<4x384xf32>
    %220 = arith.subf %102, %219 : vector<4x384xf32>
    %cst_61 = arith.constant 9.99999974E-6 : f32
    %221 = vector.broadcast %cst_61 : f32 to vector<4x1xf32>
    %222 = arith.addf %218, %221 : vector<4x1xf32>
    %223 = math.rsqrt %222 : vector<4x1xf32>
    %224 = vector.broadcast %223 : vector<4x1xf32> to vector<4x384xf32>
    %225 = arith.mulf %220, %224 : vector<4x384xf32>
    %cst_62 = arith.constant 0.00999999977 : f32
    %226 = vector.broadcast %cst_62 : f32 to vector<4x384xf32>
    %227 = arith.mulf %226, %225 : vector<4x384xf32>
    %228 = arith.maximumf %225, %227 : vector<4x384xf32>
    %229 = arith.truncf %228 : vector<4x384xf32> to vector<4x384xbf16>
    %c0_63 = arith.constant 0 : index
    %c0_64 = arith.constant 0 : index
    %c0_65 = arith.constant 0 : index
    %230 = vector.load %arg3[%c0_63, %c0_64, %c0_65] : memref<1x4x384xbf16, #tpu.memory_space<vmem>>, vector<1x4x384xbf16>
    %231 = vector.shape_cast %230 : vector<1x4x384xbf16> to vector<4x384xbf16>
    %232 = vector.shape_cast %229 : vector<4x384xbf16> to vector<1x4x384xbf16>
    tpu.vector_store %arg3[%c0_63, %c0_64, %c0_65], %232 {strides = array<i32>} : memref<1x4x384xbf16, #tpu.memory_space<vmem>>, vector<1x4x384xbf16>,
    return
  }
  func.func @transform_0(%arg0: i32) -> (i32, i32, i32) {
    %c0_i32 = arith.constant 0 : i32
    %c0_i32_0 = arith.constant 0 : i32
    %c0_i32_1 = arith.constant 0 : i32
    return %arg0, %c0_i32, %c0_i32_0 : i32, i32, i32
  }
  func.func @transform_1(%arg0: i32) -> (i32, i32) {
    %c0_i32 = arith.constant 0 : i32
    %c0_i32_0 = arith.constant 0 : i32
    %c0_i32_1 = arith.constant 0 : i32
    return %c0_i32, %c0_i32_0 : i32, i32
  }
  func.func @transform_2(%arg0: i32) -> (i32, i32, i32) {
    %c0_i32 = arith.constant 0 : i32
    %c0_i32_0 = arith.constant 0 : i32
    %c0_i32_1 = arith.constant 0 : i32
    return %arg0, %c0_i32, %c0_i32_0 : i32, i32, i32
  }
}

module attributes {stable_mosaic.version = 11 : i64} {
  func.func @_conv_in_act_kernel(%arg0: i32, %arg1: memref<1x16x512xbf16, #tpu.memory_space<vmem>>, %arg2: memref<4x144xbf16, #tpu.memory_space<vmem>>, %arg3: memref<1x4x384xf32, #tpu.memory_space<vmem>>, %arg4: memref<144x384xbf16, #tpu.memory_space<vmem>>) attributes {dimension_semantics = [#tpu.dimension_semantics<parallel>], iteration_bounds = array<i64: 2>, scalar_prefetch = 0 : i64, scratch_operands = 1 : i64, tpu.core_type = #tpu.core_type<tc>, window_params = [{transform_indices = @transform_0, window_bounds = array<i64: 1, 16, 512>}, {pipeline_mode = #tpu.pipeline_mode<synchronous>, transform_indices = @transform_1, window_bounds = array<i64: 4, 144>}, {transform_indices = @transform_2, window_bounds = array<i64: 1, 4, 384>}]} {
    %c0 = arith.constant 0 : index
    %c0_0 = arith.constant 0 : index
    %c0_1 = arith.constant 0 : index
    %0 = vector.load %arg1[%c0, %c0_0, %c0_1] : memref<1x16x512xbf16, #tpu.memory_space<vmem>>, vector<1x16x512xbf16>
    %1 = vector.shape_cast %0 : vector<1x16x512xbf16> to vector<16x512xbf16>
    %2 = vector.extract_strided_slice %1 {offsets = [0, 0], sizes = [16, 384], strides = [1, 1]} : vector<16x512xbf16> to vector<16x384xbf16>
    %c0_2 = arith.constant 0 : index
    %c0_3 = arith.constant 0 : index
    %3 = vector.load %arg4[%c0_2, %c0_3] : memref<144x384xbf16, #tpu.memory_space<vmem>>, vector<16x384xbf16>
    tpu.vector_store %arg4[%c0_2, %c0_3], %2 {strides = array<i32>} : memref<144x384xbf16, #tpu.memory_space<vmem>>, vector<16x384xbf16>,
    %4 = vector.extract_strided_slice %1 {offsets = [0, 1], sizes = [16, 384], strides = [1, 1]} : vector<16x512xbf16> to vector<16x384xbf16>
    %c16 = arith.constant 16 : index
    %c0_4 = arith.constant 0 : index
    %5 = vector.load %arg4[%c16, %c0_4] : memref<144x384xbf16, #tpu.memory_space<vmem>>, vector<16x384xbf16>
    tpu.vector_store %arg4[%c16, %c0_4], %4 {strides = array<i32>} : memref<144x384xbf16, #tpu.memory_space<vmem>>, vector<16x384xbf16>,
    %6 = vector.extract_strided_slice %1 {offsets = [0, 2], sizes = [16, 384], strides = [1, 1]} : vector<16x512xbf16> to vector<16x384xbf16>
    %c32 = arith.constant 32 : index
    %c0_5 = arith.constant 0 : index
    %7 = vector.load %arg4[%c32, %c0_5] : memref<144x384xbf16, #tpu.memory_space<vmem>>, vector<16x384xbf16>
    tpu.vector_store %arg4[%c32, %c0_5], %6 {strides = array<i32>} : memref<144x384xbf16, #tpu.memory_space<vmem>>, vector<16x384xbf16>,
    %8 = vector.extract_strided_slice %1 {offsets = [0, 18], sizes = [16, 384], strides = [1, 1]} : vector<16x512xbf16> to vector<16x384xbf16>
    %c48 = arith.constant 48 : index
    %c0_6 = arith.constant 0 : index
    %9 = vector.load %arg4[%c48, %c0_6] : memref<144x384xbf16, #tpu.memory_space<vmem>>, vector<16x384xbf16>
    tpu.vector_store %arg4[%c48, %c0_6], %8 {strides = array<i32>} : memref<144x384xbf16, #tpu.memory_space<vmem>>, vector<16x384xbf16>,
    %10 = vector.extract_strided_slice %1 {offsets = [0, 19], sizes = [16, 384], strides = [1, 1]} : vector<16x512xbf16> to vector<16x384xbf16>
    %c64 = arith.constant 64 : index
    %c0_7 = arith.constant 0 : index
    %11 = vector.load %arg4[%c64, %c0_7] : memref<144x384xbf16, #tpu.memory_space<vmem>>, vector<16x384xbf16>
    tpu.vector_store %arg4[%c64, %c0_7], %10 {strides = array<i32>} : memref<144x384xbf16, #tpu.memory_space<vmem>>, vector<16x384xbf16>,
    %12 = vector.extract_strided_slice %1 {offsets = [0, 20], sizes = [16, 384], strides = [1, 1]} : vector<16x512xbf16> to vector<16x384xbf16>
    %c80 = arith.constant 80 : index
    %c0_8 = arith.constant 0 : index
    %13 = vector.load %arg4[%c80, %c0_8] : memref<144x384xbf16, #tpu.memory_space<vmem>>, vector<16x384xbf16>
    tpu.vector_store %arg4[%c80, %c0_8], %12 {strides = array<i32>} : memref<144x384xbf16, #tpu.memory_space<vmem>>, vector<16x384xbf16>,
    %14 = vector.extract_strided_slice %1 {offsets = [0, 36], sizes = [16, 384], strides = [1, 1]} : vector<16x512xbf16> to vector<16x384xbf16>
    %c96 = arith.constant 96 : index
    %c0_9 = arith.constant 0 : index
    %15 = vector.load %arg4[%c96, %c0_9] : memref<144x384xbf16, #tpu.memory_space<vmem>>, vector<16x384xbf16>
    tpu.vector_store %arg4[%c96, %c0_9], %14 {strides = array<i32>} : memref<144x384xbf16, #tpu.memory_space<vmem>>, vector<16x384xbf16>,
    %16 = vector.extract_strided_slice %1 {offsets = [0, 37], sizes = [16, 384], strides = [1, 1]} : vector<16x512xbf16> to vector<16x384xbf16>
    %c112 = arith.constant 112 : index
    %c0_10 = arith.constant 0 : index
    %17 = vector.load %arg4[%c112, %c0_10] : memref<144x384xbf16, #tpu.memory_space<vmem>>, vector<16x384xbf16>
    tpu.vector_store %arg4[%c112, %c0_10], %16 {strides = array<i32>} : memref<144x384xbf16, #tpu.memory_space<vmem>>, vector<16x384xbf16>,
    %18 = vector.extract_strided_slice %1 {offsets = [0, 38], sizes = [16, 384], strides = [1, 1]} : vector<16x512xbf16> to vector<16x384xbf16>
    %c128 = arith.constant 128 : index
    %c0_11 = arith.constant 0 : index
    %19 = vector.load %arg4[%c128, %c0_11] : memref<144x384xbf16, #tpu.memory_space<vmem>>, vector<16x384xbf16>
    tpu.vector_store %arg4[%c128, %c0_11], %18 {strides = array<i32>} : memref<144x384xbf16, #tpu.memory_space<vmem>>, vector<16x384xbf16>,
    %c0_12 = arith.constant 0 : index
    %c0_13 = arith.constant 0 : index
    %20 = vector.load %arg2[%c0_12, %c0_13] : memref<4x144xbf16, #tpu.memory_space<vmem>>, vector<4x144xbf16>
    %c0_14 = arith.constant 0 : index
    %c0_15 = arith.constant 0 : index
    %21 = vector.load %arg4[%c0_14, %c0_15] : memref<144x384xbf16, #tpu.memory_space<vmem>>, vector<144x384xbf16>
    %cst = arith.constant dense<0.000000e+00> : vector<4x384xf32>
    %22 = tpu.matmul %20, %21, %cst {dimension_numbers = #tpu.dot_dimension_numbers<[1], [0], [0], [1], [0, 0, 1, 1], [], []>} : vector<4x144xbf16>, vector<144x384xbf16>, vector<4x384xf32> -> vector<4x384xf32>
    %23 = tpu.iota {dimensions = array<i32: 1>} : vector<1x384xi32>
    %c0_i32 = arith.constant 0 : i32
    %24 = vector.broadcast %c0_i32 : i32 to vector<1x384xi32>
    %25 = arith.cmpi slt, %23, %24 : vector<1x384xi32>
    %c0_i32_16 = arith.constant 0 : i32
    %26 = vector.broadcast %c0_i32_16 : i32 to vector<1x384xi32>
    %27 = arith.cmpi sge, %23, %26 : vector<1x384xi32>
    %c16_i32 = arith.constant 16 : i32
    %28 = vector.broadcast %c16_i32 : i32 to vector<1x384xi32>
    %29 = arith.cmpi slt, %23, %28 : vector<1x384xi32>
    %30 = arith.andi %27, %29 : vector<1x384xi1>
    %31 = arith.ori %25, %30 : vector<1x384xi1>
    %c18_i32 = arith.constant 18 : i32
    %32 = vector.broadcast %c18_i32 : i32 to vector<1x384xi32>
    %33 = arith.cmpi sge, %23, %32 : vector<1x384xi32>
    %c34_i32 = arith.constant 34 : i32
    %34 = vector.broadcast %c34_i32 : i32 to vector<1x384xi32>
    %35 = arith.cmpi slt, %23, %34 : vector<1x384xi32>
    %36 = arith.andi %33, %35 : vector<1x384xi1>
    %37 = arith.ori %31, %36 : vector<1x384xi1>
    %c36_i32 = arith.constant 36 : i32
    %38 = vector.broadcast %c36_i32 : i32 to vector<1x384xi32>
    %39 = arith.cmpi sge, %23, %38 : vector<1x384xi32>
    %c52_i32 = arith.constant 52 : i32
    %40 = vector.broadcast %c52_i32 : i32 to vector<1x384xi32>
    %41 = arith.cmpi slt, %23, %40 : vector<1x384xi32>
    %42 = arith.andi %39, %41 : vector<1x384xi1>
    %43 = arith.ori %37, %42 : vector<1x384xi1>
    %c54_i32 = arith.constant 54 : i32
    %44 = vector.broadcast %c54_i32 : i32 to vector<1x384xi32>
    %45 = arith.cmpi sge, %23, %44 : vector<1x384xi32>
    %c70_i32 = arith.constant 70 : i32
    %46 = vector.broadcast %c70_i32 : i32 to vector<1x384xi32>
    %47 = arith.cmpi slt, %23, %46 : vector<1x384xi32>
    %48 = arith.andi %45, %47 : vector<1x384xi1>
    %49 = arith.ori %43, %48 : vector<1x384xi1>
    %c72_i32 = arith.constant 72 : i32
    %50 = vector.broadcast %c72_i32 : i32 to vector<1x384xi32>
    %51 = arith.cmpi sge, %23, %50 : vector<1x384xi32>
    %c88_i32 = arith.constant 88 : i32
    %52 = vector.broadcast %c88_i32 : i32 to vector<1x384xi32>
    %53 = arith.cmpi slt, %23, %52 : vector<1x384xi32>
    %54 = arith.andi %51, %53 : vector<1x384xi1>
    %55 = arith.ori %49, %54 : vector<1x384xi1>
    %c90_i32 = arith.constant 90 : i32
    %56 = vector.broadcast %c90_i32 : i32 to vector<1x384xi32>
    %57 = arith.cmpi sge, %23, %56 : vector<1x384xi32>
    %c106_i32 = arith.constant 106 : i32
    %58 = vector.broadcast %c106_i32 : i32 to vector<1x384xi32>
    %59 = arith.cmpi slt, %23, %58 : vector<1x384xi32>
    %60 = arith.andi %57, %59 : vector<1x384xi1>
    %61 = arith.ori %55, %60 : vector<1x384xi1>
    %c108_i32 = arith.constant 108 : i32
    %62 = vector.broadcast %c108_i32 : i32 to vector<1x384xi32>
    %63 = arith.cmpi sge, %23, %62 : vector<1x384xi32>
    %c124_i32 = arith.constant 124 : i32
    %64 = vector.broadcast %c124_i32 : i32 to vector<1x384xi32>
    %65 = arith.cmpi slt, %23, %64 : vector<1x384xi32>
    %66 = arith.andi %63, %65 : vector<1x384xi1>
    %67 = arith.ori %61, %66 : vector<1x384xi1>
    %c126_i32 = arith.constant 126 : i32
    %68 = vector.broadcast %c126_i32 : i32 to vector<1x384xi32>
    %69 = arith.cmpi sge, %23, %68 : vector<1x384xi32>
    %c142_i32 = arith.constant 142 : i32
    %70 = vector.broadcast %c142_i32 : i32 to vector<1x384xi32>
    %71 = arith.cmpi slt, %23, %70 : vector<1x384xi32>
    %72 = arith.andi %69, %71 : vector<1x384xi1>
    %73 = arith.ori %67, %72 : vector<1x384xi1>
    %c144_i32 = arith.constant 144 : i32
    %74 = vector.broadcast %c144_i32 : i32 to vector<1x384xi32>
    %75 = arith.cmpi sge, %23, %74 : vector<1x384xi32>
    %c160_i32 = arith.constant 160 : i32
    %76 = vector.broadcast %c160_i32 : i32 to vector<1x384xi32>
    %77 = arith.cmpi slt, %23, %76 : vector<1x384xi32>
    %78 = arith.andi %75, %77 : vector<1x384xi1>
    %79 = arith.ori %73, %78 : vector<1x384xi1>
    %c162_i32 = arith.constant 162 : i32
    %80 = vector.broadcast %c162_i32 : i32 to vector<1x384xi32>
    %81 = arith.cmpi sge, %23, %80 : vector<1x384xi32>
    %c178_i32 = arith.constant 178 : i32
    %82 = vector.broadcast %c178_i32 : i32 to vector<1x384xi32>
    %83 = arith.cmpi slt, %23, %82 : vector<1x384xi32>
    %84 = arith.andi %81, %83 : vector<1x384xi1>
    %85 = arith.ori %79, %84 : vector<1x384xi1>
    %c180_i32 = arith.constant 180 : i32
    %86 = vector.broadcast %c180_i32 : i32 to vector<1x384xi32>
    %87 = arith.cmpi sge, %23, %86 : vector<1x384xi32>
    %c196_i32 = arith.constant 196 : i32
    %88 = vector.broadcast %c196_i32 : i32 to vector<1x384xi32>
    %89 = arith.cmpi slt, %23, %88 : vector<1x384xi32>
    %90 = arith.andi %87, %89 : vector<1x384xi1>
    %91 = arith.ori %85, %90 : vector<1x384xi1>
    %c198_i32 = arith.constant 198 : i32
    %92 = vector.broadcast %c198_i32 : i32 to vector<1x384xi32>
    %93 = arith.cmpi sge, %23, %92 : vector<1x384xi32>
    %c214_i32 = arith.constant 214 : i32
    %94 = vector.broadcast %c214_i32 : i32 to vector<1x384xi32>
    %95 = arith.cmpi slt, %23, %94 : vector<1x384xi32>
    %96 = arith.andi %93, %95 : vector<1x384xi1>
    %97 = arith.ori %91, %96 : vector<1x384xi1>
    %c216_i32 = arith.constant 216 : i32
    %98 = vector.broadcast %c216_i32 : i32 to vector<1x384xi32>
    %99 = arith.cmpi sge, %23, %98 : vector<1x384xi32>
    %c232_i32 = arith.constant 232 : i32
    %100 = vector.broadcast %c232_i32 : i32 to vector<1x384xi32>
    %101 = arith.cmpi slt, %23, %100 : vector<1x384xi32>
    %102 = arith.andi %99, %101 : vector<1x384xi1>
    %103 = arith.ori %97, %102 : vector<1x384xi1>
    %c234_i32 = arith.constant 234 : i32
    %104 = vector.broadcast %c234_i32 : i32 to vector<1x384xi32>
    %105 = arith.cmpi sge, %23, %104 : vector<1x384xi32>
    %c250_i32 = arith.constant 250 : i32
    %106 = vector.broadcast %c250_i32 : i32 to vector<1x384xi32>
    %107 = arith.cmpi slt, %23, %106 : vector<1x384xi32>
    %108 = arith.andi %105, %107 : vector<1x384xi1>
    %109 = arith.ori %103, %108 : vector<1x384xi1>
    %c252_i32 = arith.constant 252 : i32
    %110 = vector.broadcast %c252_i32 : i32 to vector<1x384xi32>
    %111 = arith.cmpi sge, %23, %110 : vector<1x384xi32>
    %c268_i32 = arith.constant 268 : i32
    %112 = vector.broadcast %c268_i32 : i32 to vector<1x384xi32>
    %113 = arith.cmpi slt, %23, %112 : vector<1x384xi32>
    %114 = arith.andi %111, %113 : vector<1x384xi1>
    %115 = arith.ori %109, %114 : vector<1x384xi1>
    %c270_i32 = arith.constant 270 : i32
    %116 = vector.broadcast %c270_i32 : i32 to vector<1x384xi32>
    %117 = arith.cmpi sge, %23, %116 : vector<1x384xi32>
    %c286_i32 = arith.constant 286 : i32
    %118 = vector.broadcast %c286_i32 : i32 to vector<1x384xi32>
    %119 = arith.cmpi slt, %23, %118 : vector<1x384xi32>
    %120 = arith.andi %117, %119 : vector<1x384xi1>
    %121 = arith.ori %115, %120 : vector<1x384xi1>
    %122 = arith.extui %121 : vector<1x384xi1> to vector<1x384xi32>
    %123 = arith.sitofp %122 : vector<1x384xi32> to vector<1x384xf32>
    %124 = vector.broadcast %123 : vector<1x384xf32> to vector<4x384xf32>
    %125 = arith.mulf %22, %124 : vector<4x384xf32>
    %cst_17 = arith.constant dense<0.000000e+00> : vector<4xf32>
    %126 = vector.multi_reduction <add>, %125, %cst_17 [1] : vector<4x384xf32> to vector<4xf32>
    %127 = vector.shape_cast %126 : vector<4xf32> to vector<4x1xf32>
    %cst_18 = arith.constant 3.906250e-03 : f32
    %128 = vector.broadcast %cst_18 : f32 to vector<4x1xf32>
    %129 = arith.mulf %127, %128 : vector<4x1xf32>
    %130 = vector.broadcast %129 : vector<4x1xf32> to vector<4x384xf32>
    %131 = arith.subf %22, %130 : vector<4x384xf32>
    %132 = vector.broadcast %123 : vector<1x384xf32> to vector<4x384xf32>
    %133 = arith.mulf %131, %132 : vector<4x384xf32>
    %134 = arith.mulf %133, %133 : vector<4x384xf32>
    %cst_19 = arith.constant dense<0.000000e+00> : vector<4xf32>
    %135 = vector.multi_reduction <add>, %134, %cst_19 [1] : vector<4x384xf32> to vector<4xf32>
    %136 = vector.shape_cast %135 : vector<4xf32> to vector<4x1xf32>
    %cst_20 = arith.constant 3.906250e-03 : f32
    %137 = vector.broadcast %cst_20 : f32 to vector<4x1xf32>
    %138 = arith.mulf %136, %137 : vector<4x1xf32>
    %139 = vector.broadcast %129 : vector<4x1xf32> to vector<4x384xf32>
    %140 = arith.subf %22, %139 : vector<4x384xf32>
    %cst_21 = arith.constant 9.99999974E-6 : f32
    %141 = vector.broadcast %cst_21 : f32 to vector<4x1xf32>
    %142 = arith.addf %138, %141 : vector<4x1xf32>
    %143 = math.rsqrt %142 : vector<4x1xf32>
    %144 = vector.broadcast %143 : vector<4x1xf32> to vector<4x384xf32>
    %145 = arith.mulf %140, %144 : vector<4x384xf32>
    %c0_22 = arith.constant 0 : index
    %c0_23 = arith.constant 0 : index
    %c0_24 = arith.constant 0 : index
    %146 = vector.load %arg3[%c0_22, %c0_23, %c0_24] : memref<1x4x384xf32, #tpu.memory_space<vmem>>, vector<1x4x384xf32>
    %147 = vector.shape_cast %146 : vector<1x4x384xf32> to vector<4x384xf32>
    %148 = vector.shape_cast %145 : vector<4x384xf32> to vector<1x4x384xf32>
    tpu.vector_store %arg3[%c0_22, %c0_23, %c0_24], %148 {strides = array<i32>} : memref<1x4x384xf32, #tpu.memory_space<vmem>>, vector<1x4x384xf32>,
    return
  }
  func.func @transform_0(%arg0: i32) -> (i32, i32, i32) {
    %c0_i32 = arith.constant 0 : i32
    %c0_i32_0 = arith.constant 0 : i32
    %c0_i32_1 = arith.constant 0 : i32
    return %arg0, %c0_i32, %c0_i32_0 : i32, i32, i32
  }
  func.func @transform_1(%arg0: i32) -> (i32, i32) {
    %c0_i32 = arith.constant 0 : i32
    %c0_i32_0 = arith.constant 0 : i32
    %c0_i32_1 = arith.constant 0 : i32
    return %c0_i32, %c0_i32_0 : i32, i32
  }
  func.func @transform_2(%arg0: i32) -> (i32, i32, i32) {
    %c0_i32 = arith.constant 0 : i32
    %c0_i32_0 = arith.constant 0 : i32
    %c0_i32_1 = arith.constant 0 : i32
    return %arg0, %c0_i32, %c0_i32_0 : i32, i32, i32
  }
}

</mosaic_0001>

<bundles_post_ra>
// kernel: unet_up_conv_forward.5
= control target key start
LH: loop header
LB: loop body
LE: loop exit
PB: predicated region body
PF: predicated region fallthrough
CT: control target
= control target key end

     0   :  { %s463_s9 = smov 0   ;;  %s496_s0 = inlined_call_operand.vmem [shape: bf16[2,16,256], index: 0, kind: input, shape index: {}]   ;;  %s497_s1 = inlined_call_operand.vmem [shape: bf16[4,144], index: 1, kind: input, shape index: {}]   ;;  %s498_s2 = inlined_call_operand.vmem [shape: bf16[2,4,128], index: 2, kind: output, shape index: {}]  }
   0x1 LB: > { %s391_s10 = sadd.s32 4294967295, %s436_s9   ;;  %p395_p0 = scmp.ge.s32.totalorder %s436_s9, 1  ;;  %s436_s9 = sphi %s463_s9, %s12_s9  }
   0x2   : > { %p112_p1 = scmp.lt.s32.totalorder %s436_s9, 3 }
   0x4   : > { %p113_p2 = pnand %p395_p0, %p112_p1 }
   0x5   : > { %p133_p3 = scmp.lt.s32.totalorder (!%p113_p2), %s391_s10, 1  ;;  %v438_v0 = vmov (!%p113_p2), 0   ;;  %s439_s15 = smov (!%p113_p2), 126   ;;  %vm239_vm0 = vcmask (!%p113_p2), 130048   ;;  %vm159_vm1 = vcmask (!%p113_p2), 1039360   ;;  %vm167_vm2 = vcmask (!%p113_p2), 1031168  }
   0x6   : > { %116 = sbr.rel (%p113_p2) target bundleno = 696 (0x2b8), region = 28  ;;  %243 = vmatprep.subr.bf16.mxu0 (!%p113_p2), %v438_v0  ;;  %s440_s16 = smov (!%p113_p2), 127   ;;  %v401_v3 = vld.sshfl [vmem:[%s497_s1] sm:$0x33 pattern:$0x76325410] (!%p113_p2)  ;;  %v283_v29 = vlaneseq (!%p113_p2) }
   0x7   : > { %s441_s17 = smov (!%p113_p2), 118   ;;  %s442_s18 = smov (!%p113_p2), 117   ;;  %v237_v4 = vcombine.high (!%p113_p2), %v401_v3, %v401_v3  ;;  %vm175_vm3 = vcmask (!%p113_p2), 965632   ;;  %vm183_vm4 = vcmask (!%p113_p2), 957440   ;;  %vm191_vm5 = vcmask (!%p113_p2), 949248  }
   0x8   : > { %s443_s19 = smov (!%p113_p2), 116   ;;  %s444_s22 = smov (!%p113_p2), 108   ;;  %vm199_vm6 = vcmask (!%p113_p2), 883712   ;;  %vm207_vm7 = vcmask (!%p113_p2), 875520   ;;  %vm215_vm8 = vcmask (!%p113_p2), 867328   ;;  %v284_v30 = vand.u32 (!%p113_p2), 127, %v283_v29 }
   0x9   : > { %402 = vmatprep.mubr.msk.bf16.mxu0 (!%p113_p2), %vm239_vm0, %v237_v4  ;;  %s445_s23 = smov (!%p113_p2), 107   ;;  %s446_s24 = smov (!%p113_p2), 106   ;;  %v447_v31 = vmov (!%p113_p2), 0.0  }
   0xa   : > { %vm290_vm9 = vcmp.ge.s32.totalorder (!%p113_p2), %v284_v30, 10  ;;  %vm291_vm10 = vcmp.lt.s32.totalorder (!%p113_p2), %v284_v30, 18  ;;  %vm287_vm11 = vcmp.lt.s32.totalorder (!%p113_p2), %v284_v30, 8  ;;  %vm294_vm13 = vcmp.ge.s32.totalorder (!%p113_p2), %v284_v30, 20 }
   0xb   : > { %vm292_vm12 = vmand (!%p113_p2), %vm290_vm9, %vm291_vm10  ;;  %vm295_vm14 = vcmp.lt.s32.totalorder (!%p113_p2), %v284_v30, 28  ;;  %vm306_vm9 = vcmp.ge.s32.totalorder (!%p113_p2), %v284_v30, 50  ;;  %vm307_vm10 = vcmp.lt.s32.totalorder (!%p113_p2), %v284_v30, 58 }
   0xc   : > { %vm293_vm15 = vmor (!%p113_p2), %vm287_vm11, %vm292_vm12 }
   0xd   : > { %s500_s10 = smov (!%p133_p3, %s391_s10), 1  ;;  %vm296_vm0 = vmand %vm294_vm13, %vm295_vm14  ;;  %vm310_vm13 = vcmp.ge.s32.totalorder %v284_v30, 60  ;;  %vm311_vm14 = vcmp.lt.s32.totalorder %v284_v30, 68 }
   0xe   : > { %s406_s11 = sshll.u32 %s500_s10, 4  ;;  %vm308_vm12 = vmand %vm306_vm9, %vm307_vm10  ;;  %s398_s25 = sshll.u32 %s500_s10, 1 }
   0xf   : > { %s137_s14 = scalar_lea.vmem %s496_s0, %s406_s11  ;;  %s141_s28 = scalar_lea.vmem %s498_s2, %s398_s25 }
  0x10   : > { %v425_v1 = vld [vmem:[%s137_s14] ss:$8 sps:$4 sm:$0xff]   ;;  %v427_v2 = vld [vmem:[%s137_s14 + $0x4] ss:$8 sps:$4 sm:$0xff]  }
  0x11   : > { %163 = vrot.lane.b32.xlu1 %v425_v1, %s439_s15  ;;  %155 = vrot.lane.b32.xlu0 %v425_v1, %s440_s16 }
  0x12   : > { %244 = vmatpush1.bf16.msra.mxu0 %v425_v1 }
  0x13   : > { %245 = vmatprep.subr.bf16.mxu0 %v438_v0 }
  0x15   : > { %165 = vrot.lane.b32.xlu1 %v427_v2, %s439_s15  ;;  %157 = vrot.lane.b32.xlu0 %v427_v2, %s440_s16 }
  0x19   : > { %173 = vrot.lane.b32.xlu1 %v427_v2, %s441_s17  ;;  %171 = vrot.lane.b32.xlu0 %v425_v1, %s441_s17 }
  0x1d   : > { %181 = vrot.lane.b32.xlu1 %v427_v2, %s442_s18  ;;  %179 = vrot.lane.b32.xlu0 %v425_v1, %s442_s18 }
  0x21   : > { %189 = vrot.lane.b32.xlu1 %v427_v2, %s443_s19  ;;  %187 = vrot.lane.b32.xlu0 %v425_v1, %s443_s19 }
  0x25   : > { %197 = vrot.lane.b32.xlu1 %v427_v2, %s444_s22  ;;  %195 = vrot.lane.b32.xlu0 %v425_v1, %s444_s22 }
  0x29   : > { %205 = vrot.lane.b32.xlu1 %v427_v2, %s445_s23  ;;  %203 = vrot.lane.b32.xlu0 %v425_v1, %s445_s23 }
  0x2d   : > { %213 = vrot.lane.b32.xlu1 %v427_v2, %s446_s24  ;;  %211 = vrot.lane.b32.xlu0 %v425_v1, %s446_s24 }
  0x83   : > { %v164_v5 = vpop.permute.xlu1 %163  ;;  %v156_v6 = vpop.permute.xlu0 %155 }
  0x87   : > { %v166_v7 = vpop.permute.xlu1 %165  ;;  %v158_v8 = vpop.permute.xlu0 %157 }
  0x88   : > { %v160_v9 = vsel %vm159_vm1, %v156_v6, %v158_v8  ;;  %v168_v12 = vsel %vm167_vm2, %v164_v5, %v166_v7  ;;  %vm298_vm1 = vcmp.ge.s32.totalorder %v284_v30, 30  ;;  %vm299_vm2 = vcmp.lt.s32.totalorder %v284_v30, 38 }
  0x89   : > { %246 = vmatpush1.bf16.msra.mxu0 %v160_v9 }
  0x8a   : > { %247 = vmatprep.subr.bf16.mxu0 %v438_v0 }
  0x8b   : > { %v174_v10 = vpop.permute.xlu1 %173  ;;  %v172_v11 = vpop.permute.xlu0 %171 }
  0x8c   : > { %v176_v13 = vsel %vm175_vm3, %v172_v11, %v174_v10  ;;  %vm297_vm3 = vmor %vm293_vm15, %vm296_vm0 }
  0x8d   : > { %248 = vmatpush1.bf16.msra.mxu0 %v168_v12  ;;  %vm312_vm15 = vmand %vm310_vm13, %vm311_vm14 }
  0x8e   : > { %249 = vmatprep.subr.bf16.mxu0 %v438_v0 }
  0x8f   : > { %v182_v14 = vpop.permute.xlu1 %181  ;;  %v180_v15 = vpop.permute.xlu0 %179 }
  0x90   : > { %v184_v16 = vsel %vm183_vm4, %v180_v15, %v182_v14  ;;  %vm300_vm4 = vmand %vm298_vm1, %vm299_vm2  ;;  %vm314_vm1 = vcmp.ge.s32.totalorder %v284_v30, 70  ;;  %vm315_vm2 = vcmp.lt.s32.totalorder %v284_v30, 78 }
  0x91   : > { %250 = vmatpush1.bf16.msra.mxu0 %v176_v13 }
  0x92   : > { %251 = vmatprep.subr.bf16.mxu0 %v438_v0 }
  0x93   : > { %v190_v17 = vpop.permute.xlu1 %189  ;;  %v188_v18 = vpop.permute.xlu0 %187 }
  0x94   : > { %v192_v19 = vsel %vm191_vm5, %v188_v18, %v190_v17  ;;  %vm302_vm5 = vcmp.ge.s32.totalorder %v284_v30, 40 }
  0x95   : > { %252 = vmatpush1.bf16.msra.mxu0 %v184_v16 }
  0x96   : > { %253 = vmatprep.subr.bf16.mxu0 %v438_v0 }
  0x97   : > { %v198_v20 = vpop.permute.xlu1 %197  ;;  %v196_v21 = vpop.permute.xlu0 %195 }
  0x98   : > { %v200_v22 = vsel %vm199_vm6, %v196_v21, %v198_v20  ;;  %vm303_vm6 = vcmp.lt.s32.totalorder %v284_v30, 48 }
  0x99   : > { %254 = vmatpush1.bf16.msra.mxu0 %v192_v19 }
  0x9a   : > { %255 = vmatprep.subr.bf16.mxu0 %v438_v0 }
  0x9b   : > { %v206_v23 = vpop.permute.xlu1 %205  ;;  %v204_v24 = vpop.permute.xlu0 %203 }
  0x9c   : > { %v208_v25 = vsel %vm207_vm7, %v204_v24, %v206_v23  ;;  %vm301_vm7 = vmor %vm297_vm3, %vm300_vm4 }
  0x9d   : > { %256 = vmatpush1.bf16.msra.mxu0 %v200_v22  ;;  %vm316_vm4 = vmand %vm314_vm1, %vm315_vm2 }
  0x9e   : > { %257 = vmatprep.subr.bf16.mxu0 %v438_v0 }
  0x9f   : > { %v214_v26 = vpop.permute.xlu1 %213  ;;  %v212_v27 = vpop.permute.xlu0 %211 }
  0xa0   : > { %v216_v28 = vsel %vm215_vm8, %v212_v27, %v214_v26  ;;  %vm304_vm8 = vmand %vm302_vm5, %vm303_vm6  ;;  %vm321_vm6 = vcmask 1043456  }
  0xa1   : > { %258 = vmatpush1.bf16.msra.mxu0 %v208_v25  ;;  %vm305_vm11 = vmor %vm301_vm7, %vm304_vm8 }
  0xa2   : > { %259 = vmatprep.subr.bf16.mxu0 %v438_v0  ;;  %vm309_vm0 = vmor %vm305_vm11, %vm308_vm12 }
  0xa3   : > { %vm313_vm3 = vmor %vm309_vm0, %vm312_vm15 }
  0xa4   : > { %vm317_vm5 = vmor %vm313_vm3, %vm316_vm4 }
  0xa5   : > { %260 = vmatpush1.bf16.msra.mxu0 %v216_v28  ;;  %v403_v32 = vsel %vm317_vm5, 1.0, %v447_v31 }
  0xa8   : > { %276 = vmatmul.mubr.bf16.vlgmr.msra.gmra.mrb[0].mxu0 %v401_v3 }
 0x17b   : > { %v277_v33 = vpop.f32.mrb[0].mxu0 }
 0x17c   : > { %v320_v34 = vmul.f32 %v403_v32, %v277_v33  ;;  %v279_v35 = vpop.f32.mrb[1].mxu0 }
 0x17d   : > { %v280_v36 = vpop.f32.mrb[2].mxu0 }
 0x17e   : > { %v281_v37 = vpop.f32.mrb[3].mxu0  ;;  %v322_v38 = vsel %vm321_vm6, %v320_v34, 0.0 }
 0x17f   : > { %323 = vadd.xlane.f32.xlu0 %v322_v38 }
 0x20c   : > { %v324_v39 = vpop.xlane.xlu0 %323 }
 0x20d   : > { %v325_v40 = vmul.f32 0.015625, %v324_v39 }
 0x20f   : > { %v326_v41 = vsub.f32 %v277_v33, %v325_v40 }
 0x211   : > { %v327_v42 = vmul.f32 %v403_v32, %v326_v41 }
 0x213   : > { %v328_v43 = vmul.f32 %v327_v42, %v327_v42 }
 0x215   : > { %v329_v44 = vsel %vm321_vm6, %v328_v43, 0.0 }
 0x216   : > { %330 = vadd.xlane.f32.xlu1 %v329_v44 }
 0x2a3   : > { %v331_v45 = vpop.xlane.xlu1 %330 }
 0x2a4   : > { %v332_v46 = vmul.f32 0.015625, %v331_v45 }
 0x2a6   : > { %v333_v47 = vadd.f32 1e-05, %v332_v46 }
 0x2a8   : > { %428 = vrsqrt.f32 %v333_v47 }
 0x2b2   : > { %v429_v48 = vpop.eup %428 }
 0x2b3   : > { %v335_v49 = vmul.f32 %v429_v48, %v326_v41 }
 0x2b5   : > { %v336_v50 = vpack.c.bf16 %v335_v49, %v335_v49 }
 0x2b7   : > { %337 = vst [vmem:[%s141_s28] sm:$0x3] %v336_v50 }
 0x2b8 PF: > { %s12_s9 = sadd.s32 1, %s436_s9  }
 0x2b9   : > { %p9_p4 = scmp.ge.s32.totalorder %s12_s9, 4  }
 0x2bb   :  { %11 = sbr.rel (!%p9_p4) target bundleno = 1 (0x1), region = 58 }

// kernel: unet_up_conv_forward.4
= control target key start
LH: loop header
LB: loop body
LE: loop exit
PB: predicated region body
PF: predicated region fallthrough
CT: control target
= control target key end

     0   :  { %s1134_s9 = smov 0   ;;  %s1298_s0 = inlined_call_operand.vmem [shape: bf16[2,16,256], index: 0, kind: input, shape index: {}]   ;;  %s1299_s1 = inlined_call_operand.vmem [shape: bf16[4,784], index: 1, kind: input, shape index: {}]   ;;  %s1300_s2 = inlined_call_operand.vmem [shape: bf16[2,4,128], index: 2, kind: output, shape index: {}]  }
   0x1 LB: > { %s905_s10 = sadd.s32 4294967295, %s1066_s9   ;;  %p909_p0 = scmp.ge.s32.totalorder %s1066_s9, 1  ;;  %s1066_s9 = sphi %s1134_s9, %s12_s9  }
   0x2   : > { %p112_p1 = scmp.lt.s32.totalorder %s1066_s9, 3 }
   0x4   : > { %p113_p2 = pnand %p909_p0, %p112_p1 }
   0x5   : > { %p133_p3 = scmp.lt.s32.totalorder (!%p113_p2), %s905_s10, 1  ;;  %s1068_s15 = smov (!%p113_p2), 112   ;;  %v1082_v2 = vmov (!%p113_p2), 1983009808   ;;  %v596_v4 = vlaneseq (!%p113_p2)  ;;  %v1188_v8 = vld [vmem:[%s1299_s1] sm:$0xff] (!%p113_p2)  ;;  %vm215_vm0 = vcmask (!%p113_p2), 924672  }
   0x6   : > { %116 = sbr.rel (%p113_p2) target bundleno = 859 (0x35b), region = 28  ;;  %s1069_s16 = smov (!%p113_p2), 113   ;;  %v594_v3 = vunpack.c.l.s4 (!%p113_p2), %v1082_v2  ;;  %vm223_vm1 = vcmask (!%p113_p2), 916480   ;;  %vm159_vm2 = vcmask (!%p113_p2), 1039360   ;;  %vm231_vm3 = vcmask (!%p113_p2), 908288  }
   0x7   : > { %s1070_s17 = smov (!%p113_p2), 127   ;;  %s1071_s18 = smov (!%p113_p2), 111   ;;  %v597_v6 = vshrl.u32 (!%p113_p2), %v596_v4, 7  ;;  %vm167_vm4 = vcmask (!%p113_p2), 1031168   ;;  %vm239_vm5 = vcmask (!%p113_p2), 900096   ;;  %vm175_vm6 = vcmask (!%p113_p2), 1022976  }
   0x8   : > { %s1072_s19 = smov (!%p113_p2), 126   ;;  %s1073_s20 = smov (!%p113_p2), 110   ;;  %v595_v5 = vunpack.c.0.s8 (!%p113_p2), %v594_v3  ;;  %vm247_vm7 = vcmask (!%p113_p2), 891904   ;;  %vm183_vm8 = vcmask (!%p113_p2), 1014784   ;;  %vm255_vm9 = vcmask (!%p113_p2), 883712  }
   0x9   : > { %s1074_s21 = smov (!%p113_p2), 125   ;;  %s1075_s22 = smov (!%p113_p2), 109   ;;  %vm191_vm10 = vcmask (!%p113_p2), 1006592   ;;  %vm263_vm11 = vcmask (!%p113_p2), 818176   ;;  %vm199_vm12 = vcmask (!%p113_p2), 998400   ;;  %v592_v47 = vcombine.high (!%p113_p2), %v1188_v8, %v1188_v8 }
   0xa   : > { %s1076_s23 = smov (!%p113_p2), 124   ;;  %s1077_s24 = smov (!%p113_p2), 108   ;;  %v1183_v7 = vsub.s32 (!%p113_p2), %v595_v5, %v597_v6  ;;  %vm271_vm13 = vcmask (!%p113_p2), 809984   ;;  %vm207_vm14 = vcmask (!%p113_p2), 932864   ;;  %v1263_v58 = vld [vmem:[%s1299_s1 + $0x8] sm:$0x3f] (!%p113_p2) }
   0xb   : > { %s1078_s25 = smov (!%p113_p2), 123   ;;  %s1079_s26 = smov (!%p113_p2), 100   ;;  %vm343_vm15 = vcmask (!%p113_p2), 678912  }
   0xc   : > { %s1080_s27 = smov (!%p113_p2), 122   ;;  %s1081_s28 = smov (!%p113_p2), 99   ;;  %v1194_v9 = vrot.slane (!%p113_p2), %v1188_v8, %v1183_v7  ;;  %v1252_v51 = vrot.slane (!%p113_p2), %v592_v47, %v1183_v7  ;;  %v1267_v60 = vrot.slane (!%p113_p2), %v1263_v58, %v1183_v7 }
   0xd   : > { %s1302_s10 = smov (!%p133_p3, %s905_s10), 1  ;;  %s1083_s29 = smov 114  }
   0xe   : > { %s919_s11 = sshll.u32 %s1302_s10, 4  ;;  %s1084_s4 = smov 83   ;;  %v607_v10 = vcombine.high %v1194_v9, %v1194_v9  ;;  %v608_v52 = vcombine.high %v1252_v51, %v1252_v51  ;;  %v624_v63 = vcombine.high %v1267_v60, %v1267_v60 }
   0xf   : > { %s137_s14 = scalar_lea.vmem %s1298_s0, %s919_s11  ;;  %s1085_s5 = smov 98  }
  0x10   : > { %v1148_v0 = vld [vmem:[%s137_s14] ss:$8 sps:$4 sm:$0xff]   ;;  %v1152_v1 = vld [vmem:[%s137_s14 + $0x4] ss:$8 sps:$4 sm:$0xff]   ;;  %667 = vmatprep.mubr.bf16.mxu0 %v607_v10  ;;  %s1086_s6 = smov 53   ;;  %s1087_s7 = smov 82   ;;  %707 = vmatprep.mubr.bf16.mxu1 %v608_v52 }
  0x11   : > { %219 = vrot.lane.b32.xlu1 %v1148_v0, %s1068_s15  ;;  %211 = vrot.lane.b32.xlu0 %v1148_v0, %s1069_s16  ;;  %s1088_s8 = smov 68   ;;  %s1089_s11 = smov 97  }
  0x12   : > { %s1090_s12 = smov 52   ;;  %s1091_s13 = smov 81  }
  0x13   : > { %s1092_s14 = smov 67   ;;  %s1108_s30 = smov 56  }
  0x14   : > { %s1109_s3 = smov 85  }
  0x15   : > { %221 = vrot.lane.b32.xlu1 %v1152_v1, %s1068_s15  ;;  %213 = vrot.lane.b32.xlu0 %v1152_v1, %s1069_s16  ;;  %s1093_s15 = smov 96   ;;  %s1094_s16 = smov 44  }
  0x19   : > { %157 = vrot.lane.b32.xlu1 %v1152_v1, %s1070_s17  ;;  %155 = vrot.lane.b32.xlu0 %v1148_v0, %s1070_s17  ;;  %s1095_s17 = smov 80  }
  0x1d   : > { %229 = vrot.lane.b32.xlu1 %v1152_v1, %s1071_s18  ;;  %227 = vrot.lane.b32.xlu0 %v1148_v0, %s1071_s18  ;;  %s1096_s18 = smov 66  }
  0x21   : > { %165 = vrot.lane.b32.xlu1 %v1152_v1, %s1072_s19  ;;  %163 = vrot.lane.b32.xlu0 %v1148_v0, %s1072_s19  ;;  %s1097_s19 = smov 95  }
  0x25   : > { %237 = vrot.lane.b32.xlu1 %v1152_v1, %s1073_s20  ;;  %235 = vrot.lane.b32.xlu0 %v1148_v0, %s1073_s20  ;;  %s1098_s20 = smov 43  }
  0x29   : > { %173 = vrot.lane.b32.xlu1 %v1152_v1, %s1074_s21  ;;  %171 = vrot.lane.b32.xlu0 %v1148_v0, %s1074_s21  ;;  %s1099_s21 = smov 72  }
  0x2d   : > { %245 = vrot.lane.b32.xlu1 %v1152_v1, %s1075_s22  ;;  %243 = vrot.lane.b32.xlu0 %v1148_v0, %s1075_s22  ;;  %s1100_s22 = smov 58  }
  0x31   : > { %181 = vrot.lane.b32.xlu1 %v1152_v1, %s1076_s23  ;;  %179 = vrot.lane.b32.xlu0 %v1148_v0, %s1076_s23  ;;  %s1101_s23 = smov 94  }
  0x35   : > { %253 = vrot.lane.b32.xlu1 %v1152_v1, %s1077_s24  ;;  %251 = vrot.lane.b32.xlu0 %v1148_v0, %s1077_s24  ;;  %s1102_s24 = smov 42  }
  0x39   : > { %189 = vrot.lane.b32.xlu1 %v1152_v1, %s1078_s25  ;;  %187 = vrot.lane.b32.xlu0 %v1148_v0, %s1078_s25  ;;  %s1103_s25 = smov 71  }
  0x3d   : > { %261 = vrot.lane.b32.xlu1 %v1152_v1, %s1079_s26  ;;  %259 = vrot.lane.b32.xlu0 %v1148_v0, %s1079_s26  ;;  %s1104_s26 = smov 57  }
  0x41   : > { %197 = vrot.lane.b32.xlu1 %v1152_v1, %s1080_s27  ;;  %195 = vrot.lane.b32.xlu0 %v1148_v0, %s1080_s27  ;;  %s1105_s27 = smov 86  }
  0x45   : > { %269 = vrot.lane.b32.xlu1 %v1152_v1, %s1081_s28  ;;  %267 = vrot.lane.b32.xlu0 %v1148_v0, %s1081_s28  ;;  %s1106_s28 = smov 41  }
  0x49   : > { %205 = vrot.lane.b32.xlu1 %v1152_v1, %s1083_s29  ;;  %203 = vrot.lane.b32.xlu0 %v1148_v0, %s1083_s29  ;;  %s1107_s29 = smov 70  }
  0x4d   : > { %341 = vrot.lane.b32.xlu1 %v1152_v1, %s1084_s4  ;;  %339 = vrot.lane.b32.xlu0 %v1148_v0, %s1084_s4  ;;  %s1110_s4 = smov 40  }
  0x51   : > { %277 = vrot.lane.b32.xlu1 %v1152_v1, %s1085_s5  ;;  %275 = vrot.lane.b32.xlu0 %v1148_v0, %s1085_s5  ;;  %s1111_s5 = smov 69  }
  0x55   : > { %469 = vrot.lane.b32.xlu1 %v1152_v1, %s1086_s6  ;;  %467 = vrot.lane.b32.xlu0 %v1148_v0, %s1086_s6 }
  0x59   : > { %349 = vrot.lane.b32.xlu1 %v1152_v1, %s1087_s7  ;;  %347 = vrot.lane.b32.xlu0 %v1148_v0, %s1087_s7 }
  0x5d   : > { %405 = vrot.lane.b32.xlu1 %v1152_v1, %s1088_s8  ;;  %403 = vrot.lane.b32.xlu0 %v1148_v0, %s1088_s8  ;;  %s1112_s8 = smov 55  }
  0x61   : > { %285 = vrot.lane.b32.xlu1 %v1152_v1, %s1089_s11  ;;  %283 = vrot.lane.b32.xlu0 %v1148_v0, %s1089_s11  ;;  %s1113_s11 = smov 84  }
  0x65   : > { %477 = vrot.lane.b32.xlu1 %v1152_v1, %s1090_s12  ;;  %475 = vrot.lane.b32.xlu0 %v1148_v0, %s1090_s12  ;;  %s1114_s12 = smov 39  }
  0x69   : > { %357 = vrot.lane.b32.xlu1 %v1152_v1, %s1091_s13  ;;  %355 = vrot.lane.b32.xlu0 %v1148_v0, %s1091_s13  ;;  %s1115_s13 = smov 54  }
  0x6d   : > { %413 = vrot.lane.b32.xlu1 %v1152_v1, %s1092_s14  ;;  %411 = vrot.lane.b32.xlu0 %v1148_v0, %s1092_s14  ;;  %s1116_s14 = smov 38  }
  0x71   : > { %293 = vrot.lane.b32.xlu1 %v1152_v1, %s1093_s15  ;;  %291 = vrot.lane.b32.xlu0 %v1148_v0, %s1093_s15  ;;  %s912_s15 = sshll.u32 %s1302_s10, 1 }
  0x75   : > { %485 = vrot.lane.b32.xlu1 %v1152_v1, %s1094_s16  ;;  %483 = vrot.lane.b32.xlu0 %v1148_v0, %s1094_s16 }
  0x79   : > { %365 = vrot.lane.b32.xlu1 %v1152_v1, %s1095_s17  ;;  %363 = vrot.lane.b32.xlu0 %v1148_v0, %s1095_s17 }
  0x7d   : > { %421 = vrot.lane.b32.xlu1 %v1152_v1, %s1096_s18  ;;  %419 = vrot.lane.b32.xlu0 %v1148_v0, %s1096_s18  ;;  %s141_s18 = scalar_lea.vmem %s1300_s2, %s912_s15 }
  0x81   : > { %301 = vrot.lane.b32.xlu1 %v1152_v1, %s1097_s19  ;;  %299 = vrot.lane.b32.xlu0 %v1148_v0, %s1097_s19 }
  0x83   : > { %v220_v11 = vpop.permute.xlu1 %219  ;;  %v212_v12 = vpop.permute.xlu0 %211 }
  0x85   : > { %493 = vrot.lane.b32.xlu1 %v1152_v1, %s1098_s20  ;;  %491 = vrot.lane.b32.xlu0 %v1148_v0, %s1098_s20 }
  0x87   : > { %v222_v13 = vpop.permute.xlu1 %221  ;;  %v214_v14 = vpop.permute.xlu0 %213 }
  0x88   : > { %v216_v15 = vsel %vm215_vm0, %v212_v12, %v214_v14  ;;  %v224_v17 = vsel %vm223_vm1, %v220_v11, %v222_v13  ;;  %vm279_vm0 = vcmask 801792   ;;  %vm471_vm1 = vcmask 433152  }
  0x89   : > { %373 = vrot.lane.b32.xlu1 %v1152_v1, %s1099_s21  ;;  %371 = vrot.lane.b32.xlu0 %v1148_v0, %s1099_s21 }
  0x8a   : > { %920 = vmatprep.subr.bf16.mxu0 %v216_v15 }
  0x8b   : > { %921 = vmatpush3.bf16.msra.mxu0 %v1148_v0  ;;  %v158_v16 = vpop.permute.xlu1 %157  ;;  %v156_v18 = vpop.permute.xlu0 %155 }
  0x8c   : > { %922 = vmatprep.subr.bf16.mxu0 %v224_v17  ;;  %v160_v19 = vsel %vm159_vm2, %v156_v18, %v158_v16  ;;  %vm351_vm2 = vcmask 670720  }
  0x8d   : > { %429 = vrot.lane.b32.xlu1 %v1152_v1, %s1100_s22  ;;  %427 = vrot.lane.b32.xlu0 %v1148_v0, %s1100_s22 }
  0x8f   : > { %923 = vmatpush3.bf16.msra.mxu0 %v160_v19  ;;  %v230_v20 = vpop.permute.xlu1 %229  ;;  %v228_v21 = vpop.permute.xlu0 %227 }
  0x90   : > { %v232_v22 = vsel %vm231_vm3, %v228_v21, %v230_v20  ;;  %vm407_vm3 = vcmask 556032  }
  0x91   : > { %309 = vrot.lane.b32.xlu1 %v1152_v1, %s1101_s23  ;;  %307 = vrot.lane.b32.xlu0 %v1148_v0, %s1101_s23 }
  0x92   : > { %924 = vmatprep.subr.bf16.mxu0 %v232_v22 }
  0x93   : > { %v166_v23 = vpop.permute.xlu1 %165  ;;  %v164_v24 = vpop.permute.xlu0 %163 }
  0x94   : > { %v168_v25 = vsel %vm167_vm4, %v164_v24, %v166_v23  ;;  %vm287_vm4 = vcmask 793600  }
  0x95   : > { %501 = vrot.lane.b32.xlu1 %v1152_v1, %s1102_s24  ;;  %499 = vrot.lane.b32.xlu0 %v1148_v0, %s1102_s24 }
  0x96   : > { %925 = vmatpush3.bf16.msra.mxu0 %v168_v25 }
  0x97   : > { %v238_v26 = vpop.permute.xlu1 %237  ;;  %v236_v27 = vpop.permute.xlu0 %235 }
  0x98   : > { %v240_v28 = vsel %vm239_vm5, %v236_v27, %v238_v26  ;;  %vm479_vm5 = vcmask 424960  }
  0x99   : > { %381 = vrot.lane.b32.xlu1 %v1152_v1, %s1103_s25  ;;  %379 = vrot.lane.b32.xlu0 %v1148_v0, %s1103_s25 }
  0x9a   : > { %926 = vmatprep.subr.bf16.mxu0 %v240_v28 }
  0x9b   : > { %v174_v29 = vpop.permute.xlu1 %173  ;;  %v172_v30 = vpop.permute.xlu0 %171 }
  0x9c   : > { %v176_v31 = vsel %vm175_vm6, %v172_v30, %v174_v29  ;;  %vm359_vm6 = vcmask 662528  }
  0x9d   : > { %437 = vrot.lane.b32.xlu1 %v1152_v1, %s1104_s26  ;;  %435 = vrot.lane.b32.xlu0 %v1148_v0, %s1104_s26 }
  0x9e   : > { %927 = vmatpush3.bf16.msra.mxu0 %v176_v31 }
  0x9f   : > { %v246_v32 = vpop.permute.xlu1 %245  ;;  %v244_v33 = vpop.permute.xlu0 %243 }
  0xa0   : > { %v248_v34 = vsel %vm247_vm7, %v244_v33, %v246_v32  ;;  %vm415_vm7 = vcmask 547840  }
  0xa1   : > { %317 = vrot.lane.b32.xlu1 %v1152_v1, %s1105_s27  ;;  %315 = vrot.lane.b32.xlu0 %v1148_v0, %s1105_s27 }
  0xa2   : > { %928 = vmatprep.subr.bf16.mxu0 %v248_v34 }
  0xa3   : > { %v182_v35 = vpop.permute.xlu1 %181  ;;  %v180_v36 = vpop.permute.xlu0 %179 }
  0xa4   : > { %v184_v37 = vsel %vm183_vm8, %v180_v36, %v182_v35  ;;  %vm295_vm8 = vcmask 785408  }
  0xa5   : > { %509 = vrot.lane.b32.xlu1 %v1152_v1, %s1106_s28  ;;  %507 = vrot.lane.b32.xlu0 %v1148_v0, %s1106_s28 }
  0xa6   : > { %929 = vmatpush3.bf16.msra.mxu0 %v184_v37 }
  0xa7   : > { %v254_v38 = vpop.permute.xlu1 %253  ;;  %v252_v39 = vpop.permute.xlu0 %251 }
  0xa8   : > { %v256_v40 = vsel %vm255_vm9, %v252_v39, %v254_v38  ;;  %vm487_vm9 = vcmask 359424  }
  0xa9   : > { %389 = vrot.lane.b32.xlu1 %v1152_v1, %s1107_s29  ;;  %387 = vrot.lane.b32.xlu0 %v1148_v0, %s1107_s29 }
  0xaa   : > { %930 = vmatprep.subr.bf16.mxu0 %v256_v40 }
  0xab   : > { %v190_v41 = vpop.permute.xlu1 %189  ;;  %v188_v42 = vpop.permute.xlu0 %187 }
  0xac   : > { %v192_v43 = vsel %vm191_vm10, %v188_v42, %v190_v41  ;;  %vm367_vm10 = vcmask 654336  }
  0xad   : > { %445 = vrot.lane.b32.xlu1 %v1152_v1, %s1108_s30  ;;  %443 = vrot.lane.b32.xlu0 %v1148_v0, %s1108_s30 }
  0xae   : > { %931 = vmatpush3.bf16.msra.mxu0 %v192_v43 }
  0xaf   : > { %v262_v44 = vpop.permute.xlu1 %261  ;;  %v260_v45 = vpop.permute.xlu0 %259 }
  0xb0   : > { %v264_v46 = vsel %vm263_vm11, %v260_v45, %v262_v44  ;;  %vm423_vm11 = vcmask 539648  }
  0xb1   : > { %325 = vrot.lane.b32.xlu1 %v1152_v1, %s1109_s3  ;;  %323 = vrot.lane.b32.xlu0 %v1148_v0, %s1109_s3 }
  0xb2   : > { %932 = vmatprep.subr.bf16.mxu0 %v264_v46 }
  0xb3   : > { %v198_v48 = vpop.permute.xlu1 %197  ;;  %v196_v49 = vpop.permute.xlu0 %195 }
  0xb4   : > { %v200_v50 = vsel %vm199_vm12, %v196_v49, %v198_v48  ;;  %vm303_vm12 = vcmask 777216  }
  0xb5   : > { %517 = vrot.lane.b32.xlu1 %v1152_v1, %s1110_s4  ;;  %515 = vrot.lane.b32.xlu0 %v1148_v0, %s1110_s4 }
  0xb6   : > { %933 = vmatpush3.bf16.msra.mxu0 %v200_v50 }
  0xb7   : > { %v270_v53 = vpop.permute.xlu1 %269  ;;  %v268_v54 = vpop.permute.xlu0 %267 }
  0xb8   : > { %v272_v55 = vsel %vm271_vm13, %v268_v54, %v270_v53  ;;  %vm495_vm13 = vcmask 351232  }
  0xb9   : > { %397 = vrot.lane.b32.xlu1 %v1152_v1, %s1111_s5  ;;  %395 = vrot.lane.b32.xlu0 %v1148_v0, %s1111_s5 }
  0xba   : > { %934 = vmatprep.subr.bf16.mxu0 %v272_v55 }
  0xbb   : > { %v206_v56 = vpop.permute.xlu1 %205  ;;  %v204_v57 = vpop.permute.xlu0 %203 }
  0xbc   : > { %v208_v59 = vsel %vm207_vm14, %v204_v57, %v206_v56  ;;  %vm375_vm14 = vcmask 588800  }
  0xbd   : > { %453 = vrot.lane.b32.xlu1 %v1152_v1, %s1112_s8  ;;  %451 = vrot.lane.b32.xlu0 %v1148_v0, %s1112_s8 }
  0xbe   : > { %935 = vmatpush3.bf16.msra.mxu0 %v208_v59 }
  0xbf   : > { %v342_v61 = vpop.permute.xlu1 %341  ;;  %v340_v62 = vpop.permute.xlu0 %339 }
  0xc0   : > { %v344_v2 = vsel %vm343_vm15, %v340_v62, %v342_v61  ;;  %vm431_vm15 = vcmask 474112  }
  0xc1   : > { %333 = vrot.lane.b32.xlu1 %v1152_v1, %s1113_s11  ;;  %331 = vrot.lane.b32.xlu0 %v1148_v0, %s1113_s11 }
  0xc2   : > { %942 = vmatprep.subr.bf16.mxu1 %v344_v2  ;;  %668 = vmatmul.mubr.bf16.vlgmr.msra.gmra.mrb[0].mxu0 %v1194_v9 }
  0xc3   : > { %v278_v3 = vpop.permute.xlu1 %277  ;;  %v276_v5 = vpop.permute.xlu0 %275  ;;  %747 = vmatprep.mubr.bf16.mxu0 %v624_v63 }
  0xc4   : > { %v280_v6 = vsel %vm279_vm0, %v276_v5, %v278_v3  ;;  %vm311_vm0 = vcmask 769024  }
  0xc5   : > { %525 = vrot.lane.b32.xlu1 %v1152_v1, %s1114_s12  ;;  %523 = vrot.lane.b32.xlu0 %v1148_v0, %s1114_s12 }
  0xc6   : > { %943 = vmatpush3.bf16.msra.mxu1 %v280_v6 }
  0xc7   : > { %v470_v8 = vpop.permute.xlu1 %469  ;;  %v468_v10 = vpop.permute.xlu0 %467 }
  0xc8   : > { %v472_v11 = vsel %vm471_vm1, %v468_v10, %v470_v8  ;;  %vm503_vm1 = vcmask 343040  }
  0xc9   : > { %461 = vrot.lane.b32.xlu1 %v1152_v1, %s1115_s13  ;;  %459 = vrot.lane.b32.xlu0 %v1148_v0, %s1115_s13 }
  0xca   : > { %964 = vmatprep.subr.bf16.mxu0 %v472_v11 }
  0xcb   : > { %v350_v9 = vpop.permute.xlu1 %349  ;;  %v348_v12 = vpop.permute.xlu0 %347 }
  0xcc   : > { %v352_v13 = vsel %vm351_vm2, %v348_v12, %v350_v9  ;;  %vm383_vm2 = vcmask 580608  }
  0xcd   : > { %533 = vrot.lane.b32.xlu1 %v1152_v1, %s1116_s14  ;;  %531 = vrot.lane.b32.xlu0 %v1148_v0, %s1116_s14 }
  0xce   : > { %944 = vmatprep.subr.bf16.mxu1 %v352_v13 }
  0xcf   : > { %v406_v14 = vpop.permute.xlu1 %405  ;;  %v404_v15 = vpop.permute.xlu0 %403 }
  0xd0   : > { %v408_v16 = vsel %vm407_vm3, %v404_v15, %v406_v14  ;;  %vm439_vm3 = vcmask 465920  }
  0xd1   : > { %965 = vmatpush3.bf16.msra.mxu0 %v408_v16 }
  0xd3   : > { %v286_v17 = vpop.permute.xlu1 %285  ;;  %v284_v18 = vpop.permute.xlu0 %283 }
  0xd4   : > { %v288_v19 = vsel %vm287_vm4, %v284_v18, %v286_v17  ;;  %vm319_vm4 = vcmask 703488  }
  0xd5   : > { %945 = vmatpush3.bf16.msra.mxu1 %v288_v19 }
  0xd7   : > { %v478_v20 = vpop.permute.xlu1 %477  ;;  %v476_v21 = vpop.permute.xlu0 %475 }
  0xd8   : > { %v480_v22 = vsel %vm479_vm5, %v476_v21, %v478_v20  ;;  %vm511_vm5 = vcmask 334848  }
  0xd9   : > { %966 = vmatprep.subr.bf16.mxu0 %v480_v22 }
  0xdb   : > { %v358_v1 = vpop.permute.xlu1 %357  ;;  %v356_v23 = vpop.permute.xlu0 %355 }
  0xdc   : > { %v360_v0 = vsel %vm359_vm6, %v356_v23, %v358_v1  ;;  %vm391_vm6 = vcmask 572416  }
  0xdd   : > { %946 = vmatprep.subr.bf16.mxu1 %v360_v0 }
  0xdf   : > { %v414_v24 = vpop.permute.xlu1 %413  ;;  %v412_v25 = vpop.permute.xlu0 %411 }
  0xe0   : > { %v416_v26 = vsel %vm415_vm7, %v412_v25, %v414_v24  ;;  %vm447_vm7 = vcmask 457728  }
  0xe1   : > { %967 = vmatpush3.bf16.msra.mxu0 %v416_v26 }
  0xe3   : > { %v294_v27 = vpop.permute.xlu1 %293  ;;  %v292_v28 = vpop.permute.xlu0 %291 }
  0xe4   : > { %v296_v29 = vsel %vm295_vm8, %v292_v28, %v294_v27  ;;  %vm327_vm8 = vcmask 695296  }
  0xe5   : > { %947 = vmatpush3.bf16.msra.mxu1 %v296_v29 }
  0xe7   : > { %v486_v30 = vpop.permute.xlu1 %485  ;;  %v484_v31 = vpop.permute.xlu0 %483 }
  0xe8   : > { %v488_v32 = vsel %vm487_vm9, %v484_v31, %v486_v30  ;;  %vm519_vm9 = vcmask 326656   ;;  %v1117_v31 = vmov 0.0  }
  0xe9   : > { %968 = vmatprep.subr.bf16.mxu0 %v488_v32 }
  0xeb   : > { %v366_v33 = vpop.permute.xlu1 %365  ;;  %v364_v34 = vpop.permute.xlu0 %363 }
  0xec   : > { %v368_v35 = vsel %vm367_vm10, %v364_v34, %v366_v33  ;;  %vm399_vm10 = vcmask 564224  }
  0xed   : > { %948 = vmatprep.subr.bf16.mxu1 %v368_v35 }
  0xef   : > { %v422_v36 = vpop.permute.xlu1 %421  ;;  %v420_v37 = vpop.permute.xlu0 %419 }
  0xf0   : > { %v424_v38 = vsel %vm423_vm11, %v420_v37, %v422_v36  ;;  %vm455_vm11 = vcmask 449536  }
  0xf1   : > { %969 = vmatpush3.bf16.msra.mxu0 %v424_v38  ;;  %v609_v38 = vcombine.high %v1263_v58, %v1263_v58 }
  0xf3   : > { %v302_v39 = vpop.permute.xlu1 %301  ;;  %v300_v40 = vpop.permute.xlu0 %299 }
  0xf4   : > { %v304_v41 = vsel %vm303_vm12, %v300_v40, %v302_v39  ;;  %vm335_vm12 = vcmask 687104  }
  0xf5   : > { %949 = vmatpush3.bf16.msra.mxu1 %v304_v41  ;;  %v623_v41 = vrot.slane %v609_v38, %v1183_v7 }
  0xf7   : > { %v494_v42 = vpop.permute.xlu1 %493  ;;  %v492_v43 = vpop.permute.xlu0 %491 }
  0xf8   : > { %v496_v44 = vsel %vm495_vm13, %v492_v43, %v494_v42  ;;  %vm527_vm13 = vcmask 318464  }
  0xf9   : > { %970 = vmatprep.subr.bf16.mxu0 %v496_v44 }
  0xfb   : > { %v374_v45 = vpop.permute.xlu1 %373  ;;  %v372_v46 = vpop.permute.xlu0 %371 }
  0xfc   : > { %v376_v47 = vsel %vm375_vm14, %v372_v46, %v374_v45  ;;  %vm463_vm14 = vcmask 441344  }
  0xfd   : > { %950 = vmatprep.subr.bf16.mxu1 %v376_v47  ;;  %v796_v47 = vand.u32 127, %v596_v4 }
  0xff   : > { %v430_v48 = vpop.permute.xlu1 %429  ;;  %v428_v49 = vpop.permute.xlu0 %427 }
 0x100   : > { %v432_v50 = vsel %vm431_vm15, %v428_v49, %v430_v48  ;;  %vm1118_vm15 = vmmov 0  }
 0x101   : > { %971 = vmatpush3.bf16.msra.mxu0 %v432_v50 }
 0x103   : > { %v310_v52 = vpop.permute.xlu1 %309  ;;  %v308_v53 = vpop.permute.xlu0 %307 }
 0x104   : > { %v312_v54 = vsel %vm311_vm0, %v308_v53, %v310_v52  ;;  %vm535_vm0 = vcmask 310272  }
 0x105   : > { %951 = vmatpush3.bf16.msra.mxu1 %v312_v54 }
 0x107   : > { %v502_v55 = vpop.permute.xlu1 %501  ;;  %v500_v56 = vpop.permute.xlu0 %499 }
 0x108   : > { %v504_v57 = vsel %vm503_vm1, %v500_v56, %v502_v55  ;;  %vm631_vm1 = vcmask 130048  }
 0x109   : > { %972 = vmatprep.subr.bf16.mxu0 %v504_v57 }
 0x10b   : > { %v382_v59 = vpop.permute.xlu1 %381  ;;  %v380_v61 = vpop.permute.xlu0 %379 }
 0x10c   : > { %v384_v62 = vsel %vm383_vm2, %v380_v61, %v382_v59  ;;  %vm802_vm2 = vcmp.ge.s32.totalorder %v796_v47, 14 }
 0x10d   : > { %952 = vmatprep.subr.bf16.mxu1 %v384_v62 }
 0x10f   : > { %v438_v63 = vpop.permute.xlu1 %437  ;;  %v436_v2 = vpop.permute.xlu0 %435 }
 0x110   : > { %v440_v3 = vsel %vm439_vm3, %v436_v2, %v438_v63  ;;  %vm803_vm3 = vcmp.lt.s32.totalorder %v796_v47, 22 }
 0x111   : > { %973 = vmatpush3.bf16.msra.mxu0 %v440_v3 }
 0x113   : > { %v318_v5 = vpop.permute.xlu1 %317  ;;  %v316_v6 = vpop.permute.xlu0 %315 }
 0x114   : > { %v320_v8 = vsel %vm319_vm4, %v316_v6, %v318_v5  ;;  %vm799_vm4 = vcmp.lt.s32.totalorder %v796_v47, 8 }
 0x115   : > { %953 = vmatpush3.bf16.msra.mxu1 %v320_v8 }
 0x117   : > { %v510_v10 = vpop.permute.xlu1 %509  ;;  %v508_v11 = vpop.permute.xlu0 %507 }
 0x118   : > { %v512_v9 = vsel %vm511_vm5, %v508_v11, %v510_v10  ;;  %vm804_vm5 = vmand %vm802_vm2, %vm803_vm3  ;;  %vm818_vm2 = vcmp.ge.s32.totalorder %v796_v47, 70  ;;  %vm819_vm3 = vcmp.lt.s32.totalorder %v796_v47, 78 }
 0x119   : > { %974 = vmatprep.subr.bf16.mxu0 %v512_v9 }
 0x11b   : > { %v390_v12 = vpop.permute.xlu1 %389  ;;  %v388_v13 = vpop.permute.xlu0 %387 }
 0x11c   : > { %v392_v14 = vsel %vm391_vm6, %v388_v13, %v390_v12  ;;  %vm806_vm6 = vcmp.ge.s32.totalorder %v796_v47, 28 }
 0x11d   : > { %954 = vmatprep.subr.bf16.mxu1 %v392_v14 }
 0x11f   : > { %v446_v15 = vpop.permute.xlu1 %445  ;;  %v444_v16 = vpop.permute.xlu0 %443 }
 0x120   : > { %v448_v17 = vsel %vm447_vm7, %v444_v16, %v446_v15  ;;  %vm807_vm7 = vcmp.lt.s32.totalorder %v796_v47, 36 }
 0x121   : > { %975 = vmatpush3.bf16.msra.mxu0 %v448_v17 }
 0x123   : > { %v326_v18 = vpop.permute.xlu1 %325  ;;  %v324_v19 = vpop.permute.xlu0 %323 }
 0x124   : > { %v328_v20 = vsel %vm327_vm8, %v324_v19, %v326_v18  ;;  %vm805_vm8 = vmor %vm799_vm4, %vm804_vm5 }
 0x125   : > { %955 = vmatpush3.bf16.msra.mxu1 %v328_v20  ;;  %vm820_vm5 = vmand %vm818_vm2, %vm819_vm3 }
 0x127   : > { %v518_v21 = vpop.permute.xlu1 %517  ;;  %v516_v22 = vpop.permute.xlu0 %515 }
 0x128   : > { %v520_v1 = vsel %vm519_vm9, %v516_v22, %v518_v21  ;;  %vm808_vm9 = vmand %vm806_vm6, %vm807_vm7  ;;  %vm822_vm6 = vcmp.ge.s32.totalorder %v796_v47, 84  ;;  %vm823_vm7 = vcmp.lt.s32.totalorder %v796_v47, 92 }
 0x129   : > { %976 = vmatprep.subr.bf16.mxu0 %v520_v1 }
 0x12b   : > { %v398_v23 = vpop.permute.xlu1 %397  ;;  %v396_v0 = vpop.permute.xlu0 %395 }
 0x12c   : > { %v400_v24 = vsel %vm399_vm10, %v396_v0, %v398_v23  ;;  %vm810_vm10 = vcmp.ge.s32.totalorder %v796_v47, 42 }
 0x12d   : > { %956 = vmatprep.subr.bf16.mxu1 %v400_v24 }
 0x12f   : > { %v454_v25 = vpop.permute.xlu1 %453  ;;  %v452_v26 = vpop.permute.xlu0 %451 }
 0x130   : > { %v456_v27 = vsel %vm455_vm11, %v452_v26, %v454_v25  ;;  %vm811_vm11 = vcmp.lt.s32.totalorder %v796_v47, 50 }
 0x131   : > { %977 = vmatpush3.bf16.msra.mxu0 %v456_v27 }
 0x133   : > { %v334_v28 = vpop.permute.xlu1 %333  ;;  %v332_v29 = vpop.permute.xlu0 %331 }
 0x134   : > { %v336_v30 = vsel %vm335_vm12, %v332_v29, %v334_v28  ;;  %vm809_vm12 = vmor %vm805_vm8, %vm808_vm9 }
 0x135   : > { %957 = vmatpush3.bf16.msra.mxu1 %v336_v30  ;;  %vm824_vm9 = vmand %vm822_vm6, %vm823_vm7 }
 0x136   : > { %988 = vmatprep.subr.bf16.mxu1 %v1117_v31 }
 0x137   : > { %v526_v32 = vpop.permute.xlu1 %525  ;;  %v524_v33 = vpop.permute.xlu0 %523 }
 0x138   : > { %708 = vmatmul.mubr.bf16.vlgmr.msra.gmra.mrb[0].mxu1 %v1252_v51  ;;  %v528_v34 = vsel %vm527_vm13, %v524_v33, %v526_v32  ;;  %vm812_vm13 = vmand %vm810_vm10, %vm811_vm11  ;;  %vm826_vm10 = vcmp.ge.s32.totalorder %v796_v47, 98  ;;  %vm827_vm11 = vcmp.lt.s32.totalorder %v796_v47, 106 }
 0x139   : > { %978 = vmatprep.subr.bf16.mxu0 %v528_v34  ;;  %990 = vmatprep.mubr.msk.bf16.mxu1 %vm1118_vm15, %v1117_v31  ;;  %vm815_vm15 = vcmp.lt.s32.totalorder %v796_v47, 64 }
 0x13b   : > { %v462_v35 = vpop.permute.xlu1 %461  ;;  %v460_v36 = vpop.permute.xlu0 %459 }
 0x13c   : > { %v464_v37 = vsel %vm463_vm14, %v460_v36, %v462_v35  ;;  %vm814_vm14 = vcmp.ge.s32.totalorder %v796_v47, 56 }
 0x13d   : > { %979 = vmatpush3.bf16.msra.mxu0 %v464_v37 }
 0x13f   : > { %v534_v39 = vpop.permute.xlu1 %533  ;;  %v532_v40 = vpop.permute.xlu0 %531 }
 0x140   : > { %v536_v42 = vsel %vm535_vm0, %v532_v40, %v534_v39  ;;  %748 = vmatmul.mubr.bf16.vlgmr.msra.gmra.mrb[4].mxu0 %v1267_v60  ;;  %vm813_vm0 = vmor %vm809_vm12, %vm812_vm13 }
 0x141   : > { %989 = vmatpush3.bf16.msra.mxu1 %v536_v42  ;;  %vm828_vm13 = vmand %vm826_vm10, %vm827_vm11 }
 0x144   : > { %991 = vmatmul.mubr.msk.bf16.vlgmr.msra.gmra.mrb[4].mxu1 %vm631_vm1, %v623_v41  ;;  %vm816_vm1 = vmand %vm814_vm14, %vm815_vm15  ;;  %vm833_vm15 = vcmask 1043456  }
 0x145   : > { %vm817_vm4 = vmor %vm813_vm0, %vm816_vm1 }
 0x146   : > { %vm821_vm8 = vmor %vm817_vm4, %vm820_vm5 }
 0x147   : > { %vm825_vm12 = vmor %vm821_vm8, %vm824_vm9 }
 0x148   : > { %vm829_vm14 = vmor %vm825_vm12, %vm828_vm13 }
 0x149   : > { %v916_v61 = vsel %vm829_vm14, 1.0, %v1117_v31 }
 0x195   : > { %v936_v51 = vpop.f32.mrb[0].mxu0 }
 0x196   : > { %v937_v43 = vpop.f32.mrb[1].mxu0 }
 0x197   : > { %v938_v44 = vadd.f32 %v937_v43, %v936_v51  ;;  %v939_v45 = vpop.f32.mrb[2].mxu0 }
 0x198   : > { %v940_v46 = vpop.f32.mrb[3].mxu0 }
 0x20b   : > { %v958_v4 = vpop.f32.mrb[0].mxu1 }
 0x20c   : > { %v959_v7 = vpop.f32.mrb[1].mxu1 }
 0x20d   : > { %v960_v58 = vadd.f32 %v959_v7, %v958_v4  ;;  %v961_v60 = vpop.f32.mrb[2].mxu1 }
 0x20e   : > { %v962_v48 = vpop.f32.mrb[3].mxu1 }
 0x20f   : > { %v710_v49 = vadd.f32 %v960_v58, %v938_v44 }
 0x213   : > { %v980_v50 = vpop.f32.mrb[4].mxu0 }
 0x214   : > { %v981_v52 = vpop.f32.mrb[5].mxu0 }
 0x215   : > { %v982_v53 = vadd.f32 %v981_v52, %v980_v50  ;;  %v983_v54 = vpop.f32.mrb[6].mxu0 }
 0x216   : > { %v984_v55 = vpop.f32.mrb[7].mxu0 }
 0x217   : > { %v750_v56 = vadd.f32 %v982_v53, %v710_v49  ;;  %v789_v57 = vpop.f32.mrb[4].mxu1 }
 0x218   : > { %v992_v59 = vpop.f32.mrb[5].mxu1 }
 0x219   : > { %v790_v62 = vadd.f32 %v789_v57, %v750_v56  ;;  %v792_v63 = vpop.f32.mrb[6].mxu1 }
 0x21a   : > { %v993_v2 = vpop.f32.mrb[7].mxu1 }
 0x21b   : > { %v832_v3 = vmul.f32 %v916_v61, %v790_v62 }
 0x21d   : > { %v834_v5 = vsel %vm833_vm15, %v832_v3, 0.0 }
 0x21e   : > { %835 = vadd.xlane.f32.xlu0 %v834_v5 }
 0x2ab   : > { %v836_v6 = vpop.xlane.xlu0 %835 }
 0x2ac   : > { %v837_v8 = vmul.f32 0.015625, %v836_v6 }
 0x2ae   : > { %v838_v10 = vsub.f32 %v790_v62, %v837_v8 }
 0x2b0   : > { %v839_v11 = vmul.f32 %v916_v61, %v838_v10 }
 0x2b2   : > { %v840_v9 = vmul.f32 %v839_v11, %v839_v11 }
 0x2b4   : > { %v841_v12 = vsel %vm833_vm15, %v840_v9, 0.0 }
 0x2b5   : > { %842 = vadd.xlane.f32.xlu1 %v841_v12 }
 0x342   : > { %v843_v13 = vpop.xlane.xlu1 %842 }
 0x343   : > { %v844_v14 = vmul.f32 0.015625, %v843_v13 }
 0x345   : > { %v845_v15 = vadd.f32 1e-05, %v844_v14 }
 0x347   : > { %1058 = vrsqrt.f32 %v845_v15 }
 0x351   : > { %v1059_v16 = vpop.eup %1058 }
 0x352   : > { %v847_v17 = vmul.f32 %v1059_v16, %v838_v10 }
 0x354   : > { %v848_v18 = vmul.f32 0.01, %v847_v17 }
 0x356   : > { %v849_v19 = vmax.f32 %v847_v17, %v848_v18 }
 0x358   : > { %v850_v20 = vpack.c.bf16 %v849_v19, %v849_v19 }
 0x35a   : > { %851 = vst [vmem:[%s141_s18] sm:$0x3] %v850_v20 }
 0x35b PF: > { %s12_s9 = sadd.s32 1, %s1066_s9  }
 0x35c   : > { %p9_p4 = scmp.ge.s32.totalorder %s12_s9, 4  }
 0x35e   :  { %11 = sbr.rel (!%p9_p4) target bundleno = 1 (0x1), region = 58 }

// kernel: unet_up_conv_forward.7
= control target key start
LH: loop header
LB: loop body
LE: loop exit
PB: predicated region body
PF: predicated region fallthrough
CT: control target
= control target key end

     0   :  { %s819_s9 = smov 0   ;;  %s912_s0 = inlined_call_operand.vmem [shape: bf16[2,16,512], index: 0, kind: input, shape index: {}]   ;;  %s913_s1 = inlined_call_operand.vmem [shape: bf16[4,144], index: 1, kind: input, shape index: {}]   ;;  %s914_s2 = inlined_call_operand.vmem [shape: f32[2,4,384], index: 2, kind: output, shape index: {}]  }
   0x1 LB: > { %s738_s10 = sadd.s32 4294967295, %s792_s9   ;;  %p742_p0 = scmp.ge.s32.totalorder %s792_s9, 1  ;;  %s792_s9 = sphi %s819_s9, %s12_s9  }
   0x2   : > { %p112_p1 = scmp.lt.s32.totalorder %s792_s9, 3 }
   0x4   : > { %p113_p2 = pnand %p742_p0, %p112_p1 }
   0x5   : > { %p134_p3 = scmp.lt.s32.totalorder (!%p113_p2), %s738_s10, 1  ;;  %v794_v0 = vmov (!%p113_p2), 0   ;;  %s795_s15 = smov (!%p113_p2), 127   ;;  %vm353_vm0 = vcmask (!%p113_p2), 130048   ;;  %vm179_vm1 = vcmask (!%p113_p2), 1039360   ;;  %vm197_vm2 = vcmask (!%p113_p2), 1031168  }
   0x6   : > { %116 = sbr.rel (%p113_p2) target bundleno = 733 (0x2dd), region = 28  ;;  %398 = vmatprep.subr.bf16.mxu1 (!%p113_p2), %v794_v0  ;;  %s796_s16 = smov (!%p113_p2), 126   ;;  %v838_v5 = vld.sshfl [vmem:[%s913_s1] sm:$0x33 pattern:$0x76325410] (!%p113_p2)  ;;  %v438_v63 = vlaneseq (!%p113_p2) }
   0x7   : > { %s797_s17 = smov (!%p113_p2), 110   ;;  %s798_s18 = smov (!%p113_p2), 109   ;;  %v351_v6 = vcombine.high (!%p113_p2), %v838_v5, %v838_v5  ;;  %vm215_vm3 = vcmask (!%p113_p2), 900096   ;;  %vm233_vm4 = vcmask (!%p113_p2), 891904   ;;  %vm251_vm5 = vcmask (!%p113_p2), 883712  }
   0x8   : > { %s799_s19 = smov (!%p113_p2), 108   ;;  %s800_s20 = smov (!%p113_p2), 92   ;;  %vm269_vm6 = vcmask (!%p113_p2), 752640   ;;  %vm287_vm7 = vcmask (!%p113_p2), 744448   ;;  %vm305_vm8 = vcmask (!%p113_p2), 736256  }
   0x9   : > { %s801_s21 = smov (!%p113_p2), 91   ;;  %751 = vmatprep.mubr.msk.bf16.mxu0 (!%p113_p2), %vm353_vm0, %v351_v6  ;;  %752 = vmatprep.mubr.msk.bf16.mxu1 (!%p113_p2), %vm353_vm0, %v351_v6  ;;  %s802_s24 = smov (!%p113_p2), 90  }
   0xd   : > { %s932_s10 = smov (!%p134_p3, %s738_s10), 1 }
   0xe   : > { %s758_s11 = sshll.u32 %s932_s10, 5  ;;  %s759_s25 = smul.u32 12, %s932_s10 }
   0xf   : > { %s138_s14 = scalar_lea.vmem %s912_s0, %s758_s11 }
  0x10   : > { %v778_v1 = vld [vmem:[%s138_s14 + $0x4] ss:$16 sps:$4 sm:$0xff]   ;;  %v780_v2 = vld [vmem:[%s138_s14] ss:$16 sps:$4 sm:$0xff]   ;;  %v781_v3 = vld [vmem:[%s138_s14 + $0x8] ss:$16 sps:$4 sm:$0xff]   ;;  %s143_s28 = scalar_lea.vmem %s914_s2, %s759_s25 }
  0x11   : > { %173 = vrot.lane.b32.xlu0 %v778_v1, %s795_s15  ;;  %357 = vmatprep.subr.bf16.mxu0 %v778_v1  ;;  %v783_v4 = vld [vmem:[%s138_s14 + $0xc] ss:$16 sps:$4 sm:$0xff]  }
  0x12   : > { %171 = vrot.lane.b32.xlu1 %v780_v2, %s795_s15  ;;  %358 = vmatpush1.bf16.msra.mxu0 %v780_v2 }
  0x13   : > { %399 = vmatpush1.bf16.msra.mxu1 %v781_v3 }
  0x14   : > { %400 = vmatprep.subr.bf16.mxu1 %v794_v0 }
  0x15   : > { %175 = vrot.lane.b32.xlu0 %v781_v3, %s795_s15 }
  0x16   : > { %177 = vrot.lane.b32.xlu1 %v783_v4, %s795_s15 }
  0x19   : > { %191 = vrot.lane.b32.xlu0 %v778_v1, %s796_s16 }
  0x1a   : > { %193 = vrot.lane.b32.xlu1 %v781_v3, %s796_s16 }
  0x1d   : > { %189 = vrot.lane.b32.xlu0 %v780_v2, %s796_s16 }
  0x1e   : > { %195 = vrot.lane.b32.xlu1 %v783_v4, %s796_s16 }
  0x21   : > { %209 = vrot.lane.b32.xlu0 %v778_v1, %s797_s17 }
  0x22   : > { %211 = vrot.lane.b32.xlu1 %v781_v3, %s797_s17 }
  0x25   : > { %207 = vrot.lane.b32.xlu0 %v780_v2, %s797_s17 }
  0x26   : > { %213 = vrot.lane.b32.xlu1 %v783_v4, %s797_s17 }
  0x29   : > { %227 = vrot.lane.b32.xlu0 %v778_v1, %s798_s18 }
  0x2a   : > { %229 = vrot.lane.b32.xlu1 %v781_v3, %s798_s18 }
  0x2d   : > { %225 = vrot.lane.b32.xlu0 %v780_v2, %s798_s18 }
  0x2e   : > { %231 = vrot.lane.b32.xlu1 %v783_v4, %s798_s18 }
  0x31   : > { %245 = vrot.lane.b32.xlu0 %v778_v1, %s799_s19 }
  0x32   : > { %247 = vrot.lane.b32.xlu1 %v781_v3, %s799_s19 }
  0x35   : > { %243 = vrot.lane.b32.xlu0 %v780_v2, %s799_s19 }
  0x36   : > { %249 = vrot.lane.b32.xlu1 %v783_v4, %s799_s19 }
  0x39   : > { %263 = vrot.lane.b32.xlu0 %v778_v1, %s800_s20 }
  0x3a   : > { %265 = vrot.lane.b32.xlu1 %v781_v3, %s800_s20 }
  0x3d   : > { %261 = vrot.lane.b32.xlu0 %v780_v2, %s800_s20 }
  0x3e   : > { %267 = vrot.lane.b32.xlu1 %v783_v4, %s800_s20 }
  0x41   : > { %281 = vrot.lane.b32.xlu0 %v778_v1, %s801_s21 }
  0x42   : > { %283 = vrot.lane.b32.xlu1 %v781_v3, %s801_s21 }
  0x45   : > { %279 = vrot.lane.b32.xlu0 %v780_v2, %s801_s21 }
  0x46   : > { %285 = vrot.lane.b32.xlu1 %v783_v4, %s801_s21 }
  0x49   : > { %299 = vrot.lane.b32.xlu0 %v778_v1, %s802_s24  ;;  %v439_v1 = vand.u32 127, %v438_v63 }
  0x4a   : > { %301 = vrot.lane.b32.xlu1 %v781_v3, %s802_s24 }
  0x4b   : > { %vm457_vm9 = vcmp.ge.s32.totalorder %v439_v1, 18  ;;  %vm460_vm10 = vcmp.lt.s32.totalorder %v439_v1, 34  ;;  %vm448_vm13 = vcmp.lt.s32.totalorder %v439_v1, 16  ;;  %vm469_vm15 = vcmp.ge.s32.totalorder %v439_v1, 36 }
  0x4c   : > { %vm463_vm14 = vmand %vm457_vm9, %vm460_vm10  ;;  %vm472_vm0 = vcmp.lt.s32.totalorder %v439_v1, 52 }
  0x4d   : > { %297 = vrot.lane.b32.xlu0 %v780_v2, %s802_s24  ;;  %v440_v2 = vadd.s32 128, %v439_v1 }
  0x4e   : > { %303 = vrot.lane.b32.xlu1 %v783_v4, %s802_s24 }
  0x4f   : > { %vm542_vm11 = vcmp.ge.s32.totalorder %v440_v2, 144  ;;  %vm545_vm12 = vcmp.lt.s32.totalorder %v440_v2, 160 }
  0x83   : > { %v174_v7 = vpop.permute.xlu0 %173 }
  0x84   : > { %v172_v8 = vpop.permute.xlu1 %171 }
  0x85   : > { %v180_v13 = vsel %vm179_vm1, %v172_v8, %v174_v7 }
  0x87   : > { %v176_v9 = vpop.permute.xlu0 %175 }
  0x88   : > { %v178_v10 = vpop.permute.xlu1 %177  ;;  %v181_v11 = vsel %vm179_vm1, %v174_v7, %v176_v9 }
  0x89   : > { %359 = vmatprep.subr.bf16.mxu0 %v181_v11  ;;  %v182_v12 = vsel %vm179_vm1, %v176_v9, %v178_v10  ;;  %vm533_vm1 = vcmp.lt.s32.totalorder %v440_v2, 142  ;;  %v441_v9 = vadd.s32 256, %v439_v1  ;;  %v803_v11 = vmov 0.0  }
  0x8a   : > { %401 = vmatpush1.bf16.msra.mxu1 %v182_v12  ;;  %360 = vmatpush1.bf16.msra.mxu0 %v180_v13 }
  0x8b   : > { %v192_v14 = vpop.permute.xlu0 %191  ;;  %402 = vmatprep.subr.bf16.mxu1 %v794_v0 }
  0x8c   : > { %v194_v15 = vpop.permute.xlu1 %193 }
  0x8d   : > { %v199_v16 = vsel %vm197_vm2, %v192_v14, %v194_v15 }
  0x8e   : > { %361 = vmatprep.subr.bf16.mxu0 %v199_v16 }
  0x8f   : > { %v190_v17 = vpop.permute.xlu0 %189 }
  0x90   : > { %v196_v18 = vpop.permute.xlu1 %195  ;;  %v198_v19 = vsel %vm197_vm2, %v190_v17, %v192_v14 }
  0x91   : > { %362 = vmatpush1.bf16.msra.mxu0 %v198_v19  ;;  %v200_v20 = vsel %vm197_vm2, %v194_v15, %v196_v18  ;;  %vm548_vm2 = vmand %vm542_vm11, %vm545_vm12  ;;  %vm566_vm12 = vcmp.ge.s32.totalorder %v440_v2, 180 }
  0x92   : > { %403 = vmatpush1.bf16.msra.mxu1 %v200_v20  ;;  %vm855_vm9 = vmor %vm533_vm1, %vm548_vm2 }
  0x93   : > { %v210_v21 = vpop.permute.xlu0 %209  ;;  %404 = vmatprep.subr.bf16.mxu1 %v794_v0 }
  0x94   : > { %v212_v22 = vpop.permute.xlu1 %211 }
  0x95   : > { %v217_v23 = vsel %vm215_vm3, %v210_v21, %v212_v22 }
  0x96   : > { %363 = vmatprep.subr.bf16.mxu0 %v217_v23 }
  0x97   : > { %v208_v24 = vpop.permute.xlu0 %207 }
  0x98   : > { %v214_v25 = vpop.permute.xlu1 %213  ;;  %v216_v26 = vsel %vm215_vm3, %v208_v24, %v210_v21 }
  0x99   : > { %364 = vmatpush1.bf16.msra.mxu0 %v216_v26  ;;  %v218_v27 = vsel %vm215_vm3, %v212_v22, %v214_v25  ;;  %vm851_vm3 = vmor %vm448_vm13, %vm463_vm14  ;;  %vm569_vm13 = vcmp.lt.s32.totalorder %v440_v2, 196 }
  0x9a   : > { %405 = vmatpush1.bf16.msra.mxu1 %v218_v27  ;;  %vm572_vm2 = vmand %vm566_vm12, %vm569_vm13  ;;  %vm590_vm12 = vcmp.ge.s32.totalorder %v440_v2, 216  ;;  %vm593_vm13 = vcmp.lt.s32.totalorder %v440_v2, 232 }
  0x9b   : > { %v228_v28 = vpop.permute.xlu0 %227  ;;  %406 = vmatprep.subr.bf16.mxu1 %v794_v0 }
  0x9c   : > { %v230_v29 = vpop.permute.xlu1 %229 }
  0x9d   : > { %v235_v30 = vsel %vm233_vm4, %v228_v28, %v230_v29 }
  0x9e   : > { %365 = vmatprep.subr.bf16.mxu0 %v235_v30 }
  0x9f   : > { %v226_v31 = vpop.permute.xlu0 %225 }
  0xa0   : > { %v232_v32 = vpop.permute.xlu1 %231  ;;  %v234_v33 = vsel %vm233_vm4, %v226_v31, %v228_v28 }
  0xa1   : > { %366 = vmatpush1.bf16.msra.mxu0 %v234_v33  ;;  %v236_v34 = vsel %vm233_vm4, %v230_v29, %v232_v32  ;;  %vm554_vm4 = vcmp.ge.s32.totalorder %v440_v2, 162 }
  0xa2   : > { %407 = vmatpush1.bf16.msra.mxu1 %v236_v34 }
  0xa3   : > { %v246_v35 = vpop.permute.xlu0 %245  ;;  %408 = vmatprep.subr.bf16.mxu1 %v794_v0 }
  0xa4   : > { %v248_v36 = vpop.permute.xlu1 %247 }
  0xa5   : > { %v253_v37 = vsel %vm251_vm5, %v246_v35, %v248_v36 }
  0xa6   : > { %367 = vmatprep.subr.bf16.mxu0 %v253_v37 }
  0xa7   : > { %v244_v38 = vpop.permute.xlu0 %243 }
  0xa8   : > { %v250_v39 = vpop.permute.xlu1 %249  ;;  %v252_v40 = vsel %vm251_vm5, %v244_v38, %v246_v35 }
  0xa9   : > { %368 = vmatpush1.bf16.msra.mxu0 %v252_v40  ;;  %v254_v41 = vsel %vm251_vm5, %v248_v36, %v250_v39  ;;  %vm557_vm5 = vcmp.lt.s32.totalorder %v440_v2, 178 }
  0xaa   : > { %409 = vmatpush1.bf16.msra.mxu1 %v254_v41  ;;  %vm859_vm10 = vmand %vm554_vm4, %vm557_vm5  ;;  %vm578_vm5 = vcmp.ge.s32.totalorder %v440_v2, 198 }
  0xab   : > { %v264_v42 = vpop.permute.xlu0 %263  ;;  %410 = vmatprep.subr.bf16.mxu1 %v794_v0  ;;  %vm563_vm1 = vmor %vm855_vm9, %vm859_vm10 }
  0xac   : > { %v266_v43 = vpop.permute.xlu1 %265  ;;  %vm877_vm9 = vmor %vm563_vm1, %vm572_vm2 }
  0xad   : > { %v271_v44 = vsel %vm269_vm6, %v264_v42, %v266_v43  ;;  %vm596_vm2 = vmand %vm590_vm12, %vm593_vm13  ;;  %vm529_vm13 = vcmp.ge.s32.totalorder %v439_v1, 126 }
  0xae   : > { %369 = vmatprep.subr.bf16.mxu0 %v271_v44 }
  0xaf   : > { %v262_v45 = vpop.permute.xlu0 %261 }
  0xb0   : > { %v268_v46 = vpop.permute.xlu1 %267  ;;  %v270_v47 = vsel %vm269_vm6, %v262_v45, %v264_v42 }
  0xb1   : > { %370 = vmatpush1.bf16.msra.mxu0 %v270_v47  ;;  %v272_v48 = vsel %vm269_vm6, %v266_v43, %v268_v46  ;;  %vm475_vm6 = vmand %vm469_vm15, %vm472_vm0  ;;  %vm493_vm0 = vcmp.ge.s32.totalorder %v439_v1, 72  ;;  %vm496_vm15 = vcmp.lt.s32.totalorder %v439_v1, 88 }
  0xb2   : > { %411 = vmatpush1.bf16.msra.mxu1 %v272_v48  ;;  %vm478_vm11 = vmor %vm851_vm3, %vm475_vm6  ;;  %vm581_vm3 = vcmp.lt.s32.totalorder %v440_v2, 214 }
  0xb3   : > { %v282_v49 = vpop.permute.xlu0 %281  ;;  %412 = vmatprep.subr.bf16.mxu1 %v794_v0  ;;  %vm873_vm6 = vmand %vm493_vm0, %vm496_vm15  ;;  %vm517_vm0 = vcmp.ge.s32.totalorder %v439_v1, 108  ;;  %vm520_vm15 = vcmp.lt.s32.totalorder %v439_v1, 124 }
  0xb4   : > { %v284_v50 = vpop.permute.xlu1 %283  ;;  %vm881_vm10 = vmand %vm578_vm5, %vm581_vm3  ;;  %vm602_vm3 = vcmp.ge.s32.totalorder %v440_v2, 234 }
  0xb5   : > { %v289_v51 = vsel %vm287_vm7, %v282_v49, %v284_v50  ;;  %vm587_vm1 = vmor %vm877_vm9, %vm881_vm10 }
  0xb6   : > { %371 = vmatprep.subr.bf16.mxu0 %v289_v51  ;;  %vm599_vm9 = vmor %vm587_vm1, %vm596_vm2 }
  0xb7   : > { %v280_v52 = vpop.permute.xlu0 %279 }
  0xb8   : > { %v286_v53 = vpop.permute.xlu1 %285  ;;  %v288_v54 = vsel %vm287_vm7, %v280_v52, %v282_v49 }
  0xb9   : > { %372 = vmatpush1.bf16.msra.mxu0 %v288_v54  ;;  %v290_v55 = vsel %vm287_vm7, %v284_v50, %v286_v53  ;;  %vm481_vm7 = vcmp.ge.s32.totalorder %v439_v1, 54 }
  0xba   : > { %413 = vmatpush1.bf16.msra.mxu1 %v290_v55 }
  0xbb   : > { %v300_v56 = vpop.permute.xlu0 %299  ;;  %414 = vmatprep.subr.bf16.mxu1 %v794_v0 }
  0xbc   : > { %v302_v57 = vpop.permute.xlu1 %301 }
  0xbd   : > { %v307_v58 = vsel %vm305_vm8, %v300_v56, %v302_v57 }
  0xbe   : > { %373 = vmatprep.subr.bf16.mxu0 %v307_v58 }
  0xbf   : > { %v298_v59 = vpop.permute.xlu0 %297 }
  0xc0   : > { %v304_v60 = vpop.permute.xlu1 %303  ;;  %v306_v61 = vsel %vm305_vm8, %v298_v59, %v300_v56 }
  0xc1   : > { %374 = vmatpush1.bf16.msra.mxu0 %v306_v61  ;;  %v308_v62 = vsel %vm305_vm8, %v302_v57, %v304_v60  ;;  %vm484_vm8 = vcmp.lt.s32.totalorder %v439_v1, 70 }
  0xc2   : > { %415 = vmatpush1.bf16.msra.mxu1 %v308_v62  ;;  %vm487_vm14 = vmand %vm481_vm7, %vm484_vm8  ;;  %vm505_vm7 = vcmp.ge.s32.totalorder %v439_v1, 90  ;;  %vm508_vm8 = vcmp.lt.s32.totalorder %v439_v1, 106 }
  0xc3   : > { %vm869_vm4 = vmor %vm478_vm11, %vm487_vm14 }
  0xc4   : > { %390 = vmatmul.mubr.bf16.vlgmr.msra.gmra.mrb[0].mxu0 %v838_v5  ;;  %vm502_vm11 = vmor %vm869_vm4, %vm873_vm6  ;;  %vm605_vm4 = vcmp.lt.s32.totalorder %v440_v2, 250 }
  0xc5   : > { %431 = vmatmul.mubr.bf16.vlgmr.msra.gmra.mrb[0].mxu1 %v838_v5  ;;  %vm511_vm14 = vmand %vm505_vm7, %vm508_vm8  ;;  %vm627_vm7 = vcmp.ge.s32.totalorder %v441_v9, 270  ;;  %vm630_vm8 = vcmp.lt.s32.totalorder %v441_v9, 286 }
  0xc6   : > { %vm893_vm5 = vmor %vm502_vm11, %vm511_vm14  ;;  %vm618_vm11 = vcmp.lt.s32.totalorder %v441_v9, 268 }
  0xc7   : > { %vm523_vm6 = vmand %vm517_vm0, %vm520_vm15  ;;  %vm614_vm15 = vcmp.ge.s32.totalorder %v440_v2, 252 }
  0xc8   : > { %vm608_vm10 = vmand %vm602_vm3, %vm605_vm4  ;;  %vm646_vm4 = vcmask 1043456  }
  0xc9   : > { %vm526_vm12 = vmor %vm893_vm5, %vm523_vm6 }
  0xca   : > { %vm633_vm14 = vmand %vm627_vm7, %vm630_vm8 }
  0xcb   : > { %vm611_vm0 = vmor %vm599_vm9, %vm608_vm10 }
  0xcc   : > { %vm538_vm1 = vmor %vm526_vm12, %vm529_vm13 }
  0xcd   : > { %vm636_vm2 = vmor %vm618_vm11, %vm633_vm14  ;;  %v753_v12 = vsel %vm538_vm1, 1.0, %v803_v11 }
  0xce   : > { %vm623_vm3 = vmor %vm611_vm0, %vm614_vm15  ;;  %v755_v13 = vsel %vm636_vm2, 1.0, %v803_v11 }
  0xcf   : > { %v754_v14 = vsel %vm623_vm3, 1.0, %v803_v11 }
 0x197   : > { %v391_v15 = vpop.f32.mrb[0].mxu0 }
 0x198   : > { %v643_v16 = vmul.f32 %v753_v12, %v391_v15  ;;  %v432_v17 = vpop.f32.mrb[0].mxu1  ;;  %v393_v18 = vpop.f32.mrb[1].mxu0 }
 0x199   : > { %v645_v19 = vmul.f32 %v755_v13, %v432_v17  ;;  %v644_v20 = vmul.f32 %v754_v14, %v393_v18  ;;  %v434_v21 = vpop.f32.mrb[1].mxu1  ;;  %v395_v22 = vpop.f32.mrb[2].mxu0 }
 0x19a   : > { %v647_v23 = vsel %vm646_vm4, %v643_v16, 0.0  ;;  %v435_v24 = vpop.f32.mrb[2].mxu1  ;;  %v396_v25 = vpop.f32.mrb[3].mxu0 }
 0x19b   : > { %v648_v26 = vsel %vm646_vm4, %v644_v20, 0.0  ;;  %v436_v27 = vpop.f32.mrb[3].mxu1  ;;  %v650_v28 = vsel %vm646_vm4, %v645_v19, 0.0 }
 0x19c   : > { %v649_v29 = vadd.f32 %v648_v26, %v647_v23 }
 0x19e   : > { %v651_v30 = vadd.f32 %v650_v28, %v649_v29 }
 0x1a0   : > { %652 = vadd.xlane.f32.xlu0 %v651_v30 }
 0x22d   : > { %v653_v31 = vpop.xlane.xlu0 %652 }
 0x22e   : > { %v654_v32 = vmul.f32 0.00390625, %v653_v31 }
 0x230   : > { %v655_v33 = vsub.f32 %v391_v15, %v654_v32  ;;  %v656_v34 = vsub.f32 %v393_v18, %v654_v32  ;;  %v657_v35 = vsub.f32 %v432_v17, %v654_v32 }
 0x232   : > { %v658_v36 = vmul.f32 %v753_v12, %v655_v33  ;;  %v659_v37 = vmul.f32 %v754_v14, %v656_v34  ;;  %v660_v38 = vmul.f32 %v755_v13, %v657_v35 }
 0x234   : > { %v661_v39 = vmul.f32 %v658_v36, %v658_v36  ;;  %v662_v40 = vmul.f32 %v659_v37, %v659_v37  ;;  %v663_v41 = vmul.f32 %v660_v38, %v660_v38 }
 0x236   : > { %v664_v42 = vsel %vm646_vm4, %v661_v39, 0.0  ;;  %v665_v43 = vsel %vm646_vm4, %v662_v40, 0.0  ;;  %v667_v45 = vsel %vm646_vm4, %v663_v41, 0.0 }
 0x237   : > { %v666_v44 = vadd.f32 %v665_v43, %v664_v42 }
 0x239   : > { %v668_v46 = vadd.f32 %v667_v45, %v666_v44 }
 0x23b   : > { %669 = vadd.xlane.f32.xlu1 %v668_v46 }
 0x2c8   : > { %v670_v47 = vpop.xlane.xlu1 %669 }
 0x2c9   : > { %v671_v48 = vmul.f32 0.00390625, %v670_v47 }
 0x2cb   : > { %v672_v49 = vadd.f32 1e-05, %v671_v48 }
 0x2cd   : > { %784 = vrsqrt.f32 %v672_v49 }
 0x2d7   : > { %v785_v50 = vpop.eup %784 }
 0x2d8   : > { %v674_v51 = vmul.f32 %v785_v50, %v655_v33  ;;  %v675_v52 = vmul.f32 %v785_v50, %v656_v34  ;;  %v676_v53 = vmul.f32 %v785_v50, %v657_v35 }
 0x2da   : > { %v679_v54 = vcombine.low %v674_v51, %v675_v52  ;;  %682 = vst [vmem:[%s143_s28 + $0x8] sm:$0xf] %v676_v53 }
 0x2dc   : > { %681 = vst [vmem:[%s143_s28] sm:$0xff] %v679_v54 }
 0x2dd PF: > { %s12_s9 = sadd.s32 1, %s792_s9  }
 0x2de   : > { %p9_p4 = scmp.ge.s32.totalorder %s12_s9, 4  }
 0x2e0   :  { %11 = sbr.rel (!%p9_p4) target bundleno = 1 (0x1), region = 58 }

// kernel: unet_up_conv_forward.6
= control target key start
LH: loop header
LB: loop body
LE: loop exit
PB: predicated region body
PF: predicated region fallthrough
CT: control target
= control target key end

     0   :  { %s2099_s9 = smov 0   ;;  %s2971_s0 = inlined_call_operand.vmem [shape: bf16[2,16,640], index: 0, kind: input, shape index: {}]   ;;  %s2972_s1 = inlined_call_operand.vmem [shape: bf16[4,784], index: 1, kind: input, shape index: {}]   ;;  %s2973_s2 = inlined_call_operand.vmem [shape: bf16[2,4,384], index: 2, kind: output, shape index: {}]  }
   0x1 LB: > { %s1851_s10 = sadd.s32 4294967295, %s2033_s9   ;;  %p1855_p0 = scmp.ge.s32.totalorder %s2033_s9, 1  ;;  %s2033_s9 = sphi %s2099_s9, %s12_s9  }
   0x2   : > { %p112_p1 = scmp.lt.s32.totalorder %s2033_s9, 3 }
   0x4   : > { %p113_p2 = pnand %p1855_p0, %p112_p1 }
   0x5   : > { %p134_p3 = scmp.lt.s32.totalorder (!%p113_p2), %s1851_s10, 1  ;;  %s2035_s15 = smov (!%p113_p2), 127   ;;  %vm181_vm0 = vcmask (!%p113_p2), 1039360   ;;  %vm199_vm1 = vcmask (!%p113_p2), 1031168   ;;  %vm217_vm2 = vcmask (!%p113_p2), 1022976   ;;  %vm235_vm3 = vcmask (!%p113_p2), 1014784  }
   0x6   : > { %116 = sbr.rel (%p113_p2) target bundleno = 1047 (0x417), region = 28  ;;  %s2036_s16 = smov (!%p113_p2), 126   ;;  %vm2984_vm4 = vcmask (!%p113_p2), 670720   ;;  %vm253_vm5 = vcmask (!%p113_p2), 1006592   ;;  %v2060_v29 = vmov (!%p113_p2), 1983009808   ;;  %v1164_v31 = vlaneseq (!%p113_p2) }
   0x7   : > { %s2037_s17 = smov (!%p113_p2), 125   ;;  %s2038_s18 = smov (!%p113_p2), 124   ;;  %v1162_v30 = vunpack.c.l.s4 (!%p113_p2), %v2060_v29  ;;  %vm2983_vm6 = vcmask (!%p113_p2), 662528   ;;  %v2320_v40 = vld [vmem:[%s2972_s1] sm:$0xff] (!%p113_p2)  ;;  %vm271_vm7 = vcmask (!%p113_p2), 998400   ;;  %vm2982_vm8 = vcmask (!%p113_p2), 654336  }
   0x8   : > { %s2039_s19 = smov (!%p113_p2), 82   ;;  %s2040_s20 = smov (!%p113_p2), 123   ;;  %v1165_v36 = vshrl.u32 (!%p113_p2), %v1164_v31, 7  ;;  %vm2988_vm9 = vcmask (!%p113_p2), 867328   ;;  %vm2980_vm10 = vcmask (!%p113_p2), 646144   ;;  %vm307_vm11 = vcmask (!%p113_p2), 859136  }
   0x9   : > { %s2041_s21 = smov (!%p113_p2), 81   ;;  %s2042_s22 = smov (!%p113_p2), 122   ;;  %v1163_v35 = vunpack.c.0.s8 (!%p113_p2), %v1162_v30  ;;  %vm2978_vm12 = vcmask (!%p113_p2), 637952   ;;  %vm325_vm13 = vcmask (!%p113_p2), 850944   ;;  %vm2977_vm14 = vcmask (!%p113_p2), 506880  }
   0xa   : > { %s2043_s23 = smov (!%p113_p2), 80   ;;  %s2044_s24 = smov (!%p113_p2), 106   ;;  %vm343_vm15 = vcmask (!%p113_p2), 842752  }
   0xb   : > { %s2045_s25 = smov (!%p113_p2), 79   ;;  %s2046_s26 = smov (!%p113_p2), 105   ;;  %v2315_v38 = vsub.s32 (!%p113_p2), %v1163_v35, %v1165_v36 }
   0xc   : > { %s2047_s27 = smov (!%p113_p2), 78   ;;  %s2048_s28 = smov (!%p113_p2), 104  }
   0xd   : > { %s3032_s10 = smov (!%p134_p3, %s1851_s10), 1  ;;  %s2976_s29 = smov 62   ;;  %v2326_v42 = vrot.slane %v2320_v40, %v2315_v38 }
   0xe   : > { %s1955_s11 = smul.u32 40, %s3032_s10  ;;  %s2050_s30 = smov 103  }
   0xf   : > { %s2975_s3 = smov 61   ;;  %s2052_s4 = smov 102   ;;  %v2336_v44 = vcombine.high %v2326_v42, %v2326_v42 }
  0x10   : > { %s2113_s14 = scalar_lea.vmem %s2971_s0, %s1955_s11  ;;  %s2974_s5 = smov 60  }
  0x11   : > { %v2116_v0 = vld [vmem:[%s2113_s14 + $0x4] ss:$20 sps:$4 sm:$0xff]   ;;  %v2119_v1 = vld [vmem:[%s2113_s14] ss:$20 sps:$4 sm:$0xff]   ;;  %v2124_v2 = vld [vmem:[%s2113_s14 + $0x8] ss:$20 sps:$4 sm:$0xff]   ;;  %1235 = vmatprep.mubr.bf16.mxu1 %v2336_v44 }
  0x12   : > { %175 = vrot.lane.b32.xlu0 %v2116_v0, %s2035_s15  ;;  %1203 = vmatprep.subr.bf16.mxu1 %v2116_v0  ;;  %s2054_s6 = smov 101   ;;  %s2055_s7 = smov 59   ;;  %v2345_v48 = vld [vmem:[%s2113_s14 + $0xc] ss:$20 sps:$4 sm:$0xff]  }
  0x13   : > { %173 = vrot.lane.b32.xlu1 %v2119_v1, %s2035_s15  ;;  %1204 = vmatpush1.bf16.msra.mxu1 %v2119_v1  ;;  %s2056_s8 = smov 100   ;;  %s2057_s11 = smov 58  }
  0x14   : > { %s2058_s12 = smov 84   ;;  %s2059_s13 = smov 57  }
  0x16   : > { %177 = vrot.lane.b32.xlu0 %v2124_v2, %s2035_s15 }
  0x17   : > { %193 = vrot.lane.b32.xlu1 %v2116_v0, %s2036_s16 }
  0x1a   : > { %195 = vrot.lane.b32.xlu0 %v2124_v2, %s2036_s16 }
  0x1b   : > { %191 = vrot.lane.b32.xlu1 %v2119_v1, %s2036_s16 }
  0x1e   : > { %211 = vrot.lane.b32.xlu0 %v2116_v0, %s2037_s17 }
  0x1f   : > { %213 = vrot.lane.b32.xlu1 %v2124_v2, %s2037_s17 }
  0x22   : > { %209 = vrot.lane.b32.xlu0 %v2119_v1, %s2037_s17 }
  0x23   : > { %229 = vrot.lane.b32.xlu1 %v2116_v0, %s2038_s18 }
  0x26   : > { %231 = vrot.lane.b32.xlu0 %v2124_v2, %s2038_s18 }
  0x27   : > { %227 = vrot.lane.b32.xlu1 %v2119_v1, %s2038_s18 }
  0x2a   : > { %445 = vrot.lane.b32.xlu0 %v2116_v0, %s2039_s19 }
  0x2b   : > { %447 = vrot.lane.b32.xlu1 %v2124_v2, %s2039_s19 }
  0x2e   : > { %443 = vrot.lane.b32.xlu0 %v2119_v1, %s2039_s19 }
  0x2f   : > { %247 = vrot.lane.b32.xlu1 %v2116_v0, %s2040_s20 }
  0x32   : > { %249 = vrot.lane.b32.xlu0 %v2124_v2, %s2040_s20 }
  0x33   : > { %245 = vrot.lane.b32.xlu1 %v2119_v1, %s2040_s20 }
  0x36   : > { %463 = vrot.lane.b32.xlu0 %v2116_v0, %s2041_s21 }
  0x37   : > { %465 = vrot.lane.b32.xlu1 %v2124_v2, %s2041_s21 }
  0x3a   : > { %461 = vrot.lane.b32.xlu0 %v2119_v1, %s2041_s21 }
  0x3b   : > { %265 = vrot.lane.b32.xlu1 %v2116_v0, %s2042_s22 }
  0x3e   : > { %267 = vrot.lane.b32.xlu0 %v2124_v2, %s2042_s22 }
  0x3f   : > { %263 = vrot.lane.b32.xlu1 %v2119_v1, %s2042_s22 }
  0x42   : > { %481 = vrot.lane.b32.xlu0 %v2116_v0, %s2043_s23 }
  0x43   : > { %483 = vrot.lane.b32.xlu1 %v2124_v2, %s2043_s23 }
  0x46   : > { %479 = vrot.lane.b32.xlu0 %v2119_v1, %s2043_s23 }
  0x47   : > { %283 = vrot.lane.b32.xlu1 %v2116_v0, %s2044_s24 }
  0x4a   : > { %285 = vrot.lane.b32.xlu0 %v2124_v2, %s2044_s24 }
  0x4b   : > { %281 = vrot.lane.b32.xlu1 %v2119_v1, %s2044_s24 }
  0x4e   : > { %499 = vrot.lane.b32.xlu0 %v2116_v0, %s2045_s25 }
  0x4f   : > { %501 = vrot.lane.b32.xlu1 %v2124_v2, %s2045_s25 }
  0x52   : > { %497 = vrot.lane.b32.xlu0 %v2119_v1, %s2045_s25 }
  0x53   : > { %301 = vrot.lane.b32.xlu1 %v2116_v0, %s2046_s26 }
  0x56   : > { %303 = vrot.lane.b32.xlu0 %v2124_v2, %s2046_s26 }
  0x57   : > { %299 = vrot.lane.b32.xlu1 %v2119_v1, %s2046_s26 }
  0x5a   : > { %517 = vrot.lane.b32.xlu0 %v2116_v0, %s2047_s27 }
  0x5b   : > { %519 = vrot.lane.b32.xlu1 %v2124_v2, %s2047_s27 }
  0x5e   : > { %515 = vrot.lane.b32.xlu0 %v2119_v1, %s2047_s27 }
  0x5f   : > { %319 = vrot.lane.b32.xlu1 %v2116_v0, %s2048_s28 }
  0x62   : > { %321 = vrot.lane.b32.xlu0 %v2124_v2, %s2048_s28 }
  0x63   : > { %317 = vrot.lane.b32.xlu1 %v2119_v1, %s2048_s28 }
  0x66   : > { %535 = vrot.lane.b32.xlu0 %v2116_v0, %s2976_s29 }
  0x67   : > { %537 = vrot.lane.b32.xlu1 %v2124_v2, %s2976_s29 }
  0x6a   : > { %533 = vrot.lane.b32.xlu0 %v2119_v1, %s2976_s29  ;;  %s2062_s29 = smov 56  }
  0x6b   : > { %337 = vrot.lane.b32.xlu1 %v2116_v0, %s2050_s30 }
  0x6e   : > { %339 = vrot.lane.b32.xlu0 %v2124_v2, %s2050_s30 }
  0x6f   : > { %335 = vrot.lane.b32.xlu1 %v2119_v1, %s2050_s30 }
  0x72   : > { %553 = vrot.lane.b32.xlu0 %v2116_v0, %s2975_s3 }
  0x73   : > { %555 = vrot.lane.b32.xlu1 %v2124_v2, %s2975_s3 }
  0x76   : > { %551 = vrot.lane.b32.xlu0 %v2119_v1, %s2975_s3  ;;  %s2063_s3 = smov 40  }
  0x77   : > { %355 = vrot.lane.b32.xlu1 %v2116_v0, %s2052_s4 }
  0x7a   : > { %357 = vrot.lane.b32.xlu0 %v2124_v2, %s2052_s4 }
  0x7b   : > { %353 = vrot.lane.b32.xlu1 %v2119_v1, %s2052_s4 }
  0x7e   : > { %571 = vrot.lane.b32.xlu0 %v2116_v0, %s2974_s5 }
  0x7f   : > { %573 = vrot.lane.b32.xlu1 %v2124_v2, %s2974_s5 }
  0x82   : > { %569 = vrot.lane.b32.xlu0 %v2119_v1, %s2974_s5  ;;  %s2061_s5 = smov 83  }
  0x83   : > { %373 = vrot.lane.b32.xlu1 %v2116_v0, %s2054_s6 }
  0x84   : > { %v176_v3 = vpop.permute.xlu0 %175 }
  0x85   : > { %v174_v4 = vpop.permute.xlu1 %173 }
  0x86   : > { %375 = vrot.lane.b32.xlu0 %v2124_v2, %s2054_s6  ;;  %v182_v8 = vsel %vm181_vm0, %v174_v4, %v176_v3 }
  0x87   : > { %371 = vrot.lane.b32.xlu1 %v2119_v1, %s2054_s6 }
  0x88   : > { %v2246_v5 = vpop.permute.xlu0 %177 }
  0x89   : > { %v194_v6 = vpop.permute.xlu1 %193  ;;  %v183_v7 = vsel %vm181_vm0, %v176_v3, %v2246_v5 }
  0x8a   : > { %589 = vrot.lane.b32.xlu0 %v2116_v0, %s2055_s7  ;;  %1205 = vmatprep.subr.bf16.mxu1 %v183_v7 }
  0x8b   : > { %591 = vrot.lane.b32.xlu1 %v2124_v2, %s2055_s7  ;;  %1206 = vmatpush1.bf16.msra.mxu1 %v182_v8 }
  0x8c   : > { %v2255_v9 = vpop.permute.xlu0 %195 }
  0x8d   : > { %v192_v10 = vpop.permute.xlu1 %191  ;;  %v201_v11 = vsel %vm199_vm1, %v194_v6, %v2255_v9 }
  0x8e   : > { %587 = vrot.lane.b32.xlu0 %v2119_v1, %s2055_s7  ;;  %1207 = vmatprep.subr.bf16.mxu1 %v201_v11  ;;  %v200_v12 = vsel %vm199_vm1, %v192_v10, %v194_v6 }
  0x8f   : > { %391 = vrot.lane.b32.xlu1 %v2116_v0, %s2056_s8  ;;  %1208 = vmatpush1.bf16.msra.mxu1 %v200_v12 }
  0x90   : > { %v212_v13 = vpop.permute.xlu0 %211 }
  0x91   : > { %v2264_v14 = vpop.permute.xlu1 %213 }
  0x92   : > { %393 = vrot.lane.b32.xlu0 %v2124_v2, %s2056_s8  ;;  %v219_v15 = vsel %vm217_vm2, %v212_v13, %v2264_v14 }
  0x93   : > { %389 = vrot.lane.b32.xlu1 %v2119_v1, %s2056_s8  ;;  %1209 = vmatprep.subr.bf16.mxu1 %v219_v15 }
  0x94   : > { %v210_v16 = vpop.permute.xlu0 %209 }
  0x95   : > { %v230_v17 = vpop.permute.xlu1 %229  ;;  %v218_v18 = vsel %vm217_vm2, %v210_v16, %v212_v13 }
  0x96   : > { %607 = vrot.lane.b32.xlu0 %v2116_v0, %s2057_s11  ;;  %1210 = vmatpush1.bf16.msra.mxu1 %v218_v18 }
  0x97   : > { %609 = vrot.lane.b32.xlu1 %v2124_v2, %s2057_s11 }
  0x98   : > { %v2277_v19 = vpop.permute.xlu0 %231 }
  0x99   : > { %v228_v20 = vpop.permute.xlu1 %227  ;;  %v2281_v21 = vsel %vm235_vm3, %v230_v17, %v2277_v19 }
  0x9a   : > { %605 = vrot.lane.b32.xlu0 %v2119_v1, %s2057_s11  ;;  %1211 = vmatprep.subr.bf16.mxu1 %v2281_v21  ;;  %v236_v22 = vsel %vm235_vm3, %v228_v20, %v230_v17  ;;  %v1160_v20 = vcombine.high %v2320_v40, %v2320_v40 }
  0x9b   : > { %409 = vrot.lane.b32.xlu1 %v2116_v0, %s2058_s12  ;;  %1212 = vmatpush1.bf16.msra.mxu1 %v236_v22 }
  0x9c   : > { %v446_v23 = vpop.permute.xlu0 %445 }
  0x9d   : > { %v2289_v24 = vpop.permute.xlu1 %447 }
  0x9e   : > { %411 = vrot.lane.b32.xlu0 %v2124_v2, %s2058_s12  ;;  %v453_v25 = vsel %vm2984_vm4, %v446_v23, %v2289_v24 }
  0x9f   : > { %407 = vrot.lane.b32.xlu1 %v2119_v1, %s2058_s12  ;;  %1244 = vmatprep.subr.bf16.mxu0 %v453_v25  ;;  %v2417_v25 = vrot.slane %v1160_v20, %v2315_v38 }
  0xa0   : > { %v444_v26 = vpop.permute.xlu0 %443 }
  0xa1   : > { %v248_v27 = vpop.permute.xlu1 %247  ;;  %v452_v28 = vsel %vm2984_vm4, %v444_v26, %v446_v23  ;;  %vm415_vm4 = vcmask 687104  }
  0xa2   : > { %625 = vrot.lane.b32.xlu0 %v2116_v0, %s2059_s13  ;;  %1245 = vmatpush1.bf16.msra.mxu0 %v452_v28 }
  0xa3   : > { %627 = vrot.lane.b32.xlu1 %v2124_v2, %s2059_s13 }
  0xa4   : > { %v2302_v32 = vpop.permute.xlu0 %249 }
  0xa5   : > { %v246_v33 = vpop.permute.xlu1 %245  ;;  %v2306_v34 = vsel %vm253_vm5, %v248_v27, %v2302_v32 }
  0xa6   : > { %623 = vrot.lane.b32.xlu0 %v2119_v1, %s2059_s13  ;;  %1213 = vmatprep.subr.bf16.mxu1 %v2306_v34  ;;  %v254_v37 = vsel %vm253_vm5, %v246_v33, %v248_v27  ;;  %v2425_v27 = vcombine.high %v2417_v25, %v2417_v25 }
  0xa7   : > { %427 = vrot.lane.b32.xlu1 %v2116_v0, %s2061_s5  ;;  %1214 = vmatpush1.bf16.msra.mxu1 %v254_v37 }
  0xa8   : > { %v464_v39 = vpop.permute.xlu0 %463  ;;  %1276 = vmatprep.mubr.bf16.mxu0 %v2425_v27 }
  0xa9   : > { %v2322_v41 = vpop.permute.xlu1 %465 }
  0xaa   : > { %429 = vrot.lane.b32.xlu0 %v2124_v2, %s2061_s5  ;;  %v471_v43 = vsel %vm2983_vm6, %v464_v39, %v2322_v41 }
  0xab   : > { %425 = vrot.lane.b32.xlu1 %v2119_v1, %s2061_s5  ;;  %1246 = vmatprep.subr.bf16.mxu0 %v471_v43 }
  0xac   : > { %v462_v45 = vpop.permute.xlu0 %461 }
  0xad   : > { %v266_v46 = vpop.permute.xlu1 %265  ;;  %v470_v47 = vsel %vm2983_vm6, %v462_v45, %v464_v39  ;;  %vm2985_vm6 = vcmask 474112  }
  0xae   : > { %643 = vrot.lane.b32.xlu0 %v2116_v0, %s2062_s29  ;;  %1247 = vmatpush1.bf16.msra.mxu0 %v470_v47 }
  0xaf   : > { %645 = vrot.lane.b32.xlu1 %v2124_v2, %s2062_s29 }
  0xb0   : > { %v2347_v49 = vpop.permute.xlu0 %267 }
  0xb1   : > { %v264_v50 = vpop.permute.xlu1 %263  ;;  %v2351_v51 = vsel %vm271_vm7, %v266_v46, %v2347_v49 }
  0xb2   : > { %641 = vrot.lane.b32.xlu0 %v2119_v1, %s2062_s29  ;;  %1215 = vmatprep.subr.bf16.mxu1 %v2351_v51  ;;  %v272_v52 = vsel %vm271_vm7, %v264_v50, %v266_v46 }
  0xb3   : > { %305 = vrot.lane.b32.xlu1 %v2345_v48, %s2046_s26  ;;  %1216 = vmatpush1.bf16.msra.mxu1 %v272_v52  ;;  %s2064_s26 = smov 39  }
  0xb4   : > { %v482_v53 = vpop.permute.xlu0 %481 }
  0xb5   : > { %v2359_v54 = vpop.permute.xlu1 %483 }
  0xb6   : > { %661 = vrot.lane.b32.xlu0 %v2116_v0, %s2063_s3  ;;  %v489_v55 = vsel %vm2982_vm8, %v482_v53, %v2359_v54 }
  0xb7   : > { %663 = vrot.lane.b32.xlu1 %v2124_v2, %s2063_s3  ;;  %1248 = vmatprep.subr.bf16.mxu0 %v489_v55 }
  0xb8   : > { %v480_v56 = vpop.permute.xlu0 %479 }
  0xb9   : > { %v284_v57 = vpop.permute.xlu1 %283  ;;  %v488_v58 = vsel %vm2982_vm8, %v480_v56, %v482_v53  ;;  %vm397_vm8 = vcmask 818176  }
  0xba   : > { %659 = vrot.lane.b32.xlu0 %v2119_v1, %s2063_s3  ;;  %1249 = vmatpush1.bf16.msra.mxu0 %v488_v58 }
  0xbb   : > { %323 = vrot.lane.b32.xlu1 %v2345_v48, %s2048_s28  ;;  %s2068_s28 = smov 35  }
  0xbc   : > { %v2372_v59 = vpop.permute.xlu0 %285 }
  0xbd   : > { %v282_v60 = vpop.permute.xlu1 %281  ;;  %v291_v61 = vsel %vm2988_vm9, %v284_v57, %v2372_v59 }
  0xbe   : > { %179 = vrot.lane.b32.xlu0 %v2345_v48, %s2035_s15  ;;  %1217 = vmatprep.subr.bf16.mxu1 %v291_v61  ;;  %v290_v62 = vsel %vm2988_vm9, %v282_v60, %v284_v57  ;;  %s2065_s15 = smov 38   ;;  %vm667_vm9 = vcmask 326656  }
  0xbf   : > { %679 = vrot.lane.b32.xlu1 %v2116_v0, %s2064_s26  ;;  %1218 = vmatpush1.bf16.msra.mxu1 %v290_v62 }
  0xc0   : > { %v500_v63 = vpop.permute.xlu0 %499 }
  0xc1   : > { %v2381_v3 = vpop.permute.xlu1 %501 }
  0xc2   : > { %681 = vrot.lane.b32.xlu0 %v2124_v2, %s2064_s26  ;;  %v507_v4 = vsel %vm2980_vm10, %v500_v63, %v2381_v3 }
  0xc3   : > { %677 = vrot.lane.b32.xlu1 %v2119_v1, %s2064_s26  ;;  %1250 = vmatprep.subr.bf16.mxu0 %v507_v4 }
  0xc4   : > { %v498_v6 = vpop.permute.xlu0 %497 }
  0xc5   : > { %v302_v7 = vpop.permute.xlu1 %301  ;;  %v506_v8 = vsel %vm2980_vm10, %v498_v6, %v500_v63  ;;  %vm379_vm10 = vcmask 826368  }
  0xc6   : > { %341 = vrot.lane.b32.xlu0 %v2345_v48, %s2050_s30  ;;  %1251 = vmatpush1.bf16.msra.mxu0 %v506_v8  ;;  %s2069_s30 = smov 34  }
  0xc7   : > { %197 = vrot.lane.b32.xlu1 %v2345_v48, %s2036_s16  ;;  %s2066_s16 = smov 37  }
  0xc8   : > { %v2394_v10 = vpop.permute.xlu0 %303 }
  0xc9   : > { %v300_v11 = vpop.permute.xlu1 %299  ;;  %v309_v12 = vsel %vm307_vm11, %v302_v7, %v2394_v10 }
  0xca   : > { %697 = vrot.lane.b32.xlu0 %v2116_v0, %s2065_s15  ;;  %1219 = vmatprep.subr.bf16.mxu1 %v309_v12  ;;  %v308_v13 = vsel %vm307_vm11, %v300_v11, %v302_v7 }
  0xcb   : > { %699 = vrot.lane.b32.xlu1 %v2124_v2, %s2065_s15  ;;  %1220 = vmatpush1.bf16.msra.mxu1 %v308_v13 }
  0xcc   : > { %v518_v15 = vpop.permute.xlu0 %517 }
  0xcd   : > { %v2403_v16 = vpop.permute.xlu1 %519 }
  0xce   : > { %695 = vrot.lane.b32.xlu0 %v2119_v1, %s2065_s15  ;;  %v525_v17 = vsel %vm2978_vm12, %v518_v15, %v2403_v16 }
  0xcf   : > { %359 = vrot.lane.b32.xlu1 %v2345_v48, %s2052_s4  ;;  %1252 = vmatprep.subr.bf16.mxu0 %v525_v17  ;;  %s2070_s4 = smov 18  }
  0xd0   : > { %v516_v18 = vpop.permute.xlu0 %515 }
  0xd1   : > { %v320_v22 = vpop.permute.xlu1 %319  ;;  %v524_v23 = vsel %vm2978_vm12, %v516_v18, %v518_v15  ;;  %vm361_vm12 = vcmask 834560  }
  0xd2   : > { %215 = vrot.lane.b32.xlu0 %v2345_v48, %s2037_s17  ;;  %1253 = vmatpush1.bf16.msra.mxu0 %v524_v23  ;;  %s2067_s17 = smov 36  }
  0xd3   : > { %715 = vrot.lane.b32.xlu1 %v2116_v0, %s2066_s16 }
  0xd4   : > { %v2421_v26 = vpop.permute.xlu0 %321 }
  0xd5   : > { %v318_v28 = vpop.permute.xlu1 %317  ;;  %v327_v29 = vsel %vm325_vm13, %v320_v22, %v2421_v26 }
  0xd6   : > { %717 = vrot.lane.b32.xlu0 %v2124_v2, %s2066_s16  ;;  %1221 = vmatprep.subr.bf16.mxu1 %v327_v29  ;;  %v326_v30 = vsel %vm325_vm13, %v318_v28, %v320_v22 }
  0xd7   : > { %713 = vrot.lane.b32.xlu1 %v2119_v1, %s2066_s16  ;;  %1222 = vmatpush1.bf16.msra.mxu1 %v326_v30 }
  0xd8   : > { %v536_v33 = vpop.permute.xlu0 %535 }
  0xd9   : > { %v2435_v35 = vpop.permute.xlu1 %537 }
  0xda   : > { %377 = vrot.lane.b32.xlu0 %v2345_v48, %s2054_s6  ;;  %v543_v36 = vsel %vm2977_vm14, %v536_v33, %v2435_v35  ;;  %s2993_s6 = smov 61  }
  0xdb   : > { %233 = vrot.lane.b32.xlu1 %v2345_v48, %s2038_s18  ;;  %1254 = vmatprep.subr.bf16.mxu0 %v543_v36 }
  0xdc   : > { %v534_v37 = vpop.permute.xlu0 %533 }
  0xdd   : > { %v338_v39 = vpop.permute.xlu1 %337  ;;  %v542_v40 = vsel %vm2977_vm14, %v534_v37, %v536_v33  ;;  %vm2979_vm14 = vcmask 498688  }
  0xde   : > { %733 = vrot.lane.b32.xlu0 %v2116_v0, %s2067_s17  ;;  %1255 = vmatpush1.bf16.msra.mxu0 %v542_v40 }
  0xdf   : > { %735 = vrot.lane.b32.xlu1 %v2124_v2, %s2067_s17 }
  0xe0   : > { %v2448_v43 = vpop.permute.xlu0 %339 }
  0xe1   : > { %v336_v45 = vpop.permute.xlu1 %335  ;;  %v345_v46 = vsel %vm343_vm15, %v338_v39, %v2448_v43 }
  0xe2   : > { %731 = vrot.lane.b32.xlu0 %v2119_v1, %s2067_s17  ;;  %1223 = vmatprep.subr.bf16.mxu1 %v345_v46  ;;  %v344_v47 = vsel %vm343_vm15, %v336_v45, %v338_v39 }
  0xe3   : > { %395 = vrot.lane.b32.xlu1 %v2345_v48, %s2056_s8  ;;  %1224 = vmatpush1.bf16.msra.mxu1 %v344_v47  ;;  %s2077_s8 = smov 121  }
  0xe4   : > { %v554_v50 = vpop.permute.xlu0 %553 }
  0xe5   : > { %v2457_v52 = vpop.permute.xlu1 %555 }
  0xe6   : > { %251 = vrot.lane.b32.xlu0 %v2345_v48, %s2040_s20  ;;  %v561_v53 = vsel %vm2979_vm14, %v554_v50, %v2457_v52 }
  0xe7   : > { %751 = vrot.lane.b32.xlu1 %v2116_v0, %s2068_s28  ;;  %1256 = vmatprep.subr.bf16.mxu0 %v561_v53 }
  0xe8   : > { %v552_v55 = vpop.permute.xlu0 %551 }
  0xe9   : > { %v356_v56 = vpop.permute.xlu1 %355  ;;  %v560_v57 = vsel %vm2979_vm14, %v552_v55, %v554_v50  ;;  %vm2981_vm14 = vcmask 490496  }
  0xea   : > { %753 = vrot.lane.b32.xlu0 %v2124_v2, %s2068_s28  ;;  %1257 = vmatpush1.bf16.msra.mxu0 %v560_v57 }
  0xeb   : > { %749 = vrot.lane.b32.xlu1 %v2119_v1, %s2068_s28 }
  0xec   : > { %v2470_v58 = vpop.permute.xlu0 %357 }
  0xed   : > { %v354_v60 = vpop.permute.xlu1 %353  ;;  %v363_v61 = vsel %vm361_vm12, %v356_v56, %v2470_v58 }
  0xee   : > { %413 = vrot.lane.b32.xlu0 %v2345_v48, %s2058_s12  ;;  %1225 = vmatprep.subr.bf16.mxu1 %v363_v61  ;;  %v362_v62 = vsel %vm361_vm12, %v354_v60, %v356_v56 }
  0xef   : > { %269 = vrot.lane.b32.xlu1 %v2345_v48, %s2042_s22  ;;  %1226 = vmatpush1.bf16.msra.mxu1 %v362_v62 }
  0xf0   : > { %v572_v63 = vpop.permute.xlu0 %571 }
  0xf1   : > { %v2479_v4 = vpop.permute.xlu1 %573 }
  0xf2   : > { %769 = vrot.lane.b32.xlu0 %v2116_v0, %s2069_s30  ;;  %v579_v6 = vsel %vm2981_vm14, %v572_v63, %v2479_v4 }
  0xf3   : > { %771 = vrot.lane.b32.xlu1 %v2124_v2, %s2069_s30  ;;  %1258 = vmatprep.subr.bf16.mxu0 %v579_v6 }
  0xf4   : > { %v570_v7 = vpop.permute.xlu0 %569 }
  0xf5   : > { %v374_v8 = vpop.permute.xlu1 %373  ;;  %v578_v11 = vsel %vm2981_vm14, %v570_v7, %v572_v63  ;;  %vm2986_vm14 = vcmask 482304  }
  0xf6   : > { %767 = vrot.lane.b32.xlu0 %v2119_v1, %s2069_s30  ;;  %1259 = vmatpush1.bf16.msra.mxu0 %v578_v11 }
  0xf7   : > { %431 = vrot.lane.b32.xlu1 %v2345_v48, %s2061_s5  ;;  %s2076_s5 = smov 12  }
  0xf8   : > { %v2492_v12 = vpop.permute.xlu0 %375 }
  0xf9   : > { %v372_v13 = vpop.permute.xlu1 %371  ;;  %v381_v15 = vsel %vm379_vm10, %v374_v8, %v2492_v12 }
  0xfa   : > { %287 = vrot.lane.b32.xlu0 %v2345_v48, %s2044_s24  ;;  %1227 = vmatprep.subr.bf16.mxu1 %v381_v15  ;;  %v380_v17 = vsel %vm379_vm10, %v372_v13, %v374_v8  ;;  %s2071_s24 = smov 17  }
  0xfb   : > { %787 = vrot.lane.b32.xlu1 %v2116_v0, %s2070_s4  ;;  %1228 = vmatpush1.bf16.msra.mxu1 %v380_v17 }
  0xfc   : > { %v590_v18 = vpop.permute.xlu0 %589 }
  0xfd   : > { %v2501_v20 = vpop.permute.xlu1 %591 }
  0xfe   : > { %789 = vrot.lane.b32.xlu0 %v2124_v2, %s2070_s4  ;;  %v597_v22 = vsel %vm2986_vm14, %v590_v18, %v2501_v20 }
  0xff   : > { %785 = vrot.lane.b32.xlu1 %v2119_v1, %s2070_s4  ;;  %1260 = vmatprep.subr.bf16.mxu0 %v597_v22 }
 0x100   : > { %v588_v23 = vpop.permute.xlu0 %587 }
 0x101   : > { %v392_v28 = vpop.permute.xlu1 %391  ;;  %v596_v29 = vsel %vm2986_vm14, %v588_v23, %v590_v18  ;;  %vm433_vm14 = vcmask 678912  }
 0x102   : > { %593 = vrot.lane.b32.xlu0 %v2345_v48, %s2055_s7  ;;  %1261 = vmatpush1.bf16.msra.mxu0 %v596_v29  ;;  %s2994_s7 = smov 60  }
 0x103   : > { %449 = vrot.lane.b32.xlu1 %v2345_v48, %s2039_s19  ;;  %s2072_s19 = smov 16  }
 0x104   : > { %v2514_v30 = vpop.permute.xlu0 %393 }
 0x105   : > { %v390_v33 = vpop.permute.xlu1 %389  ;;  %v399_v36 = vsel %vm397_vm8, %v392_v28, %v2514_v30 }
 0x106   : > { %805 = vrot.lane.b32.xlu0 %v2116_v0, %s2071_s24  ;;  %1229 = vmatprep.subr.bf16.mxu1 %v399_v36  ;;  %v398_v37 = vsel %vm397_vm8, %v390_v33, %v392_v28 }
 0x107   : > { %807 = vrot.lane.b32.xlu1 %v2124_v2, %s2071_s24  ;;  %1230 = vmatpush1.bf16.msra.mxu1 %v398_v37 }
 0x108   : > { %v608_v39 = vpop.permute.xlu0 %607 }
 0x109   : > { %v2523_v40 = vpop.permute.xlu1 %609 }
 0x10a   : > { %803 = vrot.lane.b32.xlu0 %v2119_v1, %s2071_s24  ;;  %v615_v45 = vsel %vm2985_vm6, %v608_v39, %v2523_v40 }
 0x10b   : > { %611 = vrot.lane.b32.xlu1 %v2345_v48, %s2057_s11  ;;  %1262 = vmatprep.subr.bf16.mxu0 %v615_v45  ;;  %s2078_s11 = smov 120  }
 0x10c   : > { %v606_v46 = vpop.permute.xlu0 %605 }
 0x10d   : > { %v410_v47 = vpop.permute.xlu1 %409  ;;  %v614_v50 = vsel %vm2985_vm6, %v606_v46, %v608_v39  ;;  %vm2987_vm6 = vcmask 465920  }
 0x10e   : > { %467 = vrot.lane.b32.xlu0 %v2345_v48, %s2041_s21  ;;  %1263 = vmatpush1.bf16.msra.mxu0 %v614_v50  ;;  %s2073_s21 = smov 15  }
 0x10f   : > { %823 = vrot.lane.b32.xlu1 %v2116_v0, %s2072_s19 }
 0x110   : > { %v2536_v53 = vpop.permute.xlu0 %411 }
 0x111   : > { %v408_v55 = vpop.permute.xlu1 %407  ;;  %v417_v56 = vsel %vm415_vm4, %v410_v47, %v2536_v53 }
 0x112   : > { %825 = vrot.lane.b32.xlu0 %v2124_v2, %s2072_s19  ;;  %1231 = vmatprep.subr.bf16.mxu1 %v417_v56  ;;  %v416_v57 = vsel %vm415_vm4, %v408_v55, %v410_v47 }
 0x113   : > { %821 = vrot.lane.b32.xlu1 %v2119_v1, %s2072_s19  ;;  %1232 = vmatpush1.bf16.msra.mxu1 %v416_v57 }
 0x114   : > { %v626_v60 = vpop.permute.xlu0 %625 }
 0x115   : > { %v2545_v61 = vpop.permute.xlu1 %627 }
 0x116   : > { %629 = vrot.lane.b32.xlu0 %v2345_v48, %s2059_s13  ;;  %v633_v62 = vsel %vm2987_vm6, %v626_v60, %v2545_v61 }
 0x117   : > { %485 = vrot.lane.b32.xlu1 %v2345_v48, %s2043_s23  ;;  %1264 = vmatprep.subr.bf16.mxu0 %v633_v62  ;;  %s2074_s23 = smov 14  }
 0x118   : > { %v624_v63 = vpop.permute.xlu0 %623 }
 0x119   : > { %v428_v6 = vpop.permute.xlu1 %427  ;;  %v632_v7 = vsel %vm2987_vm6, %v624_v63, %v626_v60  ;;  %vm649_vm6 = vcmask 457728  }
 0x11a   : > { %841 = vrot.lane.b32.xlu0 %v2116_v0, %s2073_s21  ;;  %1265 = vmatpush1.bf16.msra.mxu0 %v632_v7 }
 0x11b   : > { %843 = vrot.lane.b32.xlu1 %v2124_v2, %s2073_s21 }
 0x11c   : > { %v2558_v8 = vpop.permute.xlu0 %429 }
 0x11d   : > { %v426_v11 = vpop.permute.xlu1 %425  ;;  %v435_v13 = vsel %vm433_vm14, %v428_v6, %v2558_v8 }
 0x11e   : > { %839 = vrot.lane.b32.xlu0 %v2119_v1, %s2073_s21  ;;  %1233 = vmatprep.subr.bf16.mxu1 %v435_v13  ;;  %v434_v15 = vsel %vm433_vm14, %v426_v11, %v428_v6 }
 0x11f   : > { %647 = vrot.lane.b32.xlu1 %v2345_v48, %s2062_s29  ;;  %1234 = vmatpush1.bf16.msra.mxu1 %v434_v15 }
 0x120   : > { %v644_v17 = vpop.permute.xlu0 %643 }
 0x121   : > { %v2567_v18 = vpop.permute.xlu1 %645 }
 0x122   : > { %503 = vrot.lane.b32.xlu0 %v2345_v48, %s2045_s25  ;;  %v651_v22 = vsel %vm649_vm6, %v644_v17, %v2567_v18  ;;  %1236 = vmatmul.mubr.bf16.vlgmr.msra.gmra.mrb[0].mxu1 %v2326_v42  ;;  %s2075_s25 = smov 13  }
 0x123   : > { %859 = vrot.lane.b32.xlu1 %v2116_v0, %s2074_s23  ;;  %1266 = vmatprep.subr.bf16.mxu0 %v651_v22 }
 0x124   : > { %v642_v23 = vpop.permute.xlu0 %641  ;;  %1399 = vmatprep.mubr.bf16.mxu1 %v2336_v44 }
 0x125   : > { %v306_v28 = vpop.permute.xlu1 %305  ;;  %v650_v29 = vsel %vm649_vm6, %v642_v23, %v644_v17 }
 0x126   : > { %861 = vrot.lane.b32.xlu0 %v2124_v2, %s2074_s23  ;;  %1267 = vmatpush1.bf16.msra.mxu0 %v650_v29  ;;  %v310_v33 = vsel %vm307_vm11, %v2394_v10, %v306_v28  ;;  %vm685_vm11 = vcmask 318464  }
 0x127   : > { %857 = vrot.lane.b32.xlu1 %v2119_v1, %s2074_s23  ;;  %1871 = vmatprep.subr.bf16.mxu1 %v310_v33 }
 0x128   : > { %v662_v36 = vpop.permute.xlu0 %661  ;;  %1872 = vmatpush3.bf16.msra.mxu1 %v2124_v2 }
 0x129   : > { %v2585_v37 = vpop.permute.xlu1 %663 }
 0x12a   : > { %665 = vrot.lane.b32.xlu0 %v2345_v48, %s2063_s3  ;;  %v669_v44 = vsel %vm667_vm9, %v662_v36, %v2585_v37 }
 0x12b   : > { %521 = vrot.lane.b32.xlu1 %v2345_v48, %s2047_s27  ;;  %1268 = vmatprep.subr.bf16.mxu0 %v669_v44  ;;  %s2992_s27 = smov 62  }
 0x12c   : > { %v660_v10 = vpop.permute.xlu0 %659 }
 0x12d   : > { %v324_v39 = vpop.permute.xlu1 %323  ;;  %v668_v45 = vsel %vm667_vm9, %v660_v10, %v662_v36 }
 0x12e   : > { %877 = vrot.lane.b32.xlu0 %v2116_v0, %s2075_s25  ;;  %1269 = vmatpush1.bf16.msra.mxu0 %v668_v45  ;;  %v328_v46 = vsel %vm325_vm13, %v2421_v26, %v324_v39  ;;  %v2668_v39 = vld [vmem:[%s2113_s14 + $0x10] ss:$20 sps:$4 sm:$0xff]   ;;  %vm2996_vm13 = vcmask 482304  }
 0x12f   : > { %879 = vrot.lane.b32.xlu1 %v2124_v2, %s2075_s25  ;;  %1873 = vmatprep.subr.bf16.mxu1 %v328_v46 }
 0x130   : > { %v180_v47 = vpop.permute.xlu0 %179 }
 0x131   : > { %v184_v50 = vsel %vm181_vm0, %v2246_v5, %v180_v47  ;;  %v680_v55 = vpop.permute.xlu1 %679  ;;  %vm703_vm0 = vcmask 310272  }
 0x132   : > { %875 = vrot.lane.b32.xlu0 %v2119_v1, %s2075_s25  ;;  %1874 = vmatpush3.bf16.msra.mxu1 %v184_v50 }
 0x133   : > { %683 = vrot.lane.b32.xlu1 %v2345_v48, %s2064_s26 }
 0x134   : > { %v2606_v56 = vpop.permute.xlu0 %681 }
 0x135   : > { %v678_v26 = vpop.permute.xlu1 %677  ;;  %v687_v57 = vsel %vm685_vm11, %v680_v55, %v2606_v56 }
 0x136   : > { %539 = vrot.lane.b32.xlu0 %v2345_v48, %s2992_s27  ;;  %1270 = vmatprep.subr.bf16.mxu0 %v687_v57  ;;  %v686_v5 = vsel %vm685_vm11, %v678_v26, %v680_v55 }
 0x137   : > { %895 = vrot.lane.b32.xlu1 %v2116_v0, %s2076_s5  ;;  %1271 = vmatpush1.bf16.msra.mxu0 %v686_v5 }
 0x138   : > { %v342_v60 = vpop.permute.xlu0 %341 }
 0x139   : > { %v198_v62 = vpop.permute.xlu1 %197  ;;  %v346_v63 = vsel %vm343_vm15, %v2448_v43, %v342_v60  ;;  %vm2989_vm15 = vcmask 138240  }
 0x13a   : > { %v202_v6 = vsel %vm199_vm1, %v2255_v9, %v198_v62  ;;  %897 = vrot.lane.b32.xlu0 %v2124_v2, %s2076_s5  ;;  %1875 = vmatprep.subr.bf16.mxu1 %v346_v63  ;;  %vm721_vm1 = vcmask 302080  }
 0x13b   : > { %893 = vrot.lane.b32.xlu1 %v2119_v1, %s2076_s5  ;;  %1876 = vmatpush3.bf16.msra.mxu1 %v202_v6 }
 0x13c   : > { %v698_v7 = vpop.permute.xlu0 %697 }
 0x13d   : > { %v2623_v11 = vpop.permute.xlu1 %699 }
 0x13e   : > { %701 = vrot.lane.b32.xlu0 %v2345_v48, %s2065_s15  ;;  %v705_v43 = vsel %vm703_vm0, %v698_v7, %v2623_v11 }
 0x13f   : > { %557 = vrot.lane.b32.xlu1 %v2345_v48, %s2993_s6  ;;  %1272 = vmatprep.subr.bf16.mxu0 %v705_v43 }
 0x140   : > { %v696_v9 = vpop.permute.xlu0 %695 }
 0x141   : > { %v360_v13 = vpop.permute.xlu1 %359  ;;  %v704_v15 = vsel %vm703_vm0, %v696_v9, %v698_v7 }
 0x142   : > { %719 = vrot.lane.b32.xlu0 %v2345_v48, %s2066_s16  ;;  %1273 = vmatpush1.bf16.msra.mxu0 %v704_v15  ;;  %v364_v1 = vsel %vm361_vm12, %v2470_v58, %v360_v13  ;;  %vm793_vm12 = vcmask 146432  }
 0x143   : > { %575 = vrot.lane.b32.xlu1 %v2345_v48, %s2994_s7  ;;  %1877 = vmatprep.subr.bf16.mxu1 %v364_v1 }
 0x144   : > { %v216_v17 = vpop.permute.xlu0 %215 }
 0x145   : > { %v220_v22 = vsel %vm217_vm2, %v2264_v14, %v216_v17  ;;  %v716_v23 = vpop.permute.xlu1 %715  ;;  %vm739_vm2 = vcmask 293888  }
 0x146   : > { %881 = vrot.lane.b32.xlu0 %v2345_v48, %s2075_s25  ;;  %1878 = vmatpush3.bf16.msra.mxu1 %v220_v22 }
 0x147   : > { %737 = vrot.lane.b32.xlu1 %v2345_v48, %s2067_s17 }
 0x148   : > { %v2644_v28 = vpop.permute.xlu0 %717 }
 0x149   : > { %v714_v58 = vpop.permute.xlu1 %713  ;;  %v723_v29 = vsel %vm721_vm1, %v716_v23, %v2644_v28 }
 0x14a   : > { %899 = vrot.lane.b32.xlu0 %v2345_v48, %s2076_s5  ;;  %1274 = vmatprep.subr.bf16.mxu0 %v723_v29  ;;  %v722_v14 = vsel %vm721_vm1, %v714_v58, %v716_v23 }
 0x14b   : > { %755 = vrot.lane.b32.xlu1 %v2345_v48, %s2068_s28  ;;  %1275 = vmatpush1.bf16.msra.mxu0 %v722_v14 }
 0x14c   : > { %v378_v33 = vpop.permute.xlu0 %377 }
 0x14d   : > { %v2653_v36 = vpop.permute.xlu1 %233  ;;  %v382_v44 = vsel %vm379_vm10, %v2492_v12, %v378_v33  ;;  %vm757_vm10 = vcmask 285696  }
 0x14e   : > { %v2660_v10 = vsel %vm235_vm3, %v2277_v19, %v2653_v36  ;;  %939 = vrot.lane.b32.xlu0 %v2124_v2, %s2077_s8  ;;  %1879 = vmatprep.subr.bf16.mxu1 %v382_v44 }
 0x14f   : > { %941 = vrot.lane.b32.xlu1 %v2345_v48, %s2077_s8  ;;  %1880 = vmatpush3.bf16.msra.mxu1 %v2660_v10 }
 0x150   : > { %v734_v12 = vpop.permute.xlu0 %733  ;;  %1277 = vmatmul.mubr.bf16.vlgmr.msra.gmra.mrb[0].mxu0 %v2417_v25 }
 0x151   : > { %v2671_v45 = vpop.permute.xlu1 %735 }
 0x152   : > { %937 = vrot.lane.b32.xlu0 %v2116_v0, %s2077_s8  ;;  %v741_v2 = vsel %vm739_vm2, %v734_v12, %v2671_v45  ;;  %v2025_v0 = vld [vmem:[%s2113_s14 + $0x8] ss:$20 sps:$4 sm:$0xff]  }
 0x153   : > { %916 = vrot.lane.b32.xlu1 %v2668_v39, %s2038_s18  ;;  %1285 = vmatprep.subr.bf16.mxu0 %v741_v2 }
 0x154   : > { %v732_v19 = vpop.permute.xlu0 %731 }
 0x155   : > { %v740_v46 = vsel %vm739_vm2, %v732_v19, %v734_v12  ;;  %v396_v47 = vpop.permute.xlu1 %395 }
 0x156   : > { %773 = vrot.lane.b32.xlu0 %v2345_v48, %s2069_s30  ;;  %1286 = vmatpush1.bf16.msra.mxu0 %v740_v46  ;;  %v400_v50 = vsel %vm397_vm8, %v2514_v30, %v396_v47  ;;  %v2026_v30 = vld [vmem:[%s2113_s14 + $0x4] ss:$20 sps:$4 sm:$0xff]   ;;  %s2079_s14 = smov 119   ;;  %vm775_vm8 = vcmask 277504  }
 0x157   : > { %957 = vrot.lane.b32.xlu1 %v2025_v0, %s2078_s11  ;;  %1881 = vmatprep.subr.bf16.mxu1 %v400_v50 }
 0x158   : > { %v2686_v55 = vpop.permute.xlu0 %251 }
 0x159   : > { %v2691_v26 = vsel %vm253_vm5, %v2302_v32, %v2686_v55  ;;  %v752_v57 = vpop.permute.xlu1 %751  ;;  %v2705_v32 = vld [vmem:[%s2972_s1 + $0x8] sm:$0x3f] }
 0x15a   : > { %959 = vrot.lane.b32.xlu0 %v2345_v48, %s2078_s11  ;;  %1882 = vmatpush3.bf16.msra.mxu1 %v2691_v26  ;;  %v2712_v6 = vrot.slane %v2705_v32, %v2315_v38 }
 0x15b   : > { %955 = vrot.lane.b32.xlu1 %v2026_v30, %s2078_s11 }
 0x15c   : > { %v2698_v5 = vpop.permute.xlu0 %753  ;;  %v2718_v43 = vcombine.high %v2712_v6, %v2712_v6 }
 0x15d   : > { %v750_v60 = vpop.permute.xlu1 %749  ;;  %v759_v62 = vsel %vm757_vm10, %v752_v57, %v2698_v5 }
 0x15e   : > { %v758_v63 = vsel %vm757_vm10, %v750_v60, %v752_v57  ;;  %923 = vrot.lane.b32.xlu0 %v2668_v39, %s2040_s20  ;;  %1287 = vmatprep.subr.bf16.mxu0 %v759_v62  ;;  %s2080_s20 = smov 118  }
 0x15f   : > { %791 = vrot.lane.b32.xlu1 %v2345_v48, %s2070_s4  ;;  %1288 = vmatpush1.bf16.msra.mxu0 %v758_v63 }
 0x160   : > { %v414_v7 = vpop.permute.xlu0 %413  ;;  %1317 = vmatprep.mubr.bf16.mxu0 %v2718_v43 }
 0x161   : > { %v2720_v9 = vpop.permute.xlu1 %269  ;;  %v418_v13 = vsel %vm415_vm4, %v2536_v53, %v414_v7  ;;  %vm2995_vm4 = vcmask 867328  }
 0x162   : > { %v2727_v15 = vsel %vm271_vm7, %v2347_v49, %v2720_v9  ;;  %975 = vrot.lane.b32.xlu0 %v2025_v0, %s2079_s14  ;;  %1883 = vmatprep.subr.bf16.mxu1 %v418_v13 }
 0x163   : > { %977 = vrot.lane.b32.xlu1 %v2345_v48, %s2079_s14  ;;  %1884 = vmatpush3.bf16.msra.mxu1 %v2727_v15 }
 0x164   : > { %v770_v1 = vpop.permute.xlu0 %769 }
 0x165   : > { %v2734_v17 = vpop.permute.xlu1 %771 }
 0x166   : > { %973 = vrot.lane.b32.xlu0 %v2026_v30, %s2079_s14  ;;  %v777_v49 = vsel %vm775_vm8, %v770_v1, %v2734_v17 }
 0x167   : > { %930 = vrot.lane.b32.xlu1 %v2668_v39, %s2042_s22  ;;  %1289 = vmatprep.subr.bf16.mxu0 %v777_v49  ;;  %s1956_s22 = smul.u32 6, %s3032_s10 }
 0x168   : > { %v768_v53 = vpop.permute.xlu0 %767 }
 0x169   : > { %v776_v22 = vsel %vm775_vm8, %v768_v53, %v770_v1  ;;  %v432_v23 = vpop.permute.xlu1 %431  ;;  %s143_s3 = scalar_lea.vmem %s2973_s2, %s1956_s22 }
 0x16a   : > { %809 = vrot.lane.b32.xlu0 %v2345_v48, %s2071_s24  ;;  %1290 = vmatpush1.bf16.msra.mxu0 %v776_v22  ;;  %v436_v58 = vsel %vm433_vm14, %v2558_v8, %v432_v23  ;;  %vm2997_vm14 = vcmask 670720  }
 0x16b   : > { %943 = vrot.lane.b32.xlu1 %v2668_v39, %s2077_s8  ;;  %1885 = vmatprep.subr.bf16.mxu1 %v436_v58 }
 0x16c   : > { %v288_v29 = vpop.permute.xlu0 %287 }
 0x16d   : > { %v292_v14 = vsel %vm2995_vm4, %v2372_v59, %v288_v29  ;;  %v788_v33 = vpop.permute.xlu1 %787  ;;  %vm2998_vm4 = vcmask 474112  }
 0x16e   : > { %827 = vrot.lane.b32.xlu0 %v2345_v48, %s2072_s19  ;;  %1886 = vmatpush3.bf16.msra.mxu1 %v292_v14 }
 0x16f   : > { %961 = vrot.lane.b32.xlu1 %v2668_v39, %s2078_s11 }
 0x170   : > { %v2754_v44 = vpop.permute.xlu0 %789 }
 0x171   : > { %v786_v8 = vpop.permute.xlu1 %785  ;;  %v795_v12 = vsel %vm793_vm12, %v788_v33, %v2754_v44  ;;  %1400 = vmatmul.mubr.bf16.vlgmr.msra.gmra.mrb[4].mxu1 %v2326_v42 }
 0x172   : > { %v794_v2 = vsel %vm793_vm12, %v786_v8, %v788_v33  ;;  %845 = vrot.lane.b32.xlu0 %v2345_v48, %s2073_s21  ;;  %1291 = vmatprep.subr.bf16.mxu0 %v795_v12 }
 0x173   : > { %993 = vrot.lane.b32.xlu1 %v2025_v0, %s2080_s20  ;;  %1292 = vmatpush1.bf16.msra.mxu0 %v794_v2 }
 0x174   : > { %v594_v59 = vpop.permute.xlu0 %593  ;;  %1439 = vmatprep.mubr.bf16.mxu1 %v2425_v27 }
 0x175   : > { %v450_v19 = vpop.permute.xlu1 %449  ;;  %v598_v46 = vsel %vm2996_vm13, %v2501_v20, %v594_v59  ;;  %vm2999_vm13 = vcmask 662528  }
 0x176   : > { %v454_v47 = vsel %vm2997_vm14, %v2289_v24, %v450_v19  ;;  %995 = vrot.lane.b32.xlu0 %v2345_v48, %s2080_s20  ;;  %1893 = vmatprep.subr.bf16.mxu1 %v598_v46  ;;  %vm829_vm14 = vcmask 130048  }
 0x177   : > { %991 = vrot.lane.b32.xlu1 %v2026_v30, %s2080_s20  ;;  %1894 = vmatpush3.bf16.msra.mxu1 %v454_v47 }
 0x178   : > { %v806_v42 = vpop.permute.xlu0 %805 }
 0x179   : > { %v2768_v50 = vpop.permute.xlu1 %807 }
 0x17a   : > { %979 = vrot.lane.b32.xlu0 %v2668_v39, %s2079_s14  ;;  %v813_v27 = vsel %vm2989_vm15, %v806_v42, %v2768_v50 }
 0x17b   : > { %863 = vrot.lane.b32.xlu1 %v2345_v48, %s2074_s23  ;;  %1293 = vmatprep.subr.bf16.mxu0 %v813_v27 }
 0x17c   : > { %v804_v24 = vpop.permute.xlu0 %803 }
 0x17d   : > { %v812_v20 = vsel %vm2989_vm15, %v804_v24, %v806_v42  ;;  %v612_v0 = vpop.permute.xlu1 %611  ;;  %vm847_vm15 = vcmask 121856  }
 0x17e   : > { %997 = vrot.lane.b32.xlu0 %v2668_v39, %s2080_s20  ;;  %1294 = vmatpush1.bf16.msra.mxu0 %v812_v20  ;;  %v616_v57 = vsel %vm2998_vm4, %v2523_v40, %v612_v0  ;;  %vm3000_vm4 = vcmask 465920  }
 0x17f   : > { %1895 = vmatprep.subr.bf16.mxu1 %v616_v57 }
 0x180   : > { %v468_v30 = vpop.permute.xlu0 %467 }
 0x181   : > { %v472_v60 = vsel %vm2999_vm13, %v2322_v41, %v468_v30  ;;  %v824_v62 = vpop.permute.xlu1 %823  ;;  %vm3001_vm13 = vcmask 654336  }
 0x182   : > { %1896 = vmatpush3.bf16.msra.mxu1 %v472_v60 }
 0x184   : > { %v2782_v48 = vpop.permute.xlu0 %825 }
 0x185   : > { %v822_v63 = vpop.permute.xlu1 %821  ;;  %v831_v7 = vsel %vm829_vm14, %v824_v62, %v2782_v48 }
 0x186   : > { %v830_v39 = vsel %vm829_vm14, %v822_v63, %v824_v62  ;;  %1295 = vmatprep.subr.bf16.mxu0 %v831_v7 }
 0x187   : > { %1296 = vmatpush1.bf16.msra.mxu0 %v830_v39 }
 0x188   : > { %v630_v13 = vpop.permute.xlu0 %629 }
 0x189   : > { %v486_v40 = vpop.permute.xlu1 %485  ;;  %v634_v1 = vsel %vm3000_vm4, %v2545_v61, %v630_v13  ;;  %vm3002_vm4 = vcmask 646144  }
 0x18a   : > { %v490_v41 = vsel %vm3001_vm13, %v2359_v54, %v486_v40  ;;  %1897 = vmatprep.subr.bf16.mxu1 %v634_v1  ;;  %vm865_vm13 = vcmask 113664  }
 0x18b   : > { %1898 = vmatpush3.bf16.msra.mxu1 %v490_v41 }
 0x18c   : > { %v842_v49 = vpop.permute.xlu0 %841 }
 0x18d   : > { %v2791_v53 = vpop.permute.xlu1 %843 }
 0x18e   : > { %v849_v22 = vsel %vm847_vm15, %v842_v49, %v2791_v53 }
 0x18f   : > { %1297 = vmatprep.subr.bf16.mxu0 %v849_v22 }
 0x190   : > { %v840_v23 = vpop.permute.xlu0 %839 }
 0x191   : > { %v848_v58 = vsel %vm847_vm15, %v840_v23, %v842_v49  ;;  %v648_v29 = vpop.permute.xlu1 %647 }
 0x192   : > { %1298 = vmatpush1.bf16.msra.mxu0 %v848_v58  ;;  %v652_v61 = vsel %vm649_vm6, %v2567_v18, %v648_v29  ;;  %vm3003_vm6 = vcmask 637952  }
 0x193   : > { %1899 = vmatprep.subr.bf16.mxu1 %v652_v61 }
 0x194   : > { %v504_v54 = vpop.permute.xlu0 %503 }
 0x195   : > { %v508_v14 = vsel %vm3002_vm4, %v2381_v3, %v504_v54  ;;  %v860_v33 = vpop.permute.xlu1 %859  ;;  %vm883_vm4 = vcmask 105472  }
 0x196   : > { %1900 = vmatpush3.bf16.msra.mxu1 %v508_v14 }
 0x198   : > { %v2800_v8 = vpop.permute.xlu0 %861 }
 0x199   : > { %v858_v12 = vpop.permute.xlu1 %857  ;;  %v867_v2 = vsel %vm865_vm13, %v860_v33, %v2800_v8 }
 0x19a   : > { %v866_v59 = vsel %vm865_vm13, %v858_v12, %v860_v33  ;;  %1299 = vmatprep.subr.bf16.mxu0 %v867_v2 }
 0x19b   : > { %1300 = vmatpush1.bf16.msra.mxu0 %v866_v59 }
 0x19c   : > { %v666_v19 = vpop.permute.xlu0 %665 }
 0x19d   : > { %v522_v18 = vpop.permute.xlu1 %521  ;;  %v670_v46 = vsel %vm667_vm9, %v2585_v37, %v666_v19  ;;  %vm3004_vm9 = vcmask 506880  }
 0x19e   : > { %v526_v3 = vsel %vm3003_vm6, %v2403_v16, %v522_v18  ;;  %1901 = vmatprep.subr.bf16.mxu1 %v670_v46  ;;  %vm901_vm6 = vcmask 97280  }
 0x19f   : > { %1902 = vmatpush3.bf16.msra.mxu1 %v526_v3 }
 0x1a0   : > { %v878_v47 = vpop.permute.xlu0 %877 }
 0x1a1   : > { %v880_v42 = vpop.permute.xlu1 %879 }
 0x1a2   : > { %v885_v27 = vsel %vm883_vm4, %v878_v47, %v880_v42 }
 0x1a3   : > { %1301 = vmatprep.subr.bf16.mxu0 %v885_v27 }
 0x1a4   : > { %v876_v24 = vpop.permute.xlu0 %875 }
 0x1a5   : > { %v884_v20 = vsel %vm883_vm4, %v876_v24, %v878_v47  ;;  %v684_v0 = vpop.permute.xlu1 %683 }
 0x1a6   : > { %1302 = vmatpush1.bf16.msra.mxu0 %v884_v20  ;;  %v688_v57 = vsel %vm685_vm11, %v2606_v56, %v684_v0  ;;  %vm3005_vm11 = vcmask 498688   ;;  %v2081_v20 = vmov 0  }
 0x1a7   : > { %1903 = vmatprep.subr.bf16.mxu1 %v688_v57 }
 0x1a8   : > { %v540_v37 = vpop.permute.xlu0 %539 }
 0x1a9   : > { %v544_v16 = vsel %vm3004_vm9, %v2435_v35, %v540_v37  ;;  %v896_v30 = vpop.permute.xlu1 %895  ;;  %vm3006_vm9 = vcmask 490496  }
 0x1aa   : > { %1904 = vmatpush3.bf16.msra.mxu1 %v544_v16 }
 0x1ac   : > { %v898_v60 = vpop.permute.xlu0 %897 }
 0x1ad   : > { %v894_v62 = vpop.permute.xlu1 %893  ;;  %v903_v63 = vsel %vm901_vm6, %v896_v30, %v898_v60 }
 0x1ae   : > { %v902_v7 = vsel %vm901_vm6, %v894_v62, %v896_v30  ;;  %1303 = vmatprep.subr.bf16.mxu0 %v903_v63 }
 0x1af   : > { %1304 = vmatpush1.bf16.msra.mxu0 %v902_v7 }
 0x1b0   : > { %v702_v39 = vpop.permute.xlu0 %701  ;;  %1305 = vmatprep.subr.bf16.mxu0 %v2660_v10 }
 0x1b1   : > { %v558_v56 = vpop.permute.xlu1 %557  ;;  %v706_v13 = vsel %vm703_vm0, %v2623_v11, %v702_v39  ;;  %vm945_vm0 = vcmask 990208  }
 0x1b2   : > { %v562_v35 = vsel %vm3005_vm11, %v2457_v52, %v558_v56  ;;  %1905 = vmatprep.subr.bf16.mxu1 %v706_v13  ;;  %v2082_v13 = vmov 0.0  }
 0x1b3   : > { %1306 = vmatpush1.bf16.msra.mxu0 %v2281_v21  ;;  %1906 = vmatpush3.bf16.msra.mxu1 %v562_v35 }
 0x1b4   : > { %v720_v40 = vpop.permute.xlu0 %719  ;;  %1307 = vmatprep.subr.bf16.mxu0 %v2691_v26 }
 0x1b5   : > { %v576_v1 = vpop.permute.xlu1 %575  ;;  %v724_v41 = vsel %vm721_vm1, %v2644_v28, %v720_v40  ;;  %vm963_vm1 = vcmask 982016  }
 0x1b6   : > { %v580_v10 = vsel %vm3006_vm9, %v2479_v4, %v576_v1  ;;  %1907 = vmatprep.subr.bf16.mxu1 %v724_v41 }
 0x1b7   : > { %1308 = vmatpush1.bf16.msra.mxu0 %v2306_v34  ;;  %1908 = vmatpush3.bf16.msra.mxu1 %v580_v10 }
 0x1b8   : > { %v882_v11 = vpop.permute.xlu0 %881  ;;  %1309 = vmatprep.subr.bf16.mxu0 %v2727_v15 }
 0x1b9   : > { %v738_v52 = vpop.permute.xlu1 %737  ;;  %v886_v21 = vsel %vm883_vm4, %v880_v42, %v882_v11 }
 0x1ba   : > { %v742_v26 = vsel %vm739_vm2, %v2671_v45, %v738_v52  ;;  %1440 = vmatmul.mubr.bf16.vlgmr.msra.gmra.mrb[8].mxu1 %v2417_v25  ;;  %1915 = vmatprep.subr.bf16.mxu1 %v886_v21  ;;  %vm2083_vm2 = vmmov 0  }
 0x1bb   : > { %1310 = vmatpush1.bf16.msra.mxu0 %v2351_v51  ;;  %1916 = vmatpush3.bf16.msra.mxu1 %v742_v26 }
 0x1bc   : > { %v900_v4 = vpop.permute.xlu0 %899  ;;  %1479 = vmatprep.mubr.bf16.mxu1 %v2718_v43 }
 0x1bd   : > { %v756_v34 = vpop.permute.xlu1 %755  ;;  %v904_v28 = vsel %vm901_vm6, %v898_v60, %v900_v4  ;;  %v1177_v60 = vcombine.high %v2705_v32, %v2705_v32 }
 0x1be   : > { %v760_v15 = vsel %vm757_vm10, %v2698_v5, %v756_v34  ;;  %1917 = vmatprep.subr.bf16.mxu1 %v904_v28 }
 0x1bf   : > { %1918 = vmatpush3.bf16.msra.mxu1 %v760_v15  ;;  %v1191_v39 = vrot.slane %v1177_v60, %v2315_v38 }
 0x1c0   : > { %v940_v49 = vpop.permute.xlu0 %939 }
 0x1c1   : > { %v942_v45 = vpop.permute.xlu1 %941 }
 0x1c2   : > { %v947_v25 = vsel %vm945_vm0, %v940_v49, %v942_v45 }
 0x1c3   : > { %1311 = vmatprep.subr.bf16.mxu0 %v947_v25 }
 0x1c4   : > { %v938_v22 = vpop.permute.xlu0 %937 }
 0x1c5   : > { %v946_v51 = vsel %vm945_vm0, %v938_v22, %v940_v49  ;;  %v917_v23 = vpop.permute.xlu1 %916  ;;  %v1528_v22 = vand.u32 127, %v1164_v31 }
 0x1c6   : > { %1312 = vmatpush1.bf16.msra.mxu0 %v946_v51  ;;  %v918_v43 = vsel %vm235_vm3, %v2653_v36, %v917_v23  ;;  %vm981_vm3 = vcmask 973824  }
 0x1c7   : > { %1919 = vmatprep.subr.bf16.mxu1 %v918_v43  ;;  %vm1546_vm10 = vcmp.ge.s32.totalorder %v1528_v22, 22  ;;  %v1529_v51 = vadd.s32 128, %v1528_v22  ;;  %vm1570_vm11 = vcmp.ge.s32.totalorder %v1528_v22, 66  ;;  %vm1573_vm9 = vcmp.lt.s32.totalorder %v1528_v22, 82 }
 0x1c8   : > { %v774_v58 = vpop.permute.xlu0 %773  ;;  %v3012_v43 = vmov 0 }
 0x1c9   : > { %v778_v5 = vsel %vm775_vm8, %v2734_v17, %v774_v58  ;;  %v958_v29 = vpop.permute.xlu1 %957  ;;  %vm1549_vm8 = vcmp.lt.s32.totalorder %v1528_v22, 38  ;;  %v3014_v58 = vmov 0 }
 0x1ca   : > { %1920 = vmatpush3.bf16.msra.mxu1 %v778_v5  ;;  %v1530_v5 = vadd.s32 256, %v1528_v22 }
 0x1cc   : > { %v960_v61 = vpop.permute.xlu0 %959 }
 0x1cd   : > { %v956_v54 = vpop.permute.xlu1 %955  ;;  %v965_v14 = vsel %vm963_vm1, %v958_v29, %v960_v61 }
 0x1ce   : > { %v964_v33 = vsel %vm963_vm1, %v956_v54, %v958_v29  ;;  %1313 = vmatprep.subr.bf16.mxu0 %v965_v14 }
 0x1cf   : > { %1314 = vmatpush1.bf16.msra.mxu0 %v964_v33 }
 0x1d0   : > { %v924_v12 = vpop.permute.xlu0 %923 }
 0x1d1   : > { %v792_v2 = vpop.permute.xlu1 %791  ;;  %v925_v36 = vsel %vm253_vm5, %v2686_v55, %v924_v12  ;;  %vm3007_vm5 = vcmask 138240  }
 0x1d2   : > { %v796_v59 = vsel %vm793_vm12, %v2754_v44, %v792_v2  ;;  %1921 = vmatprep.subr.bf16.mxu1 %v925_v36  ;;  %vm1537_vm12 = vcmp.lt.s32.totalorder %v1528_v22, 16 }
 0x1d3   : > { %1922 = vmatpush3.bf16.msra.mxu1 %v796_v59 }
 0x1d4   : > { %v976_v17 = vpop.permute.xlu0 %975 }
 0x1d5   : > { %v978_v19 = vpop.permute.xlu1 %977 }
 0x1d6   : > { %v983_v18 = vsel %vm981_vm3, %v976_v17, %v978_v19 }
 0x1d7   : > { %1315 = vmatprep.subr.bf16.mxu0 %v983_v18 }
 0x1d8   : > { %v974_v46 = vpop.permute.xlu0 %973 }
 0x1d9   : > { %v982_v3 = vsel %vm981_vm3, %v974_v46, %v976_v17  ;;  %v931_v47 = vpop.permute.xlu1 %930 }
 0x1da   : > { %1316 = vmatpush1.bf16.msra.mxu0 %v982_v3  ;;  %v932_v42 = vsel %vm271_vm7, %v2720_v9, %v931_v47  ;;  %vm999_vm7 = vcmask 965632  }
 0x1db   : > { %1923 = vmatprep.subr.bf16.mxu1 %v932_v42 }
 0x1dc   : > { %v810_v55 = vpop.permute.xlu0 %809 }
 0x1dd   : > { %v814_v44 = vsel %vm3007_vm5, %v2768_v50, %v810_v55  ;;  %v944_v27 = vpop.permute.xlu1 %943  ;;  %1318 = vmatmul.mubr.bf16.vlgmr.msra.gmra.mrb[0].mxu0 %v2712_v6  ;;  %vm1619_vm5 = vcmp.ge.s32.totalorder %v1529_v51, 154 }
 0x1de   : > { %1924 = vmatpush3.bf16.msra.mxu1 %v814_v44  ;;  %v948_v24 = vsel %vm945_vm0, %v942_v45, %v944_v27  ;;  %1358 = vmatprep.mubr.bf16.mxu0 %v2081_v20  ;;  %vm1607_vm0 = vcmp.ge.s32.totalorder %v1529_v51, 132 }
 0x1df   : > { %1925 = vmatprep.subr.bf16.mxu1 %v948_v24 }
 0x1e0   : > { %v828_v0 = vpop.permute.xlu0 %827 }
 0x1e1   : > { %v832_v57 = vsel %vm829_vm14, %v2782_v48, %v828_v0  ;;  %v962_v37 = vpop.permute.xlu1 %961 }
 0x1e2   : > { %1926 = vmatpush3.bf16.msra.mxu1 %v832_v57  ;;  %v966_v9 = vsel %vm963_vm1, %v960_v61, %v962_v37  ;;  %vm1610_vm1 = vcmp.lt.s32.totalorder %v1529_v51, 148 }
 0x1e3   : > { %1927 = vmatprep.subr.bf16.mxu1 %v966_v9 }
 0x1e4   : > { %v846_v16 = vpop.permute.xlu0 %845 }
 0x1e5   : > { %v850_v50 = vsel %vm847_vm15, %v2791_v53, %v846_v16  ;;  %v994_v30 = vpop.permute.xlu1 %993  ;;  %vm1552_vm15 = vmand %vm1546_vm10, %vm1549_vm8  ;;  %vm1582_vm8 = vcmp.ge.s32.totalorder %v1528_v22, 88  ;;  %vm1585_vm10 = vcmp.lt.s32.totalorder %v1528_v22, 104 }
 0x1e6   : > { %1928 = vmatpush3.bf16.msra.mxu1 %v850_v50  ;;  %vm2885_vm4 = vmor %vm1537_vm12, %vm1552_vm15 }
 0x1e7   : > { %vm2891_vm12 = vmand %vm1607_vm0, %vm1610_vm1  ;;  %vm1643_vm0 = vcmp.ge.s32.totalorder %v1529_v51, 198  ;;  %vm1646_vm1 = vcmp.lt.s32.totalorder %v1529_v51, 214 }
 0x1e8   : > { %v996_v62 = vpop.permute.xlu0 %995 }
 0x1e9   : > { %v992_v63 = vpop.permute.xlu1 %991  ;;  %v1001_v7 = vsel %vm999_vm7, %v994_v30, %v996_v62 }
 0x1ea   : > { %v1000_v48 = vsel %vm999_vm7, %v992_v63, %v994_v30  ;;  %1326 = vmatprep.subr.bf16.mxu0 %v1001_v7 }
 0x1eb   : > { %1327 = vmatpush1.bf16.msra.mxu0 %v1000_v48 }
 0x1ec   : > { %v980_v56 = vpop.permute.xlu0 %979  ;;  %1939 = vmatprep.subr.bf16.mxu0 %v2082_v13 }
 0x1ed   : > { %v864_v53 = vpop.permute.xlu1 %863  ;;  %v984_v35 = vsel %vm981_vm3, %v978_v19, %v980_v56 }
 0x1ee   : > { %v868_v32 = vsel %vm865_vm13, %v2800_v8, %v864_v53  ;;  %1863 = vmatmul.mubr.msk.bf16.vlgmr.msra.gmra.mrb[0].mxu0 %vm829_vm14, %v1191_v39  ;;  %1929 = vmatprep.subr.bf16.mxu1 %v984_v35  ;;  %vm1561_vm13 = vcmp.lt.s32.totalorder %v1528_v22, 60 }
 0x1ef   : > { %1930 = vmatpush3.bf16.msra.mxu1 %v868_v32  ;;  %1941 = vmatprep.mubr.msk.bf16.mxu0 %vm2083_vm2, %v2082_v13  ;;  %vm1576_vm2 = vmand %vm1570_vm11, %vm1573_vm9 }
 0x1f0   : > { %v998_v40 = vpop.permute.xlu0 %997 }
 0x1f1   : > { %v1002_v1 = vsel %vm999_vm7, %v996_v62, %v998_v40  ;;  %vm1622_vm7 = vcmp.lt.s32.totalorder %v1529_v51, 170 }
 0x1f2   : > { %1480 = vmatmul.mubr.bf16.vlgmr.msra.gmra.mrb[12].mxu1 %v2712_v6  ;;  %1940 = vmatpush3.bf16.msra.mxu0 %v1002_v1  ;;  %vm1625_vm15 = vmand %vm1619_vm5, %vm1622_vm7  ;;  %vm1594_vm5 = vcmp.ge.s32.totalorder %v1528_v22, 110  ;;  %vm1597_vm7 = vcmp.lt.s32.totalorder %v1528_v22, 126 }
 0x1f3   : > { %vm1628_vm11 = vmor %vm2891_vm12, %vm1625_vm15 }
 0x1f4   : > { %vm2913_vm12 = vmand %vm1643_vm0, %vm1646_vm1 }
 0x1f5   : > { %v2877_v41 = vpop.f32.mrb[0].mxu1  ;;  %vm1600_vm15 = vmand %vm1594_vm5, %vm1597_vm7 }
 0x1f6   : > { %1942 = vmatmul.mubr.msk.bf16.vlgmr.msra.gmra.mrb[4].mxu0 %vm829_vm14, %v1191_v39  ;;  %v2880_v10 = vpop.f32.mrb[1].mxu1  ;;  %vm1558_vm14 = vcmp.ge.s32.totalorder %v1528_v22, 44 }
 0x1f7   : > { %v1241_v8 = vpop.f32.mrb[2].mxu1  ;;  %vm1564_vm6 = vmand %vm1558_vm14, %vm1561_vm13  ;;  %vm1631_vm14 = vcmp.ge.s32.totalorder %v1529_v51, 176 }
 0x1f8   : > { %v1242_v11 = vpop.f32.mrb[3].mxu1  ;;  %vm1567_vm3 = vmor %vm2885_vm4, %vm1564_vm6  ;;  %vm1634_vm4 = vcmp.lt.s32.totalorder %v1529_v51, 192 }
 0x1f9   : > { %vm2895_vm13 = vmor %vm1567_vm3, %vm1576_vm2  ;;  %vm1671_vm3 = vcmp.lt.s32.totalorder %v1530_v5, 258 }
 0x1fa   : > { %v3013_v43 = vsel %vm2895_vm13, 4294967295, %v3012_v43  ;;  %vm2899_vm6 = vmand %vm1582_vm8, %vm1585_vm10  ;;  %vm1680_vm8 = vcmp.ge.s32.totalorder %v1530_v5, 264  ;;  %vm1683_vm10 = vcmp.lt.s32.totalorder %v1530_v5, 280 }
 0x1fb   : > { %v3015_v58 = vsel %vm2899_vm6, 4294967295, %v3014_v58  ;;  %vm1637_vm9 = vmand %vm1631_vm14, %vm1634_vm4  ;;  %vm1655_vm14 = vcmp.ge.s32.totalorder %v1529_v51, 220  ;;  %vm1658_vm4 = vcmp.lt.s32.totalorder %v1529_v51, 236  ;;  %vm3024_vm7 = vnez %v3013_v43 }
 0x1fc   : > { %vm2909_vm2 = vmor %vm1628_vm11, %vm1637_vm9  ;;  %vm1692_vm11 = vcmp.ge.s32.totalorder %v1530_v5, 286  ;;  %vm1695_vm9 = vcmp.lt.s32.totalorder %v1530_v5, 302 }
 0x1fd   : > { %vm1686_vm6 = vmand %vm1680_vm8, %vm1683_vm10  ;;  %vm3025_vm8 = vnez %v3015_v58 }
 0x1fe   : > { %vm1652_vm13 = vmor %vm2909_vm2, %vm2913_vm12  ;;  %vm1704_vm12 = vcmp.ge.s32.totalorder %v1530_v5, 308 }
 0x1ff   : > { %vm1661_vm0 = vmand %vm1655_vm14, %vm1658_vm4  ;;  %vm1707_vm4 = vcmp.lt.s32.totalorder %v1530_v5, 324 }
 0x200   : > { %vm2921_vm1 = vmor %vm1671_vm3, %vm1686_vm6  ;;  %vm1667_vm6 = vcmp.ge.s32.totalorder %v1529_v51, 242 }
 0x201   : > { %vm2925_vm5 = vmand %vm1692_vm11, %vm1695_vm9 }
 0x202   : > { %vm3026_vm10 = vmor %vm3024_vm7, %vm3025_vm8  ;;  %vm1716_vm7 = vcmp.ge.s32.totalorder %v1530_v5, 330  ;;  %vm1719_vm8 = vcmp.lt.s32.totalorder %v1530_v5, 346 }
 0x203   : > { %vm2934_vm2 = vmor %vm3026_vm10, %vm1600_vm15 }
 0x204   : > { %vm1664_vm14 = vmor %vm1652_vm13, %vm1661_vm0  ;;  %v1865_v18 = vsel %vm2934_vm2, 1.0, %v2082_v13 }
 0x205   : > { %vm1701_vm3 = vmor %vm2921_vm1, %vm2925_vm5  ;;  %vm1735_vm1 = vcmask 1043456  }
 0x206   : > { %vm1710_vm11 = vmand %vm1704_vm12, %vm1707_vm4 }
 0x207   : > { %vm1676_vm9 = vmor %vm1664_vm14, %vm1667_vm6 }
 0x208   : > { %vm2944_vm15 = vmor %vm1701_vm3, %vm1710_vm11  ;;  %v1866_v46 = vsel %vm1676_vm9, 1.0, %v2082_v13 }
 0x209   : > { %vm1722_vm13 = vmand %vm1716_vm7, %vm1719_vm8 }
 0x20a   : > { %vm1725_vm0 = vmor %vm2944_vm15, %vm1722_vm13 }
 0x20b   : > { %v1867_v37 = vsel %vm1725_vm0, 1.0, %v2082_v13 }
 0x244   : > { %v1887_v52 = vpop.f32.mrb[4].mxu1 }
 0x245   : > { %v1888_v21 = vpop.f32.mrb[5].mxu1 }
 0x246   : > { %v1889_v26 = vadd.f32 %v1888_v21, %v1887_v52  ;;  %v1890_v4 = vpop.f32.mrb[6].mxu1 }
 0x247   : > { %v1891_v34 = vpop.f32.mrb[7].mxu1 }
 0x28d   : > { %v1909_v28 = vpop.f32.mrb[8].mxu1 }
 0x28e   : > { %v1910_v15 = vpop.f32.mrb[9].mxu1 }
 0x28f   : > { %v1911_v49 = vadd.f32 %v1910_v15, %v1909_v28  ;;  %v1912_v45 = vpop.f32.mrb[10].mxu1 }
 0x290   : > { %v1913_v25 = vpop.f32.mrb[11].mxu1 }
 0x291   : > { %v2882_v6 = vadd.f32 %v1911_v49, %v1889_v26 }
 0x2c1   : > { %v1360_v12 = vpop.f32.mrb[0].mxu0 }
 0x2c2   : > { %v1945_v2 = vadd.f32 %v1360_v12, %v2877_v41  ;;  %v1362_v36 = vpop.f32.mrb[1].mxu0 }
 0x2c3   : > { %v1946_v59 = vadd.f32 %v1362_v36, %v2880_v10  ;;  %v1364_v17 = vpop.f32.mrb[2].mxu0 }
 0x2c4   : > { %v1365_v3 = vpop.f32.mrb[3].mxu0  ;;  %v1732_v55 = vmul.f32 %v1945_v2, %v1865_v18 }
 0x2c5   : > { %v1931_v47 = vpop.f32.mrb[12].mxu1  ;;  %v1733_v44 = vmul.f32 %v1946_v59, %v1866_v46 }
 0x2c6   : > { %v1932_v42 = vpop.f32.mrb[13].mxu1  ;;  %v1736_v16 = vsel %vm1735_vm1, %v1732_v55, 0.0 }
 0x2c7   : > { %v1933_v27 = vadd.f32 %v1932_v42, %v1931_v47  ;;  %v1934_v24 = vpop.f32.mrb[14].mxu1  ;;  %v1737_v50 = vsel %vm1735_vm1, %v1733_v44, 0.0 }
 0x2c8   : > { %v1935_v20 = vpop.f32.mrb[15].mxu1  ;;  %v1738_v7 = vadd.f32 %v1737_v50, %v1736_v16 }
 0x2c9   : > { %v1482_v0 = vadd.f32 %v1933_v27, %v2882_v6  ;;  %v1521_v57 = vpop.f32.mrb[4].mxu0 }
 0x2ca   : > { %v1943_v9 = vpop.f32.mrb[5].mxu0 }
 0x2cb   : > { %v1522_v30 = vadd.f32 %v1521_v57, %v1482_v0  ;;  %v1524_v60 = vpop.f32.mrb[6].mxu0 }
 0x2cc   : > { %v1944_v62 = vpop.f32.mrb[7].mxu0 }
 0x2cd   : > { %v1734_v63 = vmul.f32 %v1867_v37, %v1522_v30 }
 0x2cf   : > { %v1739_v48 = vsel %vm1735_vm1, %v1734_v63, 0.0 }
 0x2d0   : > { %v1740_v39 = vadd.f32 %v1739_v48, %v1738_v7 }
 0x2d2   : > { %1741 = vadd.xlane.f32.xlu1 %v1740_v39 }
 0x35f   : > { %v1742_v56 = vpop.xlane.xlu1 %1741 }
 0x360   : > { %v1743_v53 = vmul.f32 0.00390625, %v1742_v56 }
 0x362   : > { %v1744_v35 = vsub.f32 %v1945_v2, %v1743_v53  ;;  %v1745_v32 = vsub.f32 %v1946_v59, %v1743_v53  ;;  %v1746_v40 = vsub.f32 %v1522_v30, %v1743_v53 }
 0x364   : > { %v1747_v13 = vmul.f32 %v1865_v18, %v1744_v35  ;;  %v1748_v1 = vmul.f32 %v1866_v46, %v1745_v32  ;;  %v1749_v41 = vmul.f32 %v1867_v37, %v1746_v40 }
 0x366   : > { %v1750_v10 = vmul.f32 %v1747_v13, %v1747_v13  ;;  %v1751_v8 = vmul.f32 %v1748_v1, %v1748_v1  ;;  %v1752_v11 = vmul.f32 %v1749_v41, %v1749_v41 }
 0x368   : > { %v1753_v52 = vsel %vm1735_vm1, %v1750_v10, 0.0  ;;  %v1754_v21 = vsel %vm1735_vm1, %v1751_v8, 0.0  ;;  %v1756_v4 = vsel %vm1735_vm1, %v1752_v11, 0.0 }
 0x369   : > { %v1755_v26 = vadd.f32 %v1754_v21, %v1753_v52 }
 0x36b   : > { %v1757_v34 = vadd.f32 %v1756_v4, %v1755_v26 }
 0x36d   : > { %1758 = vadd.xlane.f32.xlu0 %v1757_v34 }
 0x3fa   : > { %v1759_v28 = vpop.xlane.xlu0 %1758 }
 0x3fb   : > { %v1760_v15 = vmul.f32 0.00390625, %v1759_v28 }
 0x3fd   : > { %v1761_v49 = vadd.f32 1e-05, %v1760_v15 }
 0x3ff   : > { %2023 = vrsqrt.f32 %v1761_v49 }
 0x409   : > { %v2024_v45 = vpop.eup %2023 }
 0x40a   : > { %v1763_v25 = vmul.f32 %v2024_v45, %v1744_v35  ;;  %v1764_v6 = vmul.f32 %v2024_v45, %v1745_v32  ;;  %v1765_v22 = vmul.f32 %v2024_v45, %v1746_v40 }
 0x40c   : > { %v1766_v51 = vmul.f32 0.01, %v1763_v25  ;;  %v1767_v23 = vmul.f32 0.01, %v1764_v6  ;;  %v1768_v31 = vmul.f32 0.01, %v1765_v22 }
 0x40e   : > { %v1769_v43 = vmax.f32 %v1763_v25, %v1766_v51  ;;  %v1770_v58 = vmax.f32 %v1764_v6, %v1767_v23  ;;  %v1771_v5 = vmax.f32 %v1765_v22, %v1768_v31 }
 0x410   : > { %v1774_v29 = vpack.c.bf16 %v1771_v5, %v1771_v5  ;;  %v1868_v61 = vpack.c.bf16 %v1770_v58, %v1769_v43 }
 0x412   : > { %v1785_v54 = vrot.slane %v1868_v61, %v2315_v38  ;;  %v1792_v14 = vrot.slane %v1774_v29, %v2315_v38 }
 0x414   : > { %v1793_v33 = vcombine.low %v1785_v54, %v1792_v14 }
 0x416   : > { %1795 = vst [vmem:[%s143_s3] sm:$0x3f] %v1793_v33 }
 0x417 PF: > { %s12_s9 = sadd.s32 1, %s2033_s9  }
 0x418   : > { %p9_p4 = scmp.ge.s32.totalorder %s12_s9, 4  }
 0x41a   :  { %11 = sbr.rel (!%p9_p4) target bundleno = 1 (0x1), region = 58 }

</bundles_post_ra>
